<compile_context>
chip_gen: v6e
topology: v6e:2x2x1
jax: 0.10.0
libtpu: 0.0.40
codegen_flags: <defaults>
</compile_context>

<pallas_src>
import jax
import jax.numpy as jnp
from jax.experimental import pallas as pl
from jax.experimental.pallas import tpu as pltpu


def _round_up(n, m):
    return ((n + m - 1) // m) * m


def _bilstm_maxpool_kernel(has_pad_ref, mf_ref, mb_ref, xf_ref, xb_ref,
                           wih_f_ref, wih_b_ref, bf_ref, bb_ref,
                           whh_f_ref, whh_b_ref,
                           out_ref,
                           xpf_ref, xpb_ref,
                           hf_ref, cf_ref, hb_ref, cb_ref, mxf_ref, mxb_ref):
    """One (batch-tile, time-window) grid step of a bidirectional LSTM + max pool.

    has_pad_ref : (BB, 1)        f32   1.0 iff len[b] < T (row has padded time steps)
    mf_ref      : (W, BB, 1)     f32   validity mask, fwd time window (ascending t)
    mb_ref      : (W, BB, 1)     f32   validity mask, bwd time window (ascending t)
    xf_ref      : (W, BB, E)     bf16  embeddings, fwd time window
    xb_ref      : (W, BB, E)     bf16  embeddings, bwd time window
    wih_*_ref   : (E, 4H)        bf16  input weights per direction (gate order i,f,g,o)
    b*_ref      : (1, 4H)        f32   b_ih + b_hh per direction
    whh_*_ref   : (H, 4H)        bf16  recurrent weights per direction
    out_ref     : (BB, 2H)       f32   max-pooled sentence embedding (fwd | bwd)
    xp*_ref     : (W*BB, 4H)     f32   scratch: per-window hoisted input projections
    h*/c*/mx*   : (BB, H)        f32   scratch: recurrent state & running max (carried
                                       across the window grid axis)
    """
    W, BB, E = xf_ref.shape
    H = whh_f_ref.shape[0]
    wi = pl.program_id(1)

    # ---- per-batch-tile state init (first time window only) -------------------------
    @pl.when(wi == 0)
    def _init():
        z = jnp.zeros((BB, H), jnp.float32)
        hf_ref[...] = z
        cf_ref[...] = z
        hb_ref[...] = z
        cb_ref[...] = z
        # max_pad=True: padded steps of a short sequence emit exactly 0 and join the max.
        # Equivalent, cheaper form: seed the running max with 0 for rows that have at
        # least one padded step and -inf for full-length rows; the loop then only folds
        # VALID steps into the max.
        zeros_h = jnp.zeros((BB, H), jnp.float32)
        neg_inf = jnp.full((BB, H), -jnp.inf, jnp.float32)
        mx0 = jnp.where(has_pad_ref[...] != 0.0, zeros_h, neg_inf)
        mxf_ref[...] = mx0
        mxb_ref[...] = mx0

    # ---- hoisted input projection for this window: one batched MXU matmul per dir ----
    xpf_ref[...] = (
        jnp.dot(xf_ref[...].reshape(W * BB, E), wih_f_ref[...],
                preferred_element_type=jnp.float32) + bf_ref[...])
    xpb_ref[...] = (
        jnp.dot(xb_ref[...].reshape(W * BB, E), wih_b_ref[...],
                preferred_element_type=jnp.float32) + bb_ref[...])

    whh_f = whh_f_ref[...]                       # hoist recurrent weights out of the loop
    whh_b = whh_b_ref[...]

    def lstm_step(xp, h, c, mx, m, whh):
        # xp: (BB, 4H) f32 precomputed x@Wih + b ; h, c, mx: (BB, H) f32 ; m: (BB, 1) bool
        pre = xp + jnp.dot(h.astype(jnp.bfloat16), whh,
                           preferred_element_type=jnp.float32)
        i_g = jax.nn.sigmoid(pre[:, 0 * H:1 * H])
        f_g = jax.nn.sigmoid(pre[:, 1 * H:2 * H])
        g_g = jnp.tanh(pre[:, 2 * H:3 * H])
        o_g = jax.nn.sigmoid(pre[:, 3 * H:4 * H])
        c_new = f_g * c + i_g * g_g
        h_new = o_g * jnp.tanh(c_new)
        # packed-sequence semantics with 3 selects: valid steps advance state & running
        # max; steps past the length (incl. structural time padding) freeze everything.
        c = jnp.where(m, c_new, c)
        h = jnp.where(m, h_new, h)
        mx = jnp.where(m, jnp.maximum(mx, h_new), mx)
        return h, c, mx

    h_f = hf_ref[...]
    c_f = cf_ref[...]
    h_b = hb_ref[...]
    c_b = cb_ref[...]
    mx_f = mxf_ref[...]
    mx_b = mxb_ref[...]

    # Short static unroll over the window (W small); fwd step i and bwd step W-1-i share
    # an iteration so two independent recurrent MXU matmuls are in flight per step.  The
    # serial "loop over all T" lives on the window grid axis, with state in VMEM scratch.
    for i in range(W):
        ib = W - 1 - i
        m_f = mf_ref[i] != 0.0               # (BB, 1) bool
        m_b = mb_ref[ib] != 0.0
        h_f, c_f, mx_f = lstm_step(xpf_ref[pl.ds(i * BB, BB), :],
                                   h_f, c_f, mx_f, m_f, whh_f)
        h_b, c_b, mx_b = lstm_step(xpb_ref[pl.ds(ib * BB, BB), :],
                                   h_b, c_b, mx_b, m_b, whh_b)

    hf_ref[...] = h_f
    cf_ref[...] = c_f
    hb_ref[...] = h_b
    cb_ref[...] = c_b
    mxf_ref[...] = mx_f
    mxb_ref[...] = mx_b

    # ---- finalize: write the pooled sentence embedding after the last window --------
    @pl.when(wi == pl.num_programs(1) - 1)
    def _finalize():
        if H % 128 == 0:                     # lane-aligned direct half writes
            out_ref[:, 0:H] = mx_f
            out_ref[:, H:2 * H] = mx_b
        else:                                # toy H: single full-tile store
            out_ref[...] = jnp.concatenate([mx_f, mx_b], axis=-1)


def infersent_forward(x, lengths, params, *, block_b=128, window=4):
    """x: (T, B, E) f32 (padded slots zero), lengths: (B,) int -> (B, 2H) f32."""
    T, B, E = x.shape
    H = params["whh_f"].shape[0]

    # Batch tile: big by default (MXU row occupancy), capped at the padded actual batch.
    block_b = _round_up(max(8, min(block_b, _round_up(B, 8))), 8)
    window = max(1, min(window, T))
    Bp = _round_up(B, block_b)
    Tp = _round_up(T, window)
    nb, nw = Bp // block_b, Tp // window

    if Tp != T or Bp != B:
        x = jnp.pad(x, ((0, Tp - T), (0, Bp - B), (0, 0)))
    if Bp != B:
        lengths = jnp.pad(lengths, (0, Bp - B))

    x_bf = x.astype(jnp.bfloat16)                                    # halve x DMA bytes
    mask = (jnp.arange(Tp)[:, None] < lengths[None, :]).astype(jnp.float32)[:, :, None]
    has_pad = (lengths < T).astype(jnp.float32)[:, None]             # (Bp, 1)

    wih_f = params["wih_f"].astype(jnp.bfloat16)                     # (E, 4H)
    wih_b = params["wih_b"].astype(jnp.bfloat16)
    b_f = params["b_f"].astype(jnp.float32)                          # (1, 4H)
    b_b = params["b_b"].astype(jnp.float32)
    whh_f = params["whh_f"].astype(jnp.bfloat16)                     # (H, 4H)
    whh_b = params["whh_b"].astype(jnp.bfloat16)

    # Scoped VMEM budget derived per generation: well above the 32 MiB default on
    # v5e/v6e (128 MiB physical), ~0.8x physical on v7x (64 MiB).
    try:
        vmem_phys = int(pltpu.get_tpu_info().vmem_capacity_bytes)
    except Exception:
        vmem_phys = 128 * 1024 * 1024
    vmem_limit = int(min(96 * 1024 * 1024, 0.8 * vmem_phys))

    def _call(single_buffer_weights):
        def wspec(shape):
            # Weights have a constant index map; single-buffer them to halve their
            # resident VMEM (prerequisite for canonical H on v7x).
            if single_buffer_weights:
                return pl.BlockSpec(shape, lambda bi, wi: (0, 0),
                                    pipeline_mode=pl.Buffered(1))
            return pl.BlockSpec(shape, lambda bi, wi: (0, 0))

        in_specs = [
            pl.BlockSpec((block_b, 1), lambda bi, wi: (bi, 0)),                  # has_pad
            pl.BlockSpec((window, block_b, 1), lambda bi, wi: (wi, bi, 0)),      # mask fwd
            pl.BlockSpec((window, block_b, 1),
                         lambda bi, wi: (nw - 1 - wi, bi, 0)),                   # mask bwd
            pl.BlockSpec((window, block_b, E), lambda bi, wi: (wi, bi, 0)),      # x fwd
            pl.BlockSpec((window, block_b, E),
                         lambda bi, wi: (nw - 1 - wi, bi, 0)),                   # x bwd
            wspec((E, 4 * H)),                                                   # Wih fwd
            wspec((E, 4 * H)),                                                   # Wih bwd
            wspec((1, 4 * H)),                                                   # b fwd
            wspec((1, 4 * H)),                                                   # b bwd
            wspec((H, 4 * H)),                                                   # Whh fwd
            wspec((H, 4 * H)),                                                   # Whh bwd
        ]
        return pl.pallas_call(
            _bilstm_maxpool_kernel,
            out_shape=jax.ShapeDtypeStruct((Bp, 2 * H), jnp.float32),
            grid=(nb, nw),
            in_specs=in_specs,
            out_specs=pl.BlockSpec((block_b, 2 * H), lambda bi, wi: (bi, 0)),
            scratch_shapes=[
                pltpu.VMEM((window * block_b, 4 * H), jnp.float32),   # xp fwd (windowed)
                pltpu.VMEM((window * block_b, 4 * H), jnp.float32),   # xp bwd (windowed)
                pltpu.VMEM((block_b, H), jnp.float32),                # h fwd
                pltpu.VMEM((block_b, H), jnp.float32),                # c fwd
                pltpu.VMEM((block_b, H), jnp.float32),                # h bwd
                pltpu.VMEM((block_b, H), jnp.float32),                # c bwd
                pltpu.VMEM((block_b, H), jnp.float32),                # running max fwd
                pltpu.VMEM((block_b, H), jnp.float32),                # running max bwd
            ],
            compiler_params=pltpu.CompilerParams(
                dimension_semantics=("parallel", "arbitrary"),
                vmem_limit_bytes=vmem_limit,
            ),
        )(has_pad, mask, mask, x_bf, x_bf,
          wih_f, wih_b, b_f, b_b, whh_f, whh_b)

    try:
        out = _call(True)            # preferred: single-buffered weights
    except Exception:
        out = _call(False)           # fallback if pipeline_mode=pl.Buffered(1) unsupported
    return out[:B]


def init_params(key, word_emb_dim, enc_lstm_dim):
    """Deterministic LSTM params, PyTorch-style U(-1/sqrt(H), 1/sqrt(H)) init."""
    E, H = word_emb_dim, enc_lstm_dim
    bound = 1.0 / float(H) ** 0.5
    keys = jax.random.split(key, 10)
    u = lambda k, shape: jax.random.uniform(k, shape, jnp.float32, -bound, bound)
    return {
        # stored transposed for row-major (B,E)@(E,4H) matmuls; gate order i,f,g,o
        "wih_f": u(keys[0], (E, 4 * H)),
        "whh_f": u(keys[1], (H, 4 * H)),
        "b_f": u(keys[2], (1, 4 * H)) + u(keys[3], (1, 4 * H)),   # b_ih + b_hh
        "wih_b": u(keys[4], (E, 4 * H)),
        "whh_b": u(keys[5], (H, 4 * H)),
        "b_b": u(keys[6], (1, 4 * H)) + u(keys[7], (1, 4 * H)),
    }


# ---------------- pure-JAX f32 reference (for verification) ----------------
def _ref_dir(x, lengths, wih, whh, b, reverse):
    T, B, _ = x.shape
    H = whh.shape[0]
    h = jnp.zeros((B, H), jnp.float32)
    c = jnp.zeros((B, H), jnp.float32)
    outs = [None] * T
    order = range(T - 1, -1, -1) if reverse else range(T)
    for t in order:
        gates = x[t] @ wih + h @ whh + b
        i_g = jax.nn.sigmoid(gates[:, :H])
        f_g = jax.nn.sigmoid(gates[:, H:2 * H])
        g_g = jnp.tanh(gates[:, 2 * H:3 * H])
        o_g = jax.nn.sigmoid(gates[:, 3 * H:])
        c_new = f_g * c + i_g * g_g
        h_new = o_g * jnp.tanh(c_new)
        mask = (t < lengths)[:, None]
        c = jnp.where(mask, c_new, c)
        h = jnp.where(mask, h_new, h)
        outs[t] = jnp.where(mask, h_new, 0.0)
    return jnp.stack(outs)  # (T, B, H)


def infersent_reference(x, lengths, params):
    fwd = _ref_dir(x, lengths, params["wih_f"], params["whh_f"], params["b_f"], False)
    bwd = _ref_dir(x, lengths, params["wih_b"], params["whh_b"], params["b_b"], True)
    return jnp.concatenate([fwd, bwd], axis=-1).max(axis=0)


if __name__ == "__main__":
    # small shapes consistent with the module: seq=8, batch=4,
    # word_emb_dim=32, enc_lstm_dim=32  => embedding dim 64
    T, B, E, H = 8, 4, 32, 32
    key = jax.random.PRNGKey(0)
    kx, kp = jax.random.split(key)

    lengths = jnp.array([8, 5, 3, 6], dtype=jnp.int32)
    x = jax.random.normal(kx, (T, B, E), jnp.float32)
    # zero padded positions, like InferSentModel.get_batch builds its batches
    tmask = (jnp.arange(T)[:, None] < lengths[None, :]).astype(jnp.float32)
    x = x * tmask[:, :, None]

    params = init_params(kp, E, H)

    emb = jax.block_until_ready(infersent_forward(x, lengths, params))
    ref = infersent_reference(x, lengths, params)

    assert emb.shape == (B, 2 * H), emb.shape
    err = float(jnp.max(jnp.abs(emb - ref)))
    # kernel uses bf16 MXU operands (f32 accumulate) vs pure-f32 reference
    assert err < 2e-2, err
    print("KERNEL_OK")
</pallas_src>

<mosaic_0001>
module attributes {stable_mosaic.version = 11 : i64} {
  func.func @_bilstm_maxpool_kernel(%arg0: i32, %arg1: i32, %arg2: memref<8x1xf32, #tpu.memory_space<vmem>>, %arg3: memref<4x8x1xf32, #tpu.memory_space<vmem>>, %arg4: memref<4x8x1xf32, #tpu.memory_space<vmem>>, %arg5: memref<4x8x32xbf16, #tpu.memory_space<vmem>>, %arg6: memref<4x8x32xbf16, #tpu.memory_space<vmem>>, %arg7: memref<32x128xbf16, #tpu.memory_space<vmem>>, %arg8: memref<32x128xbf16, #tpu.memory_space<vmem>>, %arg9: memref<1x128xf32, #tpu.memory_space<vmem>>, %arg10: memref<1x128xf32, #tpu.memory_space<vmem>>, %arg11: memref<32x128xbf16, #tpu.memory_space<vmem>>, %arg12: memref<32x128xbf16, #tpu.memory_space<vmem>>, %arg13: memref<8x64xf32, #tpu.memory_space<vmem>>, %arg14: memref<32x128xf32, #tpu.memory_space<vmem>>, %arg15: memref<32x128xf32, #tpu.memory_space<vmem>>, %arg16: memref<8x32xf32, #tpu.memory_space<vmem>>, %arg17: memref<8x32xf32, #tpu.memory_space<vmem>>, %arg18: memref<8x32xf32, #tpu.memory_space<vmem>>, %arg19: memref<8x32xf32, #tpu.memory_space<vmem>>, %arg20: memref<8x32xf32, #tpu.memory_space<vmem>>, %arg21: memref<8x32xf32, #tpu.memory_space<vmem>>) attributes {dimension_semantics = [#tpu.dimension_semantics<parallel>, #tpu.dimension_semantics<arbitrary>], iteration_bounds = array<i64: 1, 2>, scalar_prefetch = 0 : i64, scratch_operands = 8 : i64, tpu.core_type = #tpu.core_type<tc>, window_params = [{transform_indices = @transform_0, window_bounds = array<i64: 8, 1>}, {transform_indices = @transform_1, window_bounds = array<i64: 4, 8, 1>}, {transform_indices = @transform_2, window_bounds = array<i64: 4, 8, 1>}, {transform_indices = @transform_3, window_bounds = array<i64: 4, 8, 32>}, {transform_indices = @transform_4, window_bounds = array<i64: 4, 8, 32>}, {pipeline_mode = #tpu.pipeline_mode<synchronous>, transform_indices = @transform_5, window_bounds = array<i64: 32, 128>}, {pipeline_mode = #tpu.pipeline_mode<synchronous>, transform_indices = @transform_6, window_bounds = array<i64: 32, 128>}, {pipeline_mode = #tpu.pipeline_mode<synchronous>, transform_indices = @transform_7, window_bounds = array<i64: 1, 128>}, {pipeline_mode = #tpu.pipeline_mode<synchronous>, transform_indices = @transform_8, window_bounds = array<i64: 1, 128>}, {pipeline_mode = #tpu.pipeline_mode<synchronous>, transform_indices = @transform_9, window_bounds = array<i64: 32, 128>}, {pipeline_mode = #tpu.pipeline_mode<synchronous>, transform_indices = @transform_10, window_bounds = array<i64: 32, 128>}, {transform_indices = @transform_11, window_bounds = array<i64: 8, 64>}]} {
    %c0_i32 = arith.constant 0 : i32
    %0 = arith.cmpi eq, %arg1, %c0_i32 : i32
    %1 = arith.extui %0 : i1 to i32
    %c0_i32_0 = arith.constant 0 : i32
    %2 = arith.cmpi ne, %1, %c0_i32_0 : i32
    scf.if %2 {
      %cst_122 = arith.constant 0.000000e+00 : f32
      %380 = vector.broadcast %cst_122 : f32 to vector<8x32xf32>
      %c0_123 = arith.constant 0 : index
      %c0_124 = arith.constant 0 : index
      %381 = vector.load %arg16[%c0_123, %c0_124] : memref<8x32xf32, #tpu.memory_space<vmem>>, vector<8x32xf32>
      tpu.vector_store %arg16[%c0_123, %c0_124], %380 {strides = array<i32>} : memref<8x32xf32, #tpu.memory_space<vmem>>, vector<8x32xf32>,
      %c0_125 = arith.constant 0 : index
      %c0_126 = arith.constant 0 : index
      %382 = vector.load %arg17[%c0_125, %c0_126] : memref<8x32xf32, #tpu.memory_space<vmem>>, vector<8x32xf32>
      tpu.vector_store %arg17[%c0_125, %c0_126], %380 {strides = array<i32>} : memref<8x32xf32, #tpu.memory_space<vmem>>, vector<8x32xf32>,
      %c0_127 = arith.constant 0 : index
      %c0_128 = arith.constant 0 : index
      %383 = vector.load %arg18[%c0_127, %c0_128] : memref<8x32xf32, #tpu.memory_space<vmem>>, vector<8x32xf32>
      tpu.vector_store %arg18[%c0_127, %c0_128], %380 {strides = array<i32>} : memref<8x32xf32, #tpu.memory_space<vmem>>, vector<8x32xf32>,
      %c0_129 = arith.constant 0 : index
      %c0_130 = arith.constant 0 : index
      %384 = vector.load %arg19[%c0_129, %c0_130] : memref<8x32xf32, #tpu.memory_space<vmem>>, vector<8x32xf32>
      tpu.vector_store %arg19[%c0_129, %c0_130], %380 {strides = array<i32>} : memref<8x32xf32, #tpu.memory_space<vmem>>, vector<8x32xf32>,
      %cst_131 = arith.constant 0.000000e+00 : f32
      %385 = vector.broadcast %cst_131 : f32 to vector<8x32xf32>
      %cst_132 = arith.constant 0xFF800000 : f32
      %386 = vector.broadcast %cst_132 : f32 to vector<8x32xf32>
      %c0_133 = arith.constant 0 : index
      %c0_134 = arith.constant 0 : index
      %387 = vector.load %arg2[%c0_133, %c0_134] : memref<8x1xf32, #tpu.memory_space<vmem>>, vector<8x1xf32>
      %cst_135 = arith.constant 0.000000e+00 : f32
      %388 = vector.broadcast %cst_135 : f32 to vector<8x1xf32>
      %389 = arith.cmpf one, %387, %388 : vector<8x1xf32>
      %390 = vector.shape_cast %389 : vector<8x1xi1> to vector<8x1xi1>
      %391 = vector.broadcast %390 : vector<8x1xi1> to vector<8x32xi1>
      %392 = arith.select %391, %385, %386 : vector<8x32xi1>, vector<8x32xf32>
      %c0_136 = arith.constant 0 : index
      %c0_137 = arith.constant 0 : index
      %393 = vector.load %arg20[%c0_136, %c0_137] : memref<8x32xf32, #tpu.memory_space<vmem>>, vector<8x32xf32>
      tpu.vector_store %arg20[%c0_136, %c0_137], %392 {strides = array<i32>} : memref<8x32xf32, #tpu.memory_space<vmem>>, vector<8x32xf32>,
      %c0_138 = arith.constant 0 : index
      %c0_139 = arith.constant 0 : index
      %394 = vector.load %arg21[%c0_138, %c0_139] : memref<8x32xf32, #tpu.memory_space<vmem>>, vector<8x32xf32>
      tpu.vector_store %arg21[%c0_138, %c0_139], %392 {strides = array<i32>} : memref<8x32xf32, #tpu.memory_space<vmem>>, vector<8x32xf32>,
    } else {
    }
    %c0 = arith.constant 0 : index
    %c0_1 = arith.constant 0 : index
    %c0_2 = arith.constant 0 : index
    %3 = vector.load %arg5[%c0, %c0_1, %c0_2] : memref<4x8x32xbf16, #tpu.memory_space<vmem>>, vector<4x8x32xbf16>
    %4 = vector.shape_cast %3 : vector<4x8x32xbf16> to vector<32x32xbf16>
    %c0_3 = arith.constant 0 : index
    %c0_4 = arith.constant 0 : index
    %5 = vector.load %arg7[%c0_3, %c0_4] : memref<32x128xbf16, #tpu.memory_space<vmem>>, vector<32x128xbf16>
    %cst = arith.constant dense<0.000000e+00> : vector<32x128xf32>
    %6 = tpu.matmul %4, %5, %cst {dimension_numbers = #tpu.dot_dimension_numbers<[1], [0], [0], [1], [0, 0, 1, 1], [], []>} : vector<32x32xbf16>, vector<32x128xbf16>, vector<32x128xf32> -> vector<32x128xf32>
    %c0_5 = arith.constant 0 : index
    %c0_6 = arith.constant 0 : index
    %7 = vector.load %arg9[%c0_5, %c0_6] : memref<1x128xf32, #tpu.memory_space<vmem>>, vector<1x128xf32>
    %8 = vector.broadcast %7 : vector<1x128xf32> to vector<32x128xf32>
    %9 = arith.addf %6, %8 : vector<32x128xf32>
    %c0_7 = arith.constant 0 : index
    %c0_8 = arith.constant 0 : index
    %10 = vector.load %arg14[%c0_7, %c0_8] : memref<32x128xf32, #tpu.memory_space<vmem>>, vector<32x128xf32>
    tpu.vector_store %arg14[%c0_7, %c0_8], %9 {strides = array<i32>} : memref<32x128xf32, #tpu.memory_space<vmem>>, vector<32x128xf32>,
    %c0_9 = arith.constant 0 : index
    %c0_10 = arith.constant 0 : index
    %c0_11 = arith.constant 0 : index
    %11 = vector.load %arg6[%c0_9, %c0_10, %c0_11] : memref<4x8x32xbf16, #tpu.memory_space<vmem>>, vector<4x8x32xbf16>
    %12 = vector.shape_cast %11 : vector<4x8x32xbf16> to vector<32x32xbf16>
    %c0_12 = arith.constant 0 : index
    %c0_13 = arith.constant 0 : index
    %13 = vector.load %arg8[%c0_12, %c0_13] : memref<32x128xbf16, #tpu.memory_space<vmem>>, vector<32x128xbf16>
    %cst_14 = arith.constant dense<0.000000e+00> : vector<32x128xf32>
    %14 = tpu.matmul %12, %13, %cst_14 {dimension_numbers = #tpu.dot_dimension_numbers<[1], [0], [0], [1], [0, 0, 1, 1], [], []>} : vector<32x32xbf16>, vector<32x128xbf16>, vector<32x128xf32> -> vector<32x128xf32>
    %c0_15 = arith.constant 0 : index
    %c0_16 = arith.constant 0 : index
    %15 = vector.load %arg10[%c0_15, %c0_16] : memref<1x128xf32, #tpu.memory_space<vmem>>, vector<1x128xf32>
    %16 = vector.broadcast %15 : vector<1x128xf32> to vector<32x128xf32>
    %17 = arith.addf %14, %16 : vector<32x128xf32>
    %c0_17 = arith.constant 0 : index
    %c0_18 = arith.constant 0 : index
    %18 = vector.load %arg15[%c0_17, %c0_18] : memref<32x128xf32, #tpu.memory_space<vmem>>, vector<32x128xf32>
    tpu.vector_store %arg15[%c0_17, %c0_18], %17 {strides = array<i32>} : memref<32x128xf32, #tpu.memory_space<vmem>>, vector<32x128xf32>,
    %c0_19 = arith.constant 0 : index
    %c0_20 = arith.constant 0 : index
    %19 = vector.load %arg11[%c0_19, %c0_20] : memref<32x128xbf16, #tpu.memory_space<vmem>>, vector<32x128xbf16>
    %c0_21 = arith.constant 0 : index
    %c0_22 = arith.constant 0 : index
    %20 = vector.load %arg12[%c0_21, %c0_22] : memref<32x128xbf16, #tpu.memory_space<vmem>>, vector<32x128xbf16>
    %c0_23 = arith.constant 0 : index
    %c0_24 = arith.constant 0 : index
    %21 = vector.load %arg16[%c0_23, %c0_24] : memref<8x32xf32, #tpu.memory_space<vmem>>, vector<8x32xf32>
    %c0_25 = arith.constant 0 : index
    %c0_26 = arith.constant 0 : index
    %22 = vector.load %arg17[%c0_25, %c0_26] : memref<8x32xf32, #tpu.memory_space<vmem>>, vector<8x32xf32>
    %c0_27 = arith.constant 0 : index
    %c0_28 = arith.constant 0 : index
    %23 = vector.load %arg18[%c0_27, %c0_28] : memref<8x32xf32, #tpu.memory_space<vmem>>, vector<8x32xf32>
    %c0_29 = arith.constant 0 : index
    %c0_30 = arith.constant 0 : index
    %24 = vector.load %arg19[%c0_29, %c0_30] : memref<8x32xf32, #tpu.memory_space<vmem>>, vector<8x32xf32>
    %c0_31 = arith.constant 0 : index
    %c0_32 = arith.constant 0 : index
    %25 = vector.load %arg20[%c0_31, %c0_32] : memref<8x32xf32, #tpu.memory_space<vmem>>, vector<8x32xf32>
    %c0_33 = arith.constant 0 : index
    %c0_34 = arith.constant 0 : index
    %26 = vector.load %arg21[%c0_33, %c0_34] : memref<8x32xf32, #tpu.memory_space<vmem>>, vector<8x32xf32>
    %c0_35 = arith.constant 0 : index
    %c0_36 = arith.constant 0 : index
    %c0_37 = arith.constant 0 : index
    %27 = vector.load %arg3[%c0_35, %c0_36, %c0_37] : memref<4x8x1xf32, #tpu.memory_space<vmem>>, vector<1x8x1xf32>
    %28 = vector.shape_cast %27 : vector<1x8x1xf32> to vector<8x1xf32>
    %cst_38 = arith.constant 0.000000e+00 : f32
    %29 = vector.broadcast %cst_38 : f32 to vector<8x1xf32>
    %30 = arith.cmpf one, %28, %29 : vector<8x1xf32>
    %c3 = arith.constant 3 : index
    %c0_39 = arith.constant 0 : index
    %c0_40 = arith.constant 0 : index
    %31 = vector.load %arg4[%c3, %c0_39, %c0_40] : memref<4x8x1xf32, #tpu.memory_space<vmem>>, vector<1x8x1xf32>
    %32 = vector.shape_cast %31 : vector<1x8x1xf32> to vector<8x1xf32>
    %cst_41 = arith.constant 0.000000e+00 : f32
    %33 = vector.broadcast %cst_41 : f32 to vector<8x1xf32>
    %34 = arith.cmpf one, %32, %33 : vector<8x1xf32>
    %c0_42 = arith.constant 0 : index
    %c0_43 = arith.constant 0 : index
    %35 = vector.load %arg14[%c0_42, %c0_43] : memref<32x128xf32, #tpu.memory_space<vmem>>, vector<8x128xf32>
    %36 = arith.truncf %21 : vector<8x32xf32> to vector<8x32xbf16>
    %cst_44 = arith.constant dense<0.000000e+00> : vector<8x128xf32>
    %37 = tpu.matmul %36, %19, %cst_44 {dimension_numbers = #tpu.dot_dimension_numbers<[1], [0], [0], [1], [0, 0, 1, 1], [], []>} : vector<8x32xbf16>, vector<32x128xbf16>, vector<8x128xf32> -> vector<8x128xf32>
    %38 = arith.addf %35, %37 : vector<8x128xf32>
    %39 = vector.extract_strided_slice %38 {offsets = [0, 0], sizes = [8, 32], strides = [1, 1]} : vector<8x128xf32> to vector<8x32xf32>
    %40 = arith.negf %39 : vector<8x32xf32>
    %41 = math.exp %40 : vector<8x32xf32>
    %cst_45 = arith.constant 1.000000e+00 : f32
    %42 = vector.broadcast %cst_45 : f32 to vector<8x32xf32>
    %43 = arith.addf %42, %41 : vector<8x32xf32>
    %44 = arith.divf %42, %43 : vector<8x32xf32>
    %45 = vector.extract_strided_slice %38 {offsets = [0, 32], sizes = [8, 32], strides = [1, 1]} : vector<8x128xf32> to vector<8x32xf32>
    %46 = arith.negf %45 : vector<8x32xf32>
    %47 = math.exp %46 : vector<8x32xf32>
    %cst_46 = arith.constant 1.000000e+00 : f32
    %48 = vector.broadcast %cst_46 : f32 to vector<8x32xf32>
    %49 = arith.addf %48, %47 : vector<8x32xf32>
    %50 = arith.divf %48, %49 : vector<8x32xf32>
    %51 = vector.extract_strided_slice %38 {offsets = [0, 64], sizes = [8, 32], strides = [1, 1]} : vector<8x128xf32> to vector<8x32xf32>
    %52 = math.tanh %51 : vector<8x32xf32>
    %53 = vector.extract_strided_slice %38 {offsets = [0, 96], sizes = [8, 32], strides = [1, 1]} : vector<8x128xf32> to vector<8x32xf32>
    %54 = arith.negf %53 : vector<8x32xf32>
    %55 = math.exp %54 : vector<8x32xf32>
    %cst_47 = arith.constant 1.000000e+00 : f32
    %56 = vector.broadcast %cst_47 : f32 to vector<8x32xf32>
    %57 = arith.addf %56, %55 : vector<8x32xf32>
    %58 = arith.divf %56, %57 : vector<8x32xf32>
    %59 = arith.mulf %50, %22 : vector<8x32xf32>
    %60 = arith.mulf %44, %52 : vector<8x32xf32>
    %61 = arith.addf %59, %60 : vector<8x32xf32>
    %62 = math.tanh %61 : vector<8x32xf32>
    %63 = arith.mulf %58, %62 : vector<8x32xf32>
    %64 = vector.shape_cast %30 : vector<8x1xi1> to vector<8x1xi1>
    %65 = vector.broadcast %64 : vector<8x1xi1> to vector<8x32xi1>
    %66 = arith.select %65, %61, %22 : vector<8x32xi1>, vector<8x32xf32>
    %67 = vector.shape_cast %30 : vector<8x1xi1> to vector<8x1xi1>
    %68 = vector.broadcast %67 : vector<8x1xi1> to vector<8x32xi1>
    %69 = arith.select %68, %63, %21 : vector<8x32xi1>, vector<8x32xf32>
    %70 = arith.maximumf %25, %63 : vector<8x32xf32>
    %71 = vector.shape_cast %30 : vector<8x1xi1> to vector<8x1xi1>
    %72 = vector.broadcast %71 : vector<8x1xi1> to vector<8x32xi1>
    %73 = arith.select %72, %70, %25 : vector<8x32xi1>, vector<8x32xf32>
    %c24 = arith.constant 24 : index
    %c0_48 = arith.constant 0 : index
    %74 = vector.load %arg15[%c24, %c0_48] : memref<32x128xf32, #tpu.memory_space<vmem>>, vector<8x128xf32>
    %75 = arith.truncf %23 : vector<8x32xf32> to vector<8x32xbf16>
    %cst_49 = arith.constant dense<0.000000e+00> : vector<8x128xf32>
    %76 = tpu.matmul %75, %20, %cst_49 {dimension_numbers = #tpu.dot_dimension_numbers<[1], [0], [0], [1], [0, 0, 1, 1], [], []>} : vector<8x32xbf16>, vector<32x128xbf16>, vector<8x128xf32> -> vector<8x128xf32>
    %77 = arith.addf %74, %76 : vector<8x128xf32>
    %78 = vector.extract_strided_slice %77 {offsets = [0, 0], sizes = [8, 32], strides = [1, 1]} : vector<8x128xf32> to vector<8x32xf32>
    %79 = arith.negf %78 : vector<8x32xf32>
    %80 = math.exp %79 : vector<8x32xf32>
    %cst_50 = arith.constant 1.000000e+00 : f32
    %81 = vector.broadcast %cst_50 : f32 to vector<8x32xf32>
    %82 = arith.addf %81, %80 : vector<8x32xf32>
    %83 = arith.divf %81, %82 : vector<8x32xf32>
    %84 = vector.extract_strided_slice %77 {offsets = [0, 32], sizes = [8, 32], strides = [1, 1]} : vector<8x128xf32> to vector<8x32xf32>
    %85 = arith.negf %84 : vector<8x32xf32>
    %86 = math.exp %85 : vector<8x32xf32>
    %cst_51 = arith.constant 1.000000e+00 : f32
    %87 = vector.broadcast %cst_51 : f32 to vector<8x32xf32>
    %88 = arith.addf %87, %86 : vector<8x32xf32>
    %89 = arith.divf %87, %88 : vector<8x32xf32>
    %90 = vector.extract_strided_slice %77 {offsets = [0, 64], sizes = [8, 32], strides = [1, 1]} : vector<8x128xf32> to vector<8x32xf32>
    %91 = math.tanh %90 : vector<8x32xf32>
    %92 = vector.extract_strided_slice %77 {offsets = [0, 96], sizes = [8, 32], strides = [1, 1]} : vector<8x128xf32> to vector<8x32xf32>
    %93 = arith.negf %92 : vector<8x32xf32>
    %94 = math.exp %93 : vector<8x32xf32>
    %cst_52 = arith.constant 1.000000e+00 : f32
    %95 = vector.broadcast %cst_52 : f32 to vector<8x32xf32>
    %96 = arith.addf %95, %94 : vector<8x32xf32>
    %97 = arith.divf %95, %96 : vector<8x32xf32>
    %98 = arith.mulf %89, %24 : vector<8x32xf32>
    %99 = arith.mulf %83, %91 : vector<8x32xf32>
    %100 = arith.addf %98, %99 : vector<8x32xf32>
    %101 = math.tanh %100 : vector<8x32xf32>
    %102 = arith.mulf %97, %101 : vector<8x32xf32>
    %103 = vector.shape_cast %34 : vector<8x1xi1> to vector<8x1xi1>
    %104 = vector.broadcast %103 : vector<8x1xi1> to vector<8x32xi1>
    %105 = arith.select %104, %100, %24 : vector<8x32xi1>, vector<8x32xf32>
    %106 = vector.shape_cast %34 : vector<8x1xi1> to vector<8x1xi1>
    %107 = vector.broadcast %106 : vector<8x1xi1> to vector<8x32xi1>
    %108 = arith.select %107, %102, %23 : vector<8x32xi1>, vector<8x32xf32>
    %109 = arith.maximumf %26, %102 : vector<8x32xf32>
    %110 = vector.shape_cast %34 : vector<8x1xi1> to vector<8x1xi1>
    %111 = vector.broadcast %110 : vector<8x1xi1> to vector<8x32xi1>
    %112 = arith.select %111, %109, %26 : vector<8x32xi1>, vector<8x32xf32>
    %c1 = arith.constant 1 : index
    %c0_53 = arith.constant 0 : index
    %c0_54 = arith.constant 0 : index
    %113 = vector.load %arg3[%c1, %c0_53, %c0_54] : memref<4x8x1xf32, #tpu.memory_space<vmem>>, vector<1x8x1xf32>
    %114 = vector.shape_cast %113 : vector<1x8x1xf32> to vector<8x1xf32>
    %cst_55 = arith.constant 0.000000e+00 : f32
    %115 = vector.broadcast %cst_55 : f32 to vector<8x1xf32>
    %116 = arith.cmpf one, %114, %115 : vector<8x1xf32>
    %c2 = arith.constant 2 : index
    %c0_56 = arith.constant 0 : index
    %c0_57 = arith.constant 0 : index
    %117 = vector.load %arg4[%c2, %c0_56, %c0_57] : memref<4x8x1xf32, #tpu.memory_space<vmem>>, vector<1x8x1xf32>
    %118 = vector.shape_cast %117 : vector<1x8x1xf32> to vector<8x1xf32>
    %cst_58 = arith.constant 0.000000e+00 : f32
    %119 = vector.broadcast %cst_58 : f32 to vector<8x1xf32>
    %120 = arith.cmpf one, %118, %119 : vector<8x1xf32>
    %c8 = arith.constant 8 : index
    %c0_59 = arith.constant 0 : index
    %121 = vector.load %arg14[%c8, %c0_59] : memref<32x128xf32, #tpu.memory_space<vmem>>, vector<8x128xf32>
    %122 = arith.truncf %69 : vector<8x32xf32> to vector<8x32xbf16>
    %cst_60 = arith.constant dense<0.000000e+00> : vector<8x128xf32>
    %123 = tpu.matmul %122, %19, %cst_60 {dimension_numbers = #tpu.dot_dimension_numbers<[1], [0], [0], [1], [0, 0, 1, 1], [], []>} : vector<8x32xbf16>, vector<32x128xbf16>, vector<8x128xf32> -> vector<8x128xf32>
    %124 = arith.addf %121, %123 : vector<8x128xf32>
    %125 = vector.extract_strided_slice %124 {offsets = [0, 0], sizes = [8, 32], strides = [1, 1]} : vector<8x128xf32> to vector<8x32xf32>
    %126 = arith.negf %125 : vector<8x32xf32>
    %127 = math.exp %126 : vector<8x32xf32>
    %cst_61 = arith.constant 1.000000e+00 : f32
    %128 = vector.broadcast %cst_61 : f32 to vector<8x32xf32>
    %129 = arith.addf %128, %127 : vector<8x32xf32>
    %130 = arith.divf %128, %129 : vector<8x32xf32>
    %131 = vector.extract_strided_slice %124 {offsets = [0, 32], sizes = [8, 32], strides = [1, 1]} : vector<8x128xf32> to vector<8x32xf32>
    %132 = arith.negf %131 : vector<8x32xf32>
    %133 = math.exp %132 : vector<8x32xf32>
    %cst_62 = arith.constant 1.000000e+00 : f32
    %134 = vector.broadcast %cst_62 : f32 to vector<8x32xf32>
    %135 = arith.addf %134, %133 : vector<8x32xf32>
    %136 = arith.divf %134, %135 : vector<8x32xf32>
    %137 = vector.extract_strided_slice %124 {offsets = [0, 64], sizes = [8, 32], strides = [1, 1]} : vector<8x128xf32> to vector<8x32xf32>
    %138 = math.tanh %137 : vector<8x32xf32>
    %139 = vector.extract_strided_slice %124 {offsets = [0, 96], sizes = [8, 32], strides = [1, 1]} : vector<8x128xf32> to vector<8x32xf32>
    %140 = arith.negf %139 : vector<8x32xf32>
    %141 = math.exp %140 : vector<8x32xf32>
    %cst_63 = arith.constant 1.000000e+00 : f32
    %142 = vector.broadcast %cst_63 : f32 to vector<8x32xf32>
    %143 = arith.addf %142, %141 : vector<8x32xf32>
    %144 = arith.divf %142, %143 : vector<8x32xf32>
    %145 = arith.mulf %136, %66 : vector<8x32xf32>
    %146 = arith.mulf %130, %138 : vector<8x32xf32>
    %147 = arith.addf %145, %146 : vector<8x32xf32>
    %148 = math.tanh %147 : vector<8x32xf32>
    %149 = arith.mulf %144, %148 : vector<8x32xf32>
    %150 = vector.shape_cast %116 : vector<8x1xi1> to vector<8x1xi1>
    %151 = vector.broadcast %150 : vector<8x1xi1> to vector<8x32xi1>
    %152 = arith.select %151, %147, %66 : vector<8x32xi1>, vector<8x32xf32>
    %153 = vector.shape_cast %116 : vector<8x1xi1> to vector<8x1xi1>
    %154 = vector.broadcast %153 : vector<8x1xi1> to vector<8x32xi1>
    %155 = arith.select %154, %149, %69 : vector<8x32xi1>, vector<8x32xf32>
    %156 = arith.maximumf %73, %149 : vector<8x32xf32>
    %157 = vector.shape_cast %116 : vector<8x1xi1> to vector<8x1xi1>
    %158 = vector.broadcast %157 : vector<8x1xi1> to vector<8x32xi1>
    %159 = arith.select %158, %156, %73 : vector<8x32xi1>, vector<8x32xf32>
    %c16 = arith.constant 16 : index
    %c0_64 = arith.constant 0 : index
    %160 = vector.load %arg15[%c16, %c0_64] : memref<32x128xf32, #tpu.memory_space<vmem>>, vector<8x128xf32>
    %161 = arith.truncf %108 : vector<8x32xf32> to vector<8x32xbf16>
    %cst_65 = arith.constant dense<0.000000e+00> : vector<8x128xf32>
    %162 = tpu.matmul %161, %20, %cst_65 {dimension_numbers = #tpu.dot_dimension_numbers<[1], [0], [0], [1], [0, 0, 1, 1], [], []>} : vector<8x32xbf16>, vector<32x128xbf16>, vector<8x128xf32> -> vector<8x128xf32>
    %163 = arith.addf %160, %162 : vector<8x128xf32>
    %164 = vector.extract_strided_slice %163 {offsets = [0, 0], sizes = [8, 32], strides = [1, 1]} : vector<8x128xf32> to vector<8x32xf32>
    %165 = arith.negf %164 : vector<8x32xf32>
    %166 = math.exp %165 : vector<8x32xf32>
    %cst_66 = arith.constant 1.000000e+00 : f32
    %167 = vector.broadcast %cst_66 : f32 to vector<8x32xf32>
    %168 = arith.addf %167, %166 : vector<8x32xf32>
    %169 = arith.divf %167, %168 : vector<8x32xf32>
    %170 = vector.extract_strided_slice %163 {offsets = [0, 32], sizes = [8, 32], strides = [1, 1]} : vector<8x128xf32> to vector<8x32xf32>
    %171 = arith.negf %170 : vector<8x32xf32>
    %172 = math.exp %171 : vector<8x32xf32>
    %cst_67 = arith.constant 1.000000e+00 : f32
    %173 = vector.broadcast %cst_67 : f32 to vector<8x32xf32>
    %174 = arith.addf %173, %172 : vector<8x32xf32>
    %175 = arith.divf %173, %174 : vector<8x32xf32>
    %176 = vector.extract_strided_slice %163 {offsets = [0, 64], sizes = [8, 32], strides = [1, 1]} : vector<8x128xf32> to vector<8x32xf32>
    %177 = math.tanh %176 : vector<8x32xf32>
    %178 = vector.extract_strided_slice %163 {offsets = [0, 96], sizes = [8, 32], strides = [1, 1]} : vector<8x128xf32> to vector<8x32xf32>
    %179 = arith.negf %178 : vector<8x32xf32>
    %180 = math.exp %179 : vector<8x32xf32>
    %cst_68 = arith.constant 1.000000e+00 : f32
    %181 = vector.broadcast %cst_68 : f32 to vector<8x32xf32>
    %182 = arith.addf %181, %180 : vector<8x32xf32>
    %183 = arith.divf %181, %182 : vector<8x32xf32>
    %184 = arith.mulf %175, %105 : vector<8x32xf32>
    %185 = arith.mulf %169, %177 : vector<8x32xf32>
    %186 = arith.addf %184, %185 : vector<8x32xf32>
    %187 = math.tanh %186 : vector<8x32xf32>
    %188 = arith.mulf %183, %187 : vector<8x32xf32>
    %189 = vector.shape_cast %120 : vector<8x1xi1> to vector<8x1xi1>
    %190 = vector.broadcast %189 : vector<8x1xi1> to vector<8x32xi1>
    %191 = arith.select %190, %186, %105 : vector<8x32xi1>, vector<8x32xf32>
    %192 = vector.shape_cast %120 : vector<8x1xi1> to vector<8x1xi1>
    %193 = vector.broadcast %192 : vector<8x1xi1> to vector<8x32xi1>
    %194 = arith.select %193, %188, %108 : vector<8x32xi1>, vector<8x32xf32>
    %195 = arith.maximumf %112, %188 : vector<8x32xf32>
    %196 = vector.shape_cast %120 : vector<8x1xi1> to vector<8x1xi1>
    %197 = vector.broadcast %196 : vector<8x1xi1> to vector<8x32xi1>
    %198 = arith.select %197, %195, %112 : vector<8x32xi1>, vector<8x32xf32>
    %c2_69 = arith.constant 2 : index
    %c0_70 = arith.constant 0 : index
    %c0_71 = arith.constant 0 : index
    %199 = vector.load %arg3[%c2_69, %c0_70, %c0_71] : memref<4x8x1xf32, #tpu.memory_space<vmem>>, vector<1x8x1xf32>
    %200 = vector.shape_cast %199 : vector<1x8x1xf32> to vector<8x1xf32>
    %cst_72 = arith.constant 0.000000e+00 : f32
    %201 = vector.broadcast %cst_72 : f32 to vector<8x1xf32>
    %202 = arith.cmpf one, %200, %201 : vector<8x1xf32>
    %c1_73 = arith.constant 1 : index
    %c0_74 = arith.constant 0 : index
    %c0_75 = arith.constant 0 : index
    %203 = vector.load %arg4[%c1_73, %c0_74, %c0_75] : memref<4x8x1xf32, #tpu.memory_space<vmem>>, vector<1x8x1xf32>
    %204 = vector.shape_cast %203 : vector<1x8x1xf32> to vector<8x1xf32>
    %cst_76 = arith.constant 0.000000e+00 : f32
    %205 = vector.broadcast %cst_76 : f32 to vector<8x1xf32>
    %206 = arith.cmpf one, %204, %205 : vector<8x1xf32>
    %c16_77 = arith.constant 16 : index
    %c0_78 = arith.constant 0 : index
    %207 = vector.load %arg14[%c16_77, %c0_78] : memref<32x128xf32, #tpu.memory_space<vmem>>, vector<8x128xf32>
    %208 = arith.truncf %155 : vector<8x32xf32> to vector<8x32xbf16>
    %cst_79 = arith.constant dense<0.000000e+00> : vector<8x128xf32>
    %209 = tpu.matmul %208, %19, %cst_79 {dimension_numbers = #tpu.dot_dimension_numbers<[1], [0], [0], [1], [0, 0, 1, 1], [], []>} : vector<8x32xbf16>, vector<32x128xbf16>, vector<8x128xf32> -> vector<8x128xf32>
    %210 = arith.addf %207, %209 : vector<8x128xf32>
    %211 = vector.extract_strided_slice %210 {offsets = [0, 0], sizes = [8, 32], strides = [1, 1]} : vector<8x128xf32> to vector<8x32xf32>
    %212 = arith.negf %211 : vector<8x32xf32>
    %213 = math.exp %212 : vector<8x32xf32>
    %cst_80 = arith.constant 1.000000e+00 : f32
    %214 = vector.broadcast %cst_80 : f32 to vector<8x32xf32>
    %215 = arith.addf %214, %213 : vector<8x32xf32>
    %216 = arith.divf %214, %215 : vector<8x32xf32>
    %217 = vector.extract_strided_slice %210 {offsets = [0, 32], sizes = [8, 32], strides = [1, 1]} : vector<8x128xf32> to vector<8x32xf32>
    %218 = arith.negf %217 : vector<8x32xf32>
    %219 = math.exp %218 : vector<8x32xf32>
    %cst_81 = arith.constant 1.000000e+00 : f32
    %220 = vector.broadcast %cst_81 : f32 to vector<8x32xf32>
    %221 = arith.addf %220, %219 : vector<8x32xf32>
    %222 = arith.divf %220, %221 : vector<8x32xf32>
    %223 = vector.extract_strided_slice %210 {offsets = [0, 64], sizes = [8, 32], strides = [1, 1]} : vector<8x128xf32> to vector<8x32xf32>
    %224 = math.tanh %223 : vector<8x32xf32>
    %225 = vector.extract_strided_slice %210 {offsets = [0, 96], sizes = [8, 32], strides = [1, 1]} : vector<8x128xf32> to vector<8x32xf32>
    %226 = arith.negf %225 : vector<8x32xf32>
    %227 = math.exp %226 : vector<8x32xf32>
    %cst_82 = arith.constant 1.000000e+00 : f32
    %228 = vector.broadcast %cst_82 : f32 to vector<8x32xf32>
    %229 = arith.addf %228, %227 : vector<8x32xf32>
    %230 = arith.divf %228, %229 : vector<8x32xf32>
    %231 = arith.mulf %222, %152 : vector<8x32xf32>
    %232 = arith.mulf %216, %224 : vector<8x32xf32>
    %233 = arith.addf %231, %232 : vector<8x32xf32>
    %234 = math.tanh %233 : vector<8x32xf32>
    %235 = arith.mulf %230, %234 : vector<8x32xf32>
    %236 = vector.shape_cast %202 : vector<8x1xi1> to vector<8x1xi1>
    %237 = vector.broadcast %236 : vector<8x1xi1> to vector<8x32xi1>
    %238 = arith.select %237, %233, %152 : vector<8x32xi1>, vector<8x32xf32>
    %239 = vector.shape_cast %202 : vector<8x1xi1> to vector<8x1xi1>
    %240 = vector.broadcast %239 : vector<8x1xi1> to vector<8x32xi1>
    %241 = arith.select %240, %235, %155 : vector<8x32xi1>, vector<8x32xf32>
    %242 = arith.maximumf %159, %235 : vector<8x32xf32>
    %243 = vector.shape_cast %202 : vector<8x1xi1> to vector<8x1xi1>
    %244 = vector.broadcast %243 : vector<8x1xi1> to vector<8x32xi1>
    %245 = arith.select %244, %242, %159 : vector<8x32xi1>, vector<8x32xf32>
    %c8_83 = arith.constant 8 : index
    %c0_84 = arith.constant 0 : index
    %246 = vector.load %arg15[%c8_83, %c0_84] : memref<32x128xf32, #tpu.memory_space<vmem>>, vector<8x128xf32>
    %247 = arith.truncf %194 : vector<8x32xf32> to vector<8x32xbf16>
    %cst_85 = arith.constant dense<0.000000e+00> : vector<8x128xf32>
    %248 = tpu.matmul %247, %20, %cst_85 {dimension_numbers = #tpu.dot_dimension_numbers<[1], [0], [0], [1], [0, 0, 1, 1], [], []>} : vector<8x32xbf16>, vector<32x128xbf16>, vector<8x128xf32> -> vector<8x128xf32>
    %249 = arith.addf %246, %248 : vector<8x128xf32>
    %250 = vector.extract_strided_slice %249 {offsets = [0, 0], sizes = [8, 32], strides = [1, 1]} : vector<8x128xf32> to vector<8x32xf32>
    %251 = arith.negf %250 : vector<8x32xf32>
    %252 = math.exp %251 : vector<8x32xf32>
    %cst_86 = arith.constant 1.000000e+00 : f32
    %253 = vector.broadcast %cst_86 : f32 to vector<8x32xf32>
    %254 = arith.addf %253, %252 : vector<8x32xf32>
    %255 = arith.divf %253, %254 : vector<8x32xf32>
    %256 = vector.extract_strided_slice %249 {offsets = [0, 32], sizes = [8, 32], strides = [1, 1]} : vector<8x128xf32> to vector<8x32xf32>
    %257 = arith.negf %256 : vector<8x32xf32>
    %258 = math.exp %257 : vector<8x32xf32>
    %cst_87 = arith.constant 1.000000e+00 : f32
    %259 = vector.broadcast %cst_87 : f32 to vector<8x32xf32>
    %260 = arith.addf %259, %258 : vector<8x32xf32>
    %261 = arith.divf %259, %260 : vector<8x32xf32>
    %262 = vector.extract_strided_slice %249 {offsets = [0, 64], sizes = [8, 32], strides = [1, 1]} : vector<8x128xf32> to vector<8x32xf32>
    %263 = math.tanh %262 : vector<8x32xf32>
    %264 = vector.extract_strided_slice %249 {offsets = [0, 96], sizes = [8, 32], strides = [1, 1]} : vector<8x128xf32> to vector<8x32xf32>
    %265 = arith.negf %264 : vector<8x32xf32>
    %266 = math.exp %265 : vector<8x32xf32>
    %cst_88 = arith.constant 1.000000e+00 : f32
    %267 = vector.broadcast %cst_88 : f32 to vector<8x32xf32>
    %268 = arith.addf %267, %266 : vector<8x32xf32>
    %269 = arith.divf %267, %268 : vector<8x32xf32>
    %270 = arith.mulf %261, %191 : vector<8x32xf32>
    %271 = arith.mulf %255, %263 : vector<8x32xf32>
    %272 = arith.addf %270, %271 : vector<8x32xf32>
    %273 = math.tanh %272 : vector<8x32xf32>
    %274 = arith.mulf %269, %273 : vector<8x32xf32>
    %275 = vector.shape_cast %206 : vector<8x1xi1> to vector<8x1xi1>
    %276 = vector.broadcast %275 : vector<8x1xi1> to vector<8x32xi1>
    %277 = arith.select %276, %272, %191 : vector<8x32xi1>, vector<8x32xf32>
    %278 = vector.shape_cast %206 : vector<8x1xi1> to vector<8x1xi1>
    %279 = vector.broadcast %278 : vector<8x1xi1> to vector<8x32xi1>
    %280 = arith.select %279, %274, %194 : vector<8x32xi1>, vector<8x32xf32>
    %281 = arith.maximumf %198, %274 : vector<8x32xf32>
    %282 = vector.shape_cast %206 : vector<8x1xi1> to vector<8x1xi1>
    %283 = vector.broadcast %282 : vector<8x1xi1> to vector<8x32xi1>
    %284 = arith.select %283, %281, %198 : vector<8x32xi1>, vector<8x32xf32>
    %c3_89 = arith.constant 3 : index
    %c0_90 = arith.constant 0 : index
    %c0_91 = arith.constant 0 : index
    %285 = vector.load %arg3[%c3_89, %c0_90, %c0_91] : memref<4x8x1xf32, #tpu.memory_space<vmem>>, vector<1x8x1xf32>
    %286 = vector.shape_cast %285 : vector<1x8x1xf32> to vector<8x1xf32>
    %cst_92 = arith.constant 0.000000e+00 : f32
    %287 = vector.broadcast %cst_92 : f32 to vector<8x1xf32>
    %288 = arith.cmpf one, %286, %287 : vector<8x1xf32>
    %c0_93 = arith.constant 0 : index
    %c0_94 = arith.constant 0 : index
    %c0_95 = arith.constant 0 : index
    %289 = vector.load %arg4[%c0_93, %c0_94, %c0_95] : memref<4x8x1xf32, #tpu.memory_space<vmem>>, vector<1x8x1xf32>
    %290 = vector.shape_cast %289 : vector<1x8x1xf32> to vector<8x1xf32>
    %cst_96 = arith.constant 0.000000e+00 : f32
    %291 = vector.broadcast %cst_96 : f32 to vector<8x1xf32>
    %292 = arith.cmpf one, %290, %291 : vector<8x1xf32>
    %c24_97 = arith.constant 24 : index
    %c0_98 = arith.constant 0 : index
    %293 = vector.load %arg14[%c24_97, %c0_98] : memref<32x128xf32, #tpu.memory_space<vmem>>, vector<8x128xf32>
    %294 = arith.truncf %241 : vector<8x32xf32> to vector<8x32xbf16>
    %cst_99 = arith.constant dense<0.000000e+00> : vector<8x128xf32>
    %295 = tpu.matmul %294, %19, %cst_99 {dimension_numbers = #tpu.dot_dimension_numbers<[1], [0], [0], [1], [0, 0, 1, 1], [], []>} : vector<8x32xbf16>, vector<32x128xbf16>, vector<8x128xf32> -> vector<8x128xf32>
    %296 = arith.addf %293, %295 : vector<8x128xf32>
    %297 = vector.extract_strided_slice %296 {offsets = [0, 0], sizes = [8, 32], strides = [1, 1]} : vector<8x128xf32> to vector<8x32xf32>
    %298 = arith.negf %297 : vector<8x32xf32>
    %299 = math.exp %298 : vector<8x32xf32>
    %cst_100 = arith.constant 1.000000e+00 : f32
    %300 = vector.broadcast %cst_100 : f32 to vector<8x32xf32>
    %301 = arith.addf %300, %299 : vector<8x32xf32>
    %302 = arith.divf %300, %301 : vector<8x32xf32>
    %303 = vector.extract_strided_slice %296 {offsets = [0, 32], sizes = [8, 32], strides = [1, 1]} : vector<8x128xf32> to vector<8x32xf32>
    %304 = arith.negf %303 : vector<8x32xf32>
    %305 = math.exp %304 : vector<8x32xf32>
    %cst_101 = arith.constant 1.000000e+00 : f32
    %306 = vector.broadcast %cst_101 : f32 to vector<8x32xf32>
    %307 = arith.addf %306, %305 : vector<8x32xf32>
    %308 = arith.divf %306, %307 : vector<8x32xf32>
    %309 = vector.extract_strided_slice %296 {offsets = [0, 64], sizes = [8, 32], strides = [1, 1]} : vector<8x128xf32> to vector<8x32xf32>
    %310 = math.tanh %309 : vector<8x32xf32>
    %311 = vector.extract_strided_slice %296 {offsets = [0, 96], sizes = [8, 32], strides = [1, 1]} : vector<8x128xf32> to vector<8x32xf32>
    %312 = arith.negf %311 : vector<8x32xf32>
    %313 = math.exp %312 : vector<8x32xf32>
    %cst_102 = arith.constant 1.000000e+00 : f32
    %314 = vector.broadcast %cst_102 : f32 to vector<8x32xf32>
    %315 = arith.addf %314, %313 : vector<8x32xf32>
    %316 = arith.divf %314, %315 : vector<8x32xf32>
    %317 = arith.mulf %308, %238 : vector<8x32xf32>
    %318 = arith.mulf %302, %310 : vector<8x32xf32>
    %319 = arith.addf %317, %318 : vector<8x32xf32>
    %320 = math.tanh %319 : vector<8x32xf32>
    %321 = arith.mulf %316, %320 : vector<8x32xf32>
    %322 = vector.shape_cast %288 : vector<8x1xi1> to vector<8x1xi1>
    %323 = vector.broadcast %322 : vector<8x1xi1> to vector<8x32xi1>
    %324 = arith.select %323, %319, %238 : vector<8x32xi1>, vector<8x32xf32>
    %325 = vector.shape_cast %288 : vector<8x1xi1> to vector<8x1xi1>
    %326 = vector.broadcast %325 : vector<8x1xi1> to vector<8x32xi1>
    %327 = arith.select %326, %321, %241 : vector<8x32xi1>, vector<8x32xf32>
    %328 = arith.maximumf %245, %321 : vector<8x32xf32>
    %329 = vector.shape_cast %288 : vector<8x1xi1> to vector<8x1xi1>
    %330 = vector.broadcast %329 : vector<8x1xi1> to vector<8x32xi1>
    %331 = arith.select %330, %328, %245 : vector<8x32xi1>, vector<8x32xf32>
    %c0_103 = arith.constant 0 : index
    %c0_104 = arith.constant 0 : index
    %332 = vector.load %arg15[%c0_103, %c0_104] : memref<32x128xf32, #tpu.memory_space<vmem>>, vector<8x128xf32>
    %333 = arith.truncf %280 : vector<8x32xf32> to vector<8x32xbf16>
    %cst_105 = arith.constant dense<0.000000e+00> : vector<8x128xf32>
    %334 = tpu.matmul %333, %20, %cst_105 {dimension_numbers = #tpu.dot_dimension_numbers<[1], [0], [0], [1], [0, 0, 1, 1], [], []>} : vector<8x32xbf16>, vector<32x128xbf16>, vector<8x128xf32> -> vector<8x128xf32>
    %335 = arith.addf %332, %334 : vector<8x128xf32>
    %336 = vector.extract_strided_slice %335 {offsets = [0, 0], sizes = [8, 32], strides = [1, 1]} : vector<8x128xf32> to vector<8x32xf32>
    %337 = arith.negf %336 : vector<8x32xf32>
    %338 = math.exp %337 : vector<8x32xf32>
    %cst_106 = arith.constant 1.000000e+00 : f32
    %339 = vector.broadcast %cst_106 : f32 to vector<8x32xf32>
    %340 = arith.addf %339, %338 : vector<8x32xf32>
    %341 = arith.divf %339, %340 : vector<8x32xf32>
    %342 = vector.extract_strided_slice %335 {offsets = [0, 32], sizes = [8, 32], strides = [1, 1]} : vector<8x128xf32> to vector<8x32xf32>
    %343 = arith.negf %342 : vector<8x32xf32>
    %344 = math.exp %343 : vector<8x32xf32>
    %cst_107 = arith.constant 1.000000e+00 : f32
    %345 = vector.broadcast %cst_107 : f32 to vector<8x32xf32>
    %346 = arith.addf %345, %344 : vector<8x32xf32>
    %347 = arith.divf %345, %346 : vector<8x32xf32>
    %348 = vector.extract_strided_slice %335 {offsets = [0, 64], sizes = [8, 32], strides = [1, 1]} : vector<8x128xf32> to vector<8x32xf32>
    %349 = math.tanh %348 : vector<8x32xf32>
    %350 = vector.extract_strided_slice %335 {offsets = [0, 96], sizes = [8, 32], strides = [1, 1]} : vector<8x128xf32> to vector<8x32xf32>
    %351 = arith.negf %350 : vector<8x32xf32>
    %352 = math.exp %351 : vector<8x32xf32>
    %cst_108 = arith.constant 1.000000e+00 : f32
    %353 = vector.broadcast %cst_108 : f32 to vector<8x32xf32>
    %354 = arith.addf %353, %352 : vector<8x32xf32>
    %355 = arith.divf %353, %354 : vector<8x32xf32>
    %356 = arith.mulf %347, %277 : vector<8x32xf32>
    %357 = arith.mulf %341, %349 : vector<8x32xf32>
    %358 = arith.addf %356, %357 : vector<8x32xf32>
    %359 = math.tanh %358 : vector<8x32xf32>
    %360 = arith.mulf %355, %359 : vector<8x32xf32>
    %361 = vector.shape_cast %292 : vector<8x1xi1> to vector<8x1xi1>
    %362 = vector.broadcast %361 : vector<8x1xi1> to vector<8x32xi1>
    %363 = arith.select %362, %358, %277 : vector<8x32xi1>, vector<8x32xf32>
    %364 = vector.shape_cast %292 : vector<8x1xi1> to vector<8x1xi1>
    %365 = vector.broadcast %364 : vector<8x1xi1> to vector<8x32xi1>
    %366 = arith.select %365, %360, %280 : vector<8x32xi1>, vector<8x32xf32>
    %367 = arith.maximumf %284, %360 : vector<8x32xf32>
    %368 = vector.shape_cast %292 : vector<8x1xi1> to vector<8x1xi1>
    %369 = vector.broadcast %368 : vector<8x1xi1> to vector<8x32xi1>
    %370 = arith.select %369, %367, %284 : vector<8x32xi1>, vector<8x32xf32>
    %c0_109 = arith.constant 0 : index
    %c0_110 = arith.constant 0 : index
    %371 = vector.load %arg16[%c0_109, %c0_110] : memref<8x32xf32, #tpu.memory_space<vmem>>, vector<8x32xf32>
    tpu.vector_store %arg16[%c0_109, %c0_110], %327 {strides = array<i32>} : memref<8x32xf32, #tpu.memory_space<vmem>>, vector<8x32xf32>,
    %c0_111 = arith.constant 0 : index
    %c0_112 = arith.constant 0 : index
    %372 = vector.load %arg17[%c0_111, %c0_112] : memref<8x32xf32, #tpu.memory_space<vmem>>, vector<8x32xf32>
    tpu.vector_store %arg17[%c0_111, %c0_112], %324 {strides = array<i32>} : memref<8x32xf32, #tpu.memory_space<vmem>>, vector<8x32xf32>,
    %c0_113 = arith.constant 0 : index
    %c0_114 = arith.constant 0 : index
    %373 = vector.load %arg18[%c0_113, %c0_114] : memref<8x32xf32, #tpu.memory_space<vmem>>, vector<8x32xf32>
    tpu.vector_store %arg18[%c0_113, %c0_114], %366 {strides = array<i32>} : memref<8x32xf32, #tpu.memory_space<vmem>>, vector<8x32xf32>,
    %c0_115 = arith.constant 0 : index
    %c0_116 = arith.constant 0 : index
    %374 = vector.load %arg19[%c0_115, %c0_116] : memref<8x32xf32, #tpu.memory_space<vmem>>, vector<8x32xf32>
    tpu.vector_store %arg19[%c0_115, %c0_116], %363 {strides = array<i32>} : memref<8x32xf32, #tpu.memory_space<vmem>>, vector<8x32xf32>,
    %c0_117 = arith.constant 0 : index
    %c0_118 = arith.constant 0 : index
    %375 = vector.load %arg20[%c0_117, %c0_118] : memref<8x32xf32, #tpu.memory_space<vmem>>, vector<8x32xf32>
    tpu.vector_store %arg20[%c0_117, %c0_118], %331 {strides = array<i32>} : memref<8x32xf32, #tpu.memory_space<vmem>>, vector<8x32xf32>,
    %c0_119 = arith.constant 0 : index
    %c0_120 = arith.constant 0 : index
    %376 = vector.load %arg21[%c0_119, %c0_120] : memref<8x32xf32, #tpu.memory_space<vmem>>, vector<8x32xf32>
    tpu.vector_store %arg21[%c0_119, %c0_120], %370 {strides = array<i32>} : memref<8x32xf32, #tpu.memory_space<vmem>>, vector<8x32xf32>,
    %c1_i32 = arith.constant 1 : i32
    %377 = arith.cmpi eq, %arg1, %c1_i32 : i32
    %378 = arith.extui %377 : i1 to i32
    %c0_i32_121 = arith.constant 0 : i32
    %379 = arith.cmpi ne, %378, %c0_i32_121 : i32
    scf.if %379 {
      %380 = tpu.concatenate %331, %370 in 1 : vector<8x32xf32>, vector<8x32xf32> -> vector<8x64xf32>
      %c0_122 = arith.constant 0 : index
      %c0_123 = arith.constant 0 : index
      %381 = vector.load %arg13[%c0_122, %c0_123] : memref<8x64xf32, #tpu.memory_space<vmem>>, vector<8x64xf32>
      tpu.vector_store %arg13[%c0_122, %c0_123], %380 {strides = array<i32>} : memref<8x64xf32, #tpu.memory_space<vmem>>, vector<8x64xf32>,
    } else {
    }
    return
  }
  func.func @transform_0(%arg0: i32, %arg1: i32) -> (i32, i32) {
    %c0_i32 = arith.constant 0 : i32
    %c0_i32_0 = arith.constant 0 : i32
    return %arg0, %c0_i32 : i32, i32
  }
  func.func @transform_1(%arg0: i32, %arg1: i32) -> (i32, i32, i32) {
    %c0_i32 = arith.constant 0 : i32
    %c0_i32_0 = arith.constant 0 : i32
    return %arg1, %arg0, %c0_i32 : i32, i32, i32
  }
  func.func @transform_2(%arg0: i32, %arg1: i32) -> (i32, i32, i32) {
    %c1_i32 = arith.constant 1 : i32
    %0 = arith.subi %c1_i32, %arg1 : i32
    %c0_i32 = arith.constant 0 : i32
    %c0_i32_0 = arith.constant 0 : i32
    return %0, %arg0, %c0_i32 : i32, i32, i32
  }
  func.func @transform_3(%arg0: i32, %arg1: i32) -> (i32, i32, i32) {
    %c0_i32 = arith.constant 0 : i32
    %c0_i32_0 = arith.constant 0 : i32
    return %arg1, %arg0, %c0_i32 : i32, i32, i32
  }
  func.func @transform_4(%arg0: i32, %arg1: i32) -> (i32, i32, i32) {
    %c1_i32 = arith.constant 1 : i32
    %0 = arith.subi %c1_i32, %arg1 : i32
    %c0_i32 = arith.constant 0 : i32
    %c0_i32_0 = arith.constant 0 : i32
    return %0, %arg0, %c0_i32 : i32, i32, i32
  }
  func.func @transform_5(%arg0: i32, %arg1: i32) -> (i32, i32) {
    %c0_i32 = arith.constant 0 : i32
    %c0_i32_0 = arith.constant 0 : i32
    %c0_i32_1 = arith.constant 0 : i32
    return %c0_i32, %c0_i32_0 : i32, i32
  }
  func.func @transform_6(%arg0: i32, %arg1: i32) -> (i32, i32) {
    %c0_i32 = arith.constant 0 : i32
    %c0_i32_0 = arith.constant 0 : i32
    %c0_i32_1 = arith.constant 0 : i32
    return %c0_i32, %c0_i32_0 : i32, i32
  }
  func.func @transform_7(%arg0: i32, %arg1: i32) -> (i32, i32) {
    %c0_i32 = arith.constant 0 : i32
    %c0_i32_0 = arith.constant 0 : i32
    %c0_i32_1 = arith.constant 0 : i32
    return %c0_i32, %c0_i32_0 : i32, i32
  }
  func.func @transform_8(%arg0: i32, %arg1: i32) -> (i32, i32) {
    %c0_i32 = arith.constant 0 : i32
    %c0_i32_0 = arith.constant 0 : i32
    %c0_i32_1 = arith.constant 0 : i32
    return %c0_i32, %c0_i32_0 : i32, i32
  }
  func.func @transform_9(%arg0: i32, %arg1: i32) -> (i32, i32) {
    %c0_i32 = arith.constant 0 : i32
    %c0_i32_0 = arith.constant 0 : i32
    %c0_i32_1 = arith.constant 0 : i32
    return %c0_i32, %c0_i32_0 : i32, i32
  }
  func.func @transform_10(%arg0: i32, %arg1: i32) -> (i32, i32) {
    %c0_i32 = arith.constant 0 : i32
    %c0_i32_0 = arith.constant 0 : i32
    %c0_i32_1 = arith.constant 0 : i32
    return %c0_i32, %c0_i32_0 : i32, i32
  }
  func.func @transform_11(%arg0: i32, %arg1: i32) -> (i32, i32) {
    %c0_i32 = arith.constant 0 : i32
    %c0_i32_0 = arith.constant 0 : i32
    return %arg0, %c0_i32 : i32, i32
  }
}

module attributes {stable_mosaic.version = 11 : i64} {
  func.func @_bilstm_maxpool_kernel(%arg0: i32, %arg1: i32, %arg2: memref<8x1xf32, #tpu.memory_space<vmem>>, %arg3: memref<4x8x1xf32, #tpu.memory_space<vmem>>, %arg4: memref<4x8x1xf32, #tpu.memory_space<vmem>>, %arg5: memref<4x8x32xbf16, #tpu.memory_space<vmem>>, %arg6: memref<4x8x32xbf16, #tpu.memory_space<vmem>>, %arg7: memref<32x128xbf16, #tpu.memory_space<vmem>>, %arg8: memref<32x128xbf16, #tpu.memory_space<vmem>>, %arg9: memref<1x128xf32, #tpu.memory_space<vmem>>, %arg10: memref<1x128xf32, #tpu.memory_space<vmem>>, %arg11: memref<32x128xbf16, #tpu.memory_space<vmem>>, %arg12: memref<32x128xbf16, #tpu.memory_space<vmem>>, %arg13: memref<8x64xf32, #tpu.memory_space<vmem>>, %arg14: memref<32x128xf32, #tpu.memory_space<vmem>>, %arg15: memref<32x128xf32, #tpu.memory_space<vmem>>, %arg16: memref<8x32xf32, #tpu.memory_space<vmem>>, %arg17: memref<8x32xf32, #tpu.memory_space<vmem>>, %arg18: memref<8x32xf32, #tpu.memory_space<vmem>>, %arg19: memref<8x32xf32, #tpu.memory_space<vmem>>, %arg20: memref<8x32xf32, #tpu.memory_space<vmem>>, %arg21: memref<8x32xf32, #tpu.memory_space<vmem>>) attributes {dimension_semantics = [#tpu.dimension_semantics<parallel>, #tpu.dimension_semantics<arbitrary>], iteration_bounds = array<i64: 1, 2>, scalar_prefetch = 0 : i64, scratch_operands = 8 : i64, tpu.core_type = #tpu.core_type<tc>, window_params = [{transform_indices = @transform_0, window_bounds = array<i64: 8, 1>}, {transform_indices = @transform_1, window_bounds = array<i64: 4, 8, 1>}, {transform_indices = @transform_2, window_bounds = array<i64: 4, 8, 1>}, {transform_indices = @transform_3, window_bounds = array<i64: 4, 8, 32>}, {transform_indices = @transform_4, window_bounds = array<i64: 4, 8, 32>}, {pipeline_mode = #tpu.pipeline_mode<synchronous>, transform_indices = @transform_5, window_bounds = array<i64: 32, 128>}, {pipeline_mode = #tpu.pipeline_mode<synchronous>, transform_indices = @transform_6, window_bounds = array<i64: 32, 128>}, {pipeline_mode = #tpu.pipeline_mode<synchronous>, transform_indices = @transform_7, window_bounds = array<i64: 1, 128>}, {pipeline_mode = #tpu.pipeline_mode<synchronous>, transform_indices = @transform_8, window_bounds = array<i64: 1, 128>}, {pipeline_mode = #tpu.pipeline_mode<synchronous>, transform_indices = @transform_9, window_bounds = array<i64: 32, 128>}, {pipeline_mode = #tpu.pipeline_mode<synchronous>, transform_indices = @transform_10, window_bounds = array<i64: 32, 128>}, {transform_indices = @transform_11, window_bounds = array<i64: 8, 64>}]} {
    %c0_i32 = arith.constant 0 : i32
    %0 = arith.cmpi eq, %arg1, %c0_i32 : i32
    %1 = arith.extui %0 : i1 to i32
    %c0_i32_0 = arith.constant 0 : i32
    %2 = arith.cmpi ne, %1, %c0_i32_0 : i32
    scf.if %2 {
      %cst_122 = arith.constant 0.000000e+00 : f32
      %380 = vector.broadcast %cst_122 : f32 to vector<8x32xf32>
      %c0_123 = arith.constant 0 : index
      %c0_124 = arith.constant 0 : index
      %381 = vector.load %arg16[%c0_123, %c0_124] : memref<8x32xf32, #tpu.memory_space<vmem>>, vector<8x32xf32>
      tpu.vector_store %arg16[%c0_123, %c0_124], %380 {strides = array<i32>} : memref<8x32xf32, #tpu.memory_space<vmem>>, vector<8x32xf32>,
      %c0_125 = arith.constant 0 : index
      %c0_126 = arith.constant 0 : index
      %382 = vector.load %arg17[%c0_125, %c0_126] : memref<8x32xf32, #tpu.memory_space<vmem>>, vector<8x32xf32>
      tpu.vector_store %arg17[%c0_125, %c0_126], %380 {strides = array<i32>} : memref<8x32xf32, #tpu.memory_space<vmem>>, vector<8x32xf32>,
      %c0_127 = arith.constant 0 : index
      %c0_128 = arith.constant 0 : index
      %383 = vector.load %arg18[%c0_127, %c0_128] : memref<8x32xf32, #tpu.memory_space<vmem>>, vector<8x32xf32>
      tpu.vector_store %arg18[%c0_127, %c0_128], %380 {strides = array<i32>} : memref<8x32xf32, #tpu.memory_space<vmem>>, vector<8x32xf32>,
      %c0_129 = arith.constant 0 : index
      %c0_130 = arith.constant 0 : index
      %384 = vector.load %arg19[%c0_129, %c0_130] : memref<8x32xf32, #tpu.memory_space<vmem>>, vector<8x32xf32>
      tpu.vector_store %arg19[%c0_129, %c0_130], %380 {strides = array<i32>} : memref<8x32xf32, #tpu.memory_space<vmem>>, vector<8x32xf32>,
      %cst_131 = arith.constant 0.000000e+00 : f32
      %385 = vector.broadcast %cst_131 : f32 to vector<8x32xf32>
      %cst_132 = arith.constant 0xFF800000 : f32
      %386 = vector.broadcast %cst_132 : f32 to vector<8x32xf32>
      %c0_133 = arith.constant 0 : index
      %c0_134 = arith.constant 0 : index
      %387 = vector.load %arg2[%c0_133, %c0_134] : memref<8x1xf32, #tpu.memory_space<vmem>>, vector<8x1xf32>
      %cst_135 = arith.constant 0.000000e+00 : f32
      %388 = vector.broadcast %cst_135 : f32 to vector<8x1xf32>
      %389 = arith.cmpf one, %387, %388 : vector<8x1xf32>
      %390 = vector.shape_cast %389 : vector<8x1xi1> to vector<8x1xi1>
      %391 = vector.broadcast %390 : vector<8x1xi1> to vector<8x32xi1>
      %392 = arith.select %391, %385, %386 : vector<8x32xi1>, vector<8x32xf32>
      %c0_136 = arith.constant 0 : index
      %c0_137 = arith.constant 0 : index
      %393 = vector.load %arg20[%c0_136, %c0_137] : memref<8x32xf32, #tpu.memory_space<vmem>>, vector<8x32xf32>
      tpu.vector_store %arg20[%c0_136, %c0_137], %392 {strides = array<i32>} : memref<8x32xf32, #tpu.memory_space<vmem>>, vector<8x32xf32>,
      %c0_138 = arith.constant 0 : index
      %c0_139 = arith.constant 0 : index
      %394 = vector.load %arg21[%c0_138, %c0_139] : memref<8x32xf32, #tpu.memory_space<vmem>>, vector<8x32xf32>
      tpu.vector_store %arg21[%c0_138, %c0_139], %392 {strides = array<i32>} : memref<8x32xf32, #tpu.memory_space<vmem>>, vector<8x32xf32>,
    } else {
    }
    %c0 = arith.constant 0 : index
    %c0_1 = arith.constant 0 : index
    %c0_2 = arith.constant 0 : index
    %3 = vector.load %arg5[%c0, %c0_1, %c0_2] : memref<4x8x32xbf16, #tpu.memory_space<vmem>>, vector<4x8x32xbf16>
    %4 = vector.shape_cast %3 : vector<4x8x32xbf16> to vector<32x32xbf16>
    %c0_3 = arith.constant 0 : index
    %c0_4 = arith.constant 0 : index
    %5 = vector.load %arg7[%c0_3, %c0_4] : memref<32x128xbf16, #tpu.memory_space<vmem>>, vector<32x128xbf16>
    %cst = arith.constant dense<0.000000e+00> : vector<32x128xf32>
    %6 = tpu.matmul %4, %5, %cst {dimension_numbers = #tpu.dot_dimension_numbers<[1], [0], [0], [1], [0, 0, 1, 1], [], []>} : vector<32x32xbf16>, vector<32x128xbf16>, vector<32x128xf32> -> vector<32x128xf32>
    %c0_5 = arith.constant 0 : index
    %c0_6 = arith.constant 0 : index
    %7 = vector.load %arg9[%c0_5, %c0_6] : memref<1x128xf32, #tpu.memory_space<vmem>>, vector<1x128xf32>
    %8 = vector.broadcast %7 : vector<1x128xf32> to vector<32x128xf32>
    %9 = arith.addf %6, %8 : vector<32x128xf32>
    %c0_7 = arith.constant 0 : index
    %c0_8 = arith.constant 0 : index
    %10 = vector.load %arg14[%c0_7, %c0_8] : memref<32x128xf32, #tpu.memory_space<vmem>>, vector<32x128xf32>
    tpu.vector_store %arg14[%c0_7, %c0_8], %9 {strides = array<i32>} : memref<32x128xf32, #tpu.memory_space<vmem>>, vector<32x128xf32>,
    %c0_9 = arith.constant 0 : index
    %c0_10 = arith.constant 0 : index
    %c0_11 = arith.constant 0 : index
    %11 = vector.load %arg6[%c0_9, %c0_10, %c0_11] : memref<4x8x32xbf16, #tpu.memory_space<vmem>>, vector<4x8x32xbf16>
    %12 = vector.shape_cast %11 : vector<4x8x32xbf16> to vector<32x32xbf16>
    %c0_12 = arith.constant 0 : index
    %c0_13 = arith.constant 0 : index
    %13 = vector.load %arg8[%c0_12, %c0_13] : memref<32x128xbf16, #tpu.memory_space<vmem>>, vector<32x128xbf16>
    %cst_14 = arith.constant dense<0.000000e+00> : vector<32x128xf32>
    %14 = tpu.matmul %12, %13, %cst_14 {dimension_numbers = #tpu.dot_dimension_numbers<[1], [0], [0], [1], [0, 0, 1, 1], [], []>} : vector<32x32xbf16>, vector<32x128xbf16>, vector<32x128xf32> -> vector<32x128xf32>
    %c0_15 = arith.constant 0 : index
    %c0_16 = arith.constant 0 : index
    %15 = vector.load %arg10[%c0_15, %c0_16] : memref<1x128xf32, #tpu.memory_space<vmem>>, vector<1x128xf32>
    %16 = vector.broadcast %15 : vector<1x128xf32> to vector<32x128xf32>
    %17 = arith.addf %14, %16 : vector<32x128xf32>
    %c0_17 = arith.constant 0 : index
    %c0_18 = arith.constant 0 : index
    %18 = vector.load %arg15[%c0_17, %c0_18] : memref<32x128xf32, #tpu.memory_space<vmem>>, vector<32x128xf32>
    tpu.vector_store %arg15[%c0_17, %c0_18], %17 {strides = array<i32>} : memref<32x128xf32, #tpu.memory_space<vmem>>, vector<32x128xf32>,
    %c0_19 = arith.constant 0 : index
    %c0_20 = arith.constant 0 : index
    %19 = vector.load %arg11[%c0_19, %c0_20] : memref<32x128xbf16, #tpu.memory_space<vmem>>, vector<32x128xbf16>
    %c0_21 = arith.constant 0 : index
    %c0_22 = arith.constant 0 : index
    %20 = vector.load %arg12[%c0_21, %c0_22] : memref<32x128xbf16, #tpu.memory_space<vmem>>, vector<32x128xbf16>
    %c0_23 = arith.constant 0 : index
    %c0_24 = arith.constant 0 : index
    %21 = vector.load %arg16[%c0_23, %c0_24] : memref<8x32xf32, #tpu.memory_space<vmem>>, vector<8x32xf32>
    %c0_25 = arith.constant 0 : index
    %c0_26 = arith.constant 0 : index
    %22 = vector.load %arg17[%c0_25, %c0_26] : memref<8x32xf32, #tpu.memory_space<vmem>>, vector<8x32xf32>
    %c0_27 = arith.constant 0 : index
    %c0_28 = arith.constant 0 : index
    %23 = vector.load %arg18[%c0_27, %c0_28] : memref<8x32xf32, #tpu.memory_space<vmem>>, vector<8x32xf32>
    %c0_29 = arith.constant 0 : index
    %c0_30 = arith.constant 0 : index
    %24 = vector.load %arg19[%c0_29, %c0_30] : memref<8x32xf32, #tpu.memory_space<vmem>>, vector<8x32xf32>
    %c0_31 = arith.constant 0 : index
    %c0_32 = arith.constant 0 : index
    %25 = vector.load %arg20[%c0_31, %c0_32] : memref<8x32xf32, #tpu.memory_space<vmem>>, vector<8x32xf32>
    %c0_33 = arith.constant 0 : index
    %c0_34 = arith.constant 0 : index
    %26 = vector.load %arg21[%c0_33, %c0_34] : memref<8x32xf32, #tpu.memory_space<vmem>>, vector<8x32xf32>
    %c0_35 = arith.constant 0 : index
    %c0_36 = arith.constant 0 : index
    %c0_37 = arith.constant 0 : index
    %27 = vector.load %arg3[%c0_35, %c0_36, %c0_37] : memref<4x8x1xf32, #tpu.memory_space<vmem>>, vector<1x8x1xf32>
    %28 = vector.shape_cast %27 : vector<1x8x1xf32> to vector<8x1xf32>
    %cst_38 = arith.constant 0.000000e+00 : f32
    %29 = vector.broadcast %cst_38 : f32 to vector<8x1xf32>
    %30 = arith.cmpf one, %28, %29 : vector<8x1xf32>
    %c3 = arith.constant 3 : index
    %c0_39 = arith.constant 0 : index
    %c0_40 = arith.constant 0 : index
    %31 = vector.load %arg4[%c3, %c0_39, %c0_40] : memref<4x8x1xf32, #tpu.memory_space<vmem>>, vector<1x8x1xf32>
    %32 = vector.shape_cast %31 : vector<1x8x1xf32> to vector<8x1xf32>
    %cst_41 = arith.constant 0.000000e+00 : f32
    %33 = vector.broadcast %cst_41 : f32 to vector<8x1xf32>
    %34 = arith.cmpf one, %32, %33 : vector<8x1xf32>
    %c0_42 = arith.constant 0 : index
    %c0_43 = arith.constant 0 : index
    %35 = vector.load %arg14[%c0_42, %c0_43] : memref<32x128xf32, #tpu.memory_space<vmem>>, vector<8x128xf32>
    %36 = arith.truncf %21 : vector<8x32xf32> to vector<8x32xbf16>
    %cst_44 = arith.constant dense<0.000000e+00> : vector<8x128xf32>
    %37 = tpu.matmul %36, %19, %cst_44 {dimension_numbers = #tpu.dot_dimension_numbers<[1], [0], [0], [1], [0, 0, 1, 1], [], []>} : vector<8x32xbf16>, vector<32x128xbf16>, vector<8x128xf32> -> vector<8x128xf32>
    %38 = arith.addf %35, %37 : vector<8x128xf32>
    %39 = vector.extract_strided_slice %38 {offsets = [0, 0], sizes = [8, 32], strides = [1, 1]} : vector<8x128xf32> to vector<8x32xf32>
    %40 = arith.negf %39 : vector<8x32xf32>
    %41 = math.exp %40 : vector<8x32xf32>
    %cst_45 = arith.constant 1.000000e+00 : f32
    %42 = vector.broadcast %cst_45 : f32 to vector<8x32xf32>
    %43 = arith.addf %42, %41 : vector<8x32xf32>
    %44 = arith.divf %42, %43 : vector<8x32xf32>
    %45 = vector.extract_strided_slice %38 {offsets = [0, 32], sizes = [8, 32], strides = [1, 1]} : vector<8x128xf32> to vector<8x32xf32>
    %46 = arith.negf %45 : vector<8x32xf32>
    %47 = math.exp %46 : vector<8x32xf32>
    %cst_46 = arith.constant 1.000000e+00 : f32
    %48 = vector.broadcast %cst_46 : f32 to vector<8x32xf32>
    %49 = arith.addf %48, %47 : vector<8x32xf32>
    %50 = arith.divf %48, %49 : vector<8x32xf32>
    %51 = vector.extract_strided_slice %38 {offsets = [0, 64], sizes = [8, 32], strides = [1, 1]} : vector<8x128xf32> to vector<8x32xf32>
    %52 = math.tanh %51 : vector<8x32xf32>
    %53 = vector.extract_strided_slice %38 {offsets = [0, 96], sizes = [8, 32], strides = [1, 1]} : vector<8x128xf32> to vector<8x32xf32>
    %54 = arith.negf %53 : vector<8x32xf32>
    %55 = math.exp %54 : vector<8x32xf32>
    %cst_47 = arith.constant 1.000000e+00 : f32
    %56 = vector.broadcast %cst_47 : f32 to vector<8x32xf32>
    %57 = arith.addf %56, %55 : vector<8x32xf32>
    %58 = arith.divf %56, %57 : vector<8x32xf32>
    %59 = arith.mulf %50, %22 : vector<8x32xf32>
    %60 = arith.mulf %44, %52 : vector<8x32xf32>
    %61 = arith.addf %59, %60 : vector<8x32xf32>
    %62 = math.tanh %61 : vector<8x32xf32>
    %63 = arith.mulf %58, %62 : vector<8x32xf32>
    %64 = vector.shape_cast %30 : vector<8x1xi1> to vector<8x1xi1>
    %65 = vector.broadcast %64 : vector<8x1xi1> to vector<8x32xi1>
    %66 = arith.select %65, %61, %22 : vector<8x32xi1>, vector<8x32xf32>
    %67 = vector.shape_cast %30 : vector<8x1xi1> to vector<8x1xi1>
    %68 = vector.broadcast %67 : vector<8x1xi1> to vector<8x32xi1>
    %69 = arith.select %68, %63, %21 : vector<8x32xi1>, vector<8x32xf32>
    %70 = arith.maximumf %25, %63 : vector<8x32xf32>
    %71 = vector.shape_cast %30 : vector<8x1xi1> to vector<8x1xi1>
    %72 = vector.broadcast %71 : vector<8x1xi1> to vector<8x32xi1>
    %73 = arith.select %72, %70, %25 : vector<8x32xi1>, vector<8x32xf32>
    %c24 = arith.constant 24 : index
    %c0_48 = arith.constant 0 : index
    %74 = vector.load %arg15[%c24, %c0_48] : memref<32x128xf32, #tpu.memory_space<vmem>>, vector<8x128xf32>
    %75 = arith.truncf %23 : vector<8x32xf32> to vector<8x32xbf16>
    %cst_49 = arith.constant dense<0.000000e+00> : vector<8x128xf32>
    %76 = tpu.matmul %75, %20, %cst_49 {dimension_numbers = #tpu.dot_dimension_numbers<[1], [0], [0], [1], [0, 0, 1, 1], [], []>} : vector<8x32xbf16>, vector<32x128xbf16>, vector<8x128xf32> -> vector<8x128xf32>
    %77 = arith.addf %74, %76 : vector<8x128xf32>
    %78 = vector.extract_strided_slice %77 {offsets = [0, 0], sizes = [8, 32], strides = [1, 1]} : vector<8x128xf32> to vector<8x32xf32>
    %79 = arith.negf %78 : vector<8x32xf32>
    %80 = math.exp %79 : vector<8x32xf32>
    %cst_50 = arith.constant 1.000000e+00 : f32
    %81 = vector.broadcast %cst_50 : f32 to vector<8x32xf32>
    %82 = arith.addf %81, %80 : vector<8x32xf32>
    %83 = arith.divf %81, %82 : vector<8x32xf32>
    %84 = vector.extract_strided_slice %77 {offsets = [0, 32], sizes = [8, 32], strides = [1, 1]} : vector<8x128xf32> to vector<8x32xf32>
    %85 = arith.negf %84 : vector<8x32xf32>
    %86 = math.exp %85 : vector<8x32xf32>
    %cst_51 = arith.constant 1.000000e+00 : f32
    %87 = vector.broadcast %cst_51 : f32 to vector<8x32xf32>
    %88 = arith.addf %87, %86 : vector<8x32xf32>
    %89 = arith.divf %87, %88 : vector<8x32xf32>
    %90 = vector.extract_strided_slice %77 {offsets = [0, 64], sizes = [8, 32], strides = [1, 1]} : vector<8x128xf32> to vector<8x32xf32>
    %91 = math.tanh %90 : vector<8x32xf32>
    %92 = vector.extract_strided_slice %77 {offsets = [0, 96], sizes = [8, 32], strides = [1, 1]} : vector<8x128xf32> to vector<8x32xf32>
    %93 = arith.negf %92 : vector<8x32xf32>
    %94 = math.exp %93 : vector<8x32xf32>
    %cst_52 = arith.constant 1.000000e+00 : f32
    %95 = vector.broadcast %cst_52 : f32 to vector<8x32xf32>
    %96 = arith.addf %95, %94 : vector<8x32xf32>
    %97 = arith.divf %95, %96 : vector<8x32xf32>
    %98 = arith.mulf %89, %24 : vector<8x32xf32>
    %99 = arith.mulf %83, %91 : vector<8x32xf32>
    %100 = arith.addf %98, %99 : vector<8x32xf32>
    %101 = math.tanh %100 : vector<8x32xf32>
    %102 = arith.mulf %97, %101 : vector<8x32xf32>
    %103 = vector.shape_cast %34 : vector<8x1xi1> to vector<8x1xi1>
    %104 = vector.broadcast %103 : vector<8x1xi1> to vector<8x32xi1>
    %105 = arith.select %104, %100, %24 : vector<8x32xi1>, vector<8x32xf32>
    %106 = vector.shape_cast %34 : vector<8x1xi1> to vector<8x1xi1>
    %107 = vector.broadcast %106 : vector<8x1xi1> to vector<8x32xi1>
    %108 = arith.select %107, %102, %23 : vector<8x32xi1>, vector<8x32xf32>
    %109 = arith.maximumf %26, %102 : vector<8x32xf32>
    %110 = vector.shape_cast %34 : vector<8x1xi1> to vector<8x1xi1>
    %111 = vector.broadcast %110 : vector<8x1xi1> to vector<8x32xi1>
    %112 = arith.select %111, %109, %26 : vector<8x32xi1>, vector<8x32xf32>
    %c1 = arith.constant 1 : index
    %c0_53 = arith.constant 0 : index
    %c0_54 = arith.constant 0 : index
    %113 = vector.load %arg3[%c1, %c0_53, %c0_54] : memref<4x8x1xf32, #tpu.memory_space<vmem>>, vector<1x8x1xf32>
    %114 = vector.shape_cast %113 : vector<1x8x1xf32> to vector<8x1xf32>
    %cst_55 = arith.constant 0.000000e+00 : f32
    %115 = vector.broadcast %cst_55 : f32 to vector<8x1xf32>
    %116 = arith.cmpf one, %114, %115 : vector<8x1xf32>
    %c2 = arith.constant 2 : index
    %c0_56 = arith.constant 0 : index
    %c0_57 = arith.constant 0 : index
    %117 = vector.load %arg4[%c2, %c0_56, %c0_57] : memref<4x8x1xf32, #tpu.memory_space<vmem>>, vector<1x8x1xf32>
    %118 = vector.shape_cast %117 : vector<1x8x1xf32> to vector<8x1xf32>
    %cst_58 = arith.constant 0.000000e+00 : f32
    %119 = vector.broadcast %cst_58 : f32 to vector<8x1xf32>
    %120 = arith.cmpf one, %118, %119 : vector<8x1xf32>
    %c8 = arith.constant 8 : index
    %c0_59 = arith.constant 0 : index
    %121 = vector.load %arg14[%c8, %c0_59] : memref<32x128xf32, #tpu.memory_space<vmem>>, vector<8x128xf32>
    %122 = arith.truncf %69 : vector<8x32xf32> to vector<8x32xbf16>
    %cst_60 = arith.constant dense<0.000000e+00> : vector<8x128xf32>
    %123 = tpu.matmul %122, %19, %cst_60 {dimension_numbers = #tpu.dot_dimension_numbers<[1], [0], [0], [1], [0, 0, 1, 1], [], []>} : vector<8x32xbf16>, vector<32x128xbf16>, vector<8x128xf32> -> vector<8x128xf32>
    %124 = arith.addf %121, %123 : vector<8x128xf32>
    %125 = vector.extract_strided_slice %124 {offsets = [0, 0], sizes = [8, 32], strides = [1, 1]} : vector<8x128xf32> to vector<8x32xf32>
    %126 = arith.negf %125 : vector<8x32xf32>
    %127 = math.exp %126 : vector<8x32xf32>
    %cst_61 = arith.constant 1.000000e+00 : f32
    %128 = vector.broadcast %cst_61 : f32 to vector<8x32xf32>
    %129 = arith.addf %128, %127 : vector<8x32xf32>
    %130 = arith.divf %128, %129 : vector<8x32xf32>
    %131 = vector.extract_strided_slice %124 {offsets = [0, 32], sizes = [8, 32], strides = [1, 1]} : vector<8x128xf32> to vector<8x32xf32>
    %132 = arith.negf %131 : vector<8x32xf32>
    %133 = math.exp %132 : vector<8x32xf32>
    %cst_62 = arith.constant 1.000000e+00 : f32
    %134 = vector.broadcast %cst_62 : f32 to vector<8x32xf32>
    %135 = arith.addf %134, %133 : vector<8x32xf32>
    %136 = arith.divf %134, %135 : vector<8x32xf32>
    %137 = vector.extract_strided_slice %124 {offsets = [0, 64], sizes = [8, 32], strides = [1, 1]} : vector<8x128xf32> to vector<8x32xf32>
    %138 = math.tanh %137 : vector<8x32xf32>
    %139 = vector.extract_strided_slice %124 {offsets = [0, 96], sizes = [8, 32], strides = [1, 1]} : vector<8x128xf32> to vector<8x32xf32>
    %140 = arith.negf %139 : vector<8x32xf32>
    %141 = math.exp %140 : vector<8x32xf32>
    %cst_63 = arith.constant 1.000000e+00 : f32
    %142 = vector.broadcast %cst_63 : f32 to vector<8x32xf32>
    %143 = arith.addf %142, %141 : vector<8x32xf32>
    %144 = arith.divf %142, %143 : vector<8x32xf32>
    %145 = arith.mulf %136, %66 : vector<8x32xf32>
    %146 = arith.mulf %130, %138 : vector<8x32xf32>
    %147 = arith.addf %145, %146 : vector<8x32xf32>
    %148 = math.tanh %147 : vector<8x32xf32>
    %149 = arith.mulf %144, %148 : vector<8x32xf32>
    %150 = vector.shape_cast %116 : vector<8x1xi1> to vector<8x1xi1>
    %151 = vector.broadcast %150 : vector<8x1xi1> to vector<8x32xi1>
    %152 = arith.select %151, %147, %66 : vector<8x32xi1>, vector<8x32xf32>
    %153 = vector.shape_cast %116 : vector<8x1xi1> to vector<8x1xi1>
    %154 = vector.broadcast %153 : vector<8x1xi1> to vector<8x32xi1>
    %155 = arith.select %154, %149, %69 : vector<8x32xi1>, vector<8x32xf32>
    %156 = arith.maximumf %73, %149 : vector<8x32xf32>
    %157 = vector.shape_cast %116 : vector<8x1xi1> to vector<8x1xi1>
    %158 = vector.broadcast %157 : vector<8x1xi1> to vector<8x32xi1>
    %159 = arith.select %158, %156, %73 : vector<8x32xi1>, vector<8x32xf32>
    %c16 = arith.constant 16 : index
    %c0_64 = arith.constant 0 : index
    %160 = vector.load %arg15[%c16, %c0_64] : memref<32x128xf32, #tpu.memory_space<vmem>>, vector<8x128xf32>
    %161 = arith.truncf %108 : vector<8x32xf32> to vector<8x32xbf16>
    %cst_65 = arith.constant dense<0.000000e+00> : vector<8x128xf32>
    %162 = tpu.matmul %161, %20, %cst_65 {dimension_numbers = #tpu.dot_dimension_numbers<[1], [0], [0], [1], [0, 0, 1, 1], [], []>} : vector<8x32xbf16>, vector<32x128xbf16>, vector<8x128xf32> -> vector<8x128xf32>
    %163 = arith.addf %160, %162 : vector<8x128xf32>
    %164 = vector.extract_strided_slice %163 {offsets = [0, 0], sizes = [8, 32], strides = [1, 1]} : vector<8x128xf32> to vector<8x32xf32>
    %165 = arith.negf %164 : vector<8x32xf32>
    %166 = math.exp %165 : vector<8x32xf32>
    %cst_66 = arith.constant 1.000000e+00 : f32
    %167 = vector.broadcast %cst_66 : f32 to vector<8x32xf32>
    %168 = arith.addf %167, %166 : vector<8x32xf32>
    %169 = arith.divf %167, %168 : vector<8x32xf32>
    %170 = vector.extract_strided_slice %163 {offsets = [0, 32], sizes = [8, 32], strides = [1, 1]} : vector<8x128xf32> to vector<8x32xf32>
    %171 = arith.negf %170 : vector<8x32xf32>
    %172 = math.exp %171 : vector<8x32xf32>
    %cst_67 = arith.constant 1.000000e+00 : f32
    %173 = vector.broadcast %cst_67 : f32 to vector<8x32xf32>
    %174 = arith.addf %173, %172 : vector<8x32xf32>
    %175 = arith.divf %173, %174 : vector<8x32xf32>
    %176 = vector.extract_strided_slice %163 {offsets = [0, 64], sizes = [8, 32], strides = [1, 1]} : vector<8x128xf32> to vector<8x32xf32>
    %177 = math.tanh %176 : vector<8x32xf32>
    %178 = vector.extract_strided_slice %163 {offsets = [0, 96], sizes = [8, 32], strides = [1, 1]} : vector<8x128xf32> to vector<8x32xf32>
    %179 = arith.negf %178 : vector<8x32xf32>
    %180 = math.exp %179 : vector<8x32xf32>
    %cst_68 = arith.constant 1.000000e+00 : f32
    %181 = vector.broadcast %cst_68 : f32 to vector<8x32xf32>
    %182 = arith.addf %181, %180 : vector<8x32xf32>
    %183 = arith.divf %181, %182 : vector<8x32xf32>
    %184 = arith.mulf %175, %105 : vector<8x32xf32>
    %185 = arith.mulf %169, %177 : vector<8x32xf32>
    %186 = arith.addf %184, %185 : vector<8x32xf32>
    %187 = math.tanh %186 : vector<8x32xf32>
    %188 = arith.mulf %183, %187 : vector<8x32xf32>
    %189 = vector.shape_cast %120 : vector<8x1xi1> to vector<8x1xi1>
    %190 = vector.broadcast %189 : vector<8x1xi1> to vector<8x32xi1>
    %191 = arith.select %190, %186, %105 : vector<8x32xi1>, vector<8x32xf32>
    %192 = vector.shape_cast %120 : vector<8x1xi1> to vector<8x1xi1>
    %193 = vector.broadcast %192 : vector<8x1xi1> to vector<8x32xi1>
    %194 = arith.select %193, %188, %108 : vector<8x32xi1>, vector<8x32xf32>
    %195 = arith.maximumf %112, %188 : vector<8x32xf32>
    %196 = vector.shape_cast %120 : vector<8x1xi1> to vector<8x1xi1>
    %197 = vector.broadcast %196 : vector<8x1xi1> to vector<8x32xi1>
    %198 = arith.select %197, %195, %112 : vector<8x32xi1>, vector<8x32xf32>
    %c2_69 = arith.constant 2 : index
    %c0_70 = arith.constant 0 : index
    %c0_71 = arith.constant 0 : index
    %199 = vector.load %arg3[%c2_69, %c0_70, %c0_71] : memref<4x8x1xf32, #tpu.memory_space<vmem>>, vector<1x8x1xf32>
    %200 = vector.shape_cast %199 : vector<1x8x1xf32> to vector<8x1xf32>
    %cst_72 = arith.constant 0.000000e+00 : f32
    %201 = vector.broadcast %cst_72 : f32 to vector<8x1xf32>
    %202 = arith.cmpf one, %200, %201 : vector<8x1xf32>
    %c1_73 = arith.constant 1 : index
    %c0_74 = arith.constant 0 : index
    %c0_75 = arith.constant 0 : index
    %203 = vector.load %arg4[%c1_73, %c0_74, %c0_75] : memref<4x8x1xf32, #tpu.memory_space<vmem>>, vector<1x8x1xf32>
    %204 = vector.shape_cast %203 : vector<1x8x1xf32> to vector<8x1xf32>
    %cst_76 = arith.constant 0.000000e+00 : f32
    %205 = vector.broadcast %cst_76 : f32 to vector<8x1xf32>
    %206 = arith.cmpf one, %204, %205 : vector<8x1xf32>
    %c16_77 = arith.constant 16 : index
    %c0_78 = arith.constant 0 : index
    %207 = vector.load %arg14[%c16_77, %c0_78] : memref<32x128xf32, #tpu.memory_space<vmem>>, vector<8x128xf32>
    %208 = arith.truncf %155 : vector<8x32xf32> to vector<8x32xbf16>
    %cst_79 = arith.constant dense<0.000000e+00> : vector<8x128xf32>
    %209 = tpu.matmul %208, %19, %cst_79 {dimension_numbers = #tpu.dot_dimension_numbers<[1], [0], [0], [1], [0, 0, 1, 1], [], []>} : vector<8x32xbf16>, vector<32x128xbf16>, vector<8x128xf32> -> vector<8x128xf32>
    %210 = arith.addf %207, %209 : vector<8x128xf32>
    %211 = vector.extract_strided_slice %210 {offsets = [0, 0], sizes = [8, 32], strides = [1, 1]} : vector<8x128xf32> to vector<8x32xf32>
    %212 = arith.negf %211 : vector<8x32xf32>
    %213 = math.exp %212 : vector<8x32xf32>
    %cst_80 = arith.constant 1.000000e+00 : f32
    %214 = vector.broadcast %cst_80 : f32 to vector<8x32xf32>
    %215 = arith.addf %214, %213 : vector<8x32xf32>
    %216 = arith.divf %214, %215 : vector<8x32xf32>
    %217 = vector.extract_strided_slice %210 {offsets = [0, 32], sizes = [8, 32], strides = [1, 1]} : vector<8x128xf32> to vector<8x32xf32>
    %218 = arith.negf %217 : vector<8x32xf32>
    %219 = math.exp %218 : vector<8x32xf32>
    %cst_81 = arith.constant 1.000000e+00 : f32
    %220 = vector.broadcast %cst_81 : f32 to vector<8x32xf32>
    %221 = arith.addf %220, %219 : vector<8x32xf32>
    %222 = arith.divf %220, %221 : vector<8x32xf32>
    %223 = vector.extract_strided_slice %210 {offsets = [0, 64], sizes = [8, 32], strides = [1, 1]} : vector<8x128xf32> to vector<8x32xf32>
    %224 = math.tanh %223 : vector<8x32xf32>
    %225 = vector.extract_strided_slice %210 {offsets = [0, 96], sizes = [8, 32], strides = [1, 1]} : vector<8x128xf32> to vector<8x32xf32>
    %226 = arith.negf %225 : vector<8x32xf32>
    %227 = math.exp %226 : vector<8x32xf32>
    %cst_82 = arith.constant 1.000000e+00 : f32
    %228 = vector.broadcast %cst_82 : f32 to vector<8x32xf32>
    %229 = arith.addf %228, %227 : vector<8x32xf32>
    %230 = arith.divf %228, %229 : vector<8x32xf32>
    %231 = arith.mulf %222, %152 : vector<8x32xf32>
    %232 = arith.mulf %216, %224 : vector<8x32xf32>
    %233 = arith.addf %231, %232 : vector<8x32xf32>
    %234 = math.tanh %233 : vector<8x32xf32>
    %235 = arith.mulf %230, %234 : vector<8x32xf32>
    %236 = vector.shape_cast %202 : vector<8x1xi1> to vector<8x1xi1>
    %237 = vector.broadcast %236 : vector<8x1xi1> to vector<8x32xi1>
    %238 = arith.select %237, %233, %152 : vector<8x32xi1>, vector<8x32xf32>
    %239 = vector.shape_cast %202 : vector<8x1xi1> to vector<8x1xi1>
    %240 = vector.broadcast %239 : vector<8x1xi1> to vector<8x32xi1>
    %241 = arith.select %240, %235, %155 : vector<8x32xi1>, vector<8x32xf32>
    %242 = arith.maximumf %159, %235 : vector<8x32xf32>
    %243 = vector.shape_cast %202 : vector<8x1xi1> to vector<8x1xi1>
    %244 = vector.broadcast %243 : vector<8x1xi1> to vector<8x32xi1>
    %245 = arith.select %244, %242, %159 : vector<8x32xi1>, vector<8x32xf32>
    %c8_83 = arith.constant 8 : index
    %c0_84 = arith.constant 0 : index
    %246 = vector.load %arg15[%c8_83, %c0_84] : memref<32x128xf32, #tpu.memory_space<vmem>>, vector<8x128xf32>
    %247 = arith.truncf %194 : vector<8x32xf32> to vector<8x32xbf16>
    %cst_85 = arith.constant dense<0.000000e+00> : vector<8x128xf32>
    %248 = tpu.matmul %247, %20, %cst_85 {dimension_numbers = #tpu.dot_dimension_numbers<[1], [0], [0], [1], [0, 0, 1, 1], [], []>} : vector<8x32xbf16>, vector<32x128xbf16>, vector<8x128xf32> -> vector<8x128xf32>
    %249 = arith.addf %246, %248 : vector<8x128xf32>
    %250 = vector.extract_strided_slice %249 {offsets = [0, 0], sizes = [8, 32], strides = [1, 1]} : vector<8x128xf32> to vector<8x32xf32>
    %251 = arith.negf %250 : vector<8x32xf32>
    %252 = math.exp %251 : vector<8x32xf32>
    %cst_86 = arith.constant 1.000000e+00 : f32
    %253 = vector.broadcast %cst_86 : f32 to vector<8x32xf32>
    %254 = arith.addf %253, %252 : vector<8x32xf32>
    %255 = arith.divf %253, %254 : vector<8x32xf32>
    %256 = vector.extract_strided_slice %249 {offsets = [0, 32], sizes = [8, 32], strides = [1, 1]} : vector<8x128xf32> to vector<8x32xf32>
    %257 = arith.negf %256 : vector<8x32xf32>
    %258 = math.exp %257 : vector<8x32xf32>
    %cst_87 = arith.constant 1.000000e+00 : f32
    %259 = vector.broadcast %cst_87 : f32 to vector<8x32xf32>
    %260 = arith.addf %259, %258 : vector<8x32xf32>
    %261 = arith.divf %259, %260 : vector<8x32xf32>
    %262 = vector.extract_strided_slice %249 {offsets = [0, 64], sizes = [8, 32], strides = [1, 1]} : vector<8x128xf32> to vector<8x32xf32>
    %263 = math.tanh %262 : vector<8x32xf32>
    %264 = vector.extract_strided_slice %249 {offsets = [0, 96], sizes = [8, 32], strides = [1, 1]} : vector<8x128xf32> to vector<8x32xf32>
    %265 = arith.negf %264 : vector<8x32xf32>
    %266 = math.exp %265 : vector<8x32xf32>
    %cst_88 = arith.constant 1.000000e+00 : f32
    %267 = vector.broadcast %cst_88 : f32 to vector<8x32xf32>
    %268 = arith.addf %267, %266 : vector<8x32xf32>
    %269 = arith.divf %267, %268 : vector<8x32xf32>
    %270 = arith.mulf %261, %191 : vector<8x32xf32>
    %271 = arith.mulf %255, %263 : vector<8x32xf32>
    %272 = arith.addf %270, %271 : vector<8x32xf32>
    %273 = math.tanh %272 : vector<8x32xf32>
    %274 = arith.mulf %269, %273 : vector<8x32xf32>
    %275 = vector.shape_cast %206 : vector<8x1xi1> to vector<8x1xi1>
    %276 = vector.broadcast %275 : vector<8x1xi1> to vector<8x32xi1>
    %277 = arith.select %276, %272, %191 : vector<8x32xi1>, vector<8x32xf32>
    %278 = vector.shape_cast %206 : vector<8x1xi1> to vector<8x1xi1>
    %279 = vector.broadcast %278 : vector<8x1xi1> to vector<8x32xi1>
    %280 = arith.select %279, %274, %194 : vector<8x32xi1>, vector<8x32xf32>
    %281 = arith.maximumf %198, %274 : vector<8x32xf32>
    %282 = vector.shape_cast %206 : vector<8x1xi1> to vector<8x1xi1>
    %283 = vector.broadcast %282 : vector<8x1xi1> to vector<8x32xi1>
    %284 = arith.select %283, %281, %198 : vector<8x32xi1>, vector<8x32xf32>
    %c3_89 = arith.constant 3 : index
    %c0_90 = arith.constant 0 : index
    %c0_91 = arith.constant 0 : index
    %285 = vector.load %arg3[%c3_89, %c0_90, %c0_91] : memref<4x8x1xf32, #tpu.memory_space<vmem>>, vector<1x8x1xf32>
    %286 = vector.shape_cast %285 : vector<1x8x1xf32> to vector<8x1xf32>
    %cst_92 = arith.constant 0.000000e+00 : f32
    %287 = vector.broadcast %cst_92 : f32 to vector<8x1xf32>
    %288 = arith.cmpf one, %286, %287 : vector<8x1xf32>
    %c0_93 = arith.constant 0 : index
    %c0_94 = arith.constant 0 : index
    %c0_95 = arith.constant 0 : index
    %289 = vector.load %arg4[%c0_93, %c0_94, %c0_95] : memref<4x8x1xf32, #tpu.memory_space<vmem>>, vector<1x8x1xf32>
    %290 = vector.shape_cast %289 : vector<1x8x1xf32> to vector<8x1xf32>
    %cst_96 = arith.constant 0.000000e+00 : f32
    %291 = vector.broadcast %cst_96 : f32 to vector<8x1xf32>
    %292 = arith.cmpf one, %290, %291 : vector<8x1xf32>
    %c24_97 = arith.constant 24 : index
    %c0_98 = arith.constant 0 : index
    %293 = vector.load %arg14[%c24_97, %c0_98] : memref<32x128xf32, #tpu.memory_space<vmem>>, vector<8x128xf32>
    %294 = arith.truncf %241 : vector<8x32xf32> to vector<8x32xbf16>
    %cst_99 = arith.constant dense<0.000000e+00> : vector<8x128xf32>
    %295 = tpu.matmul %294, %19, %cst_99 {dimension_numbers = #tpu.dot_dimension_numbers<[1], [0], [0], [1], [0, 0, 1, 1], [], []>} : vector<8x32xbf16>, vector<32x128xbf16>, vector<8x128xf32> -> vector<8x128xf32>
    %296 = arith.addf %293, %295 : vector<8x128xf32>
    %297 = vector.extract_strided_slice %296 {offsets = [0, 0], sizes = [8, 32], strides = [1, 1]} : vector<8x128xf32> to vector<8x32xf32>
    %298 = arith.negf %297 : vector<8x32xf32>
    %299 = math.exp %298 : vector<8x32xf32>
    %cst_100 = arith.constant 1.000000e+00 : f32
    %300 = vector.broadcast %cst_100 : f32 to vector<8x32xf32>
    %301 = arith.addf %300, %299 : vector<8x32xf32>
    %302 = arith.divf %300, %301 : vector<8x32xf32>
    %303 = vector.extract_strided_slice %296 {offsets = [0, 32], sizes = [8, 32], strides = [1, 1]} : vector<8x128xf32> to vector<8x32xf32>
    %304 = arith.negf %303 : vector<8x32xf32>
    %305 = math.exp %304 : vector<8x32xf32>
    %cst_101 = arith.constant 1.000000e+00 : f32
    %306 = vector.broadcast %cst_101 : f32 to vector<8x32xf32>
    %307 = arith.addf %306, %305 : vector<8x32xf32>
    %308 = arith.divf %306, %307 : vector<8x32xf32>
    %309 = vector.extract_strided_slice %296 {offsets = [0, 64], sizes = [8, 32], strides = [1, 1]} : vector<8x128xf32> to vector<8x32xf32>
    %310 = math.tanh %309 : vector<8x32xf32>
    %311 = vector.extract_strided_slice %296 {offsets = [0, 96], sizes = [8, 32], strides = [1, 1]} : vector<8x128xf32> to vector<8x32xf32>
    %312 = arith.negf %311 : vector<8x32xf32>
    %313 = math.exp %312 : vector<8x32xf32>
    %cst_102 = arith.constant 1.000000e+00 : f32
    %314 = vector.broadcast %cst_102 : f32 to vector<8x32xf32>
    %315 = arith.addf %314, %313 : vector<8x32xf32>
    %316 = arith.divf %314, %315 : vector<8x32xf32>
    %317 = arith.mulf %308, %238 : vector<8x32xf32>
    %318 = arith.mulf %302, %310 : vector<8x32xf32>
    %319 = arith.addf %317, %318 : vector<8x32xf32>
    %320 = math.tanh %319 : vector<8x32xf32>
    %321 = arith.mulf %316, %320 : vector<8x32xf32>
    %322 = vector.shape_cast %288 : vector<8x1xi1> to vector<8x1xi1>
    %323 = vector.broadcast %322 : vector<8x1xi1> to vector<8x32xi1>
    %324 = arith.select %323, %319, %238 : vector<8x32xi1>, vector<8x32xf32>
    %325 = vector.shape_cast %288 : vector<8x1xi1> to vector<8x1xi1>
    %326 = vector.broadcast %325 : vector<8x1xi1> to vector<8x32xi1>
    %327 = arith.select %326, %321, %241 : vector<8x32xi1>, vector<8x32xf32>
    %328 = arith.maximumf %245, %321 : vector<8x32xf32>
    %329 = vector.shape_cast %288 : vector<8x1xi1> to vector<8x1xi1>
    %330 = vector.broadcast %329 : vector<8x1xi1> to vector<8x32xi1>
    %331 = arith.select %330, %328, %245 : vector<8x32xi1>, vector<8x32xf32>
    %c0_103 = arith.constant 0 : index
    %c0_104 = arith.constant 0 : index
    %332 = vector.load %arg15[%c0_103, %c0_104] : memref<32x128xf32, #tpu.memory_space<vmem>>, vector<8x128xf32>
    %333 = arith.truncf %280 : vector<8x32xf32> to vector<8x32xbf16>
    %cst_105 = arith.constant dense<0.000000e+00> : vector<8x128xf32>
    %334 = tpu.matmul %333, %20, %cst_105 {dimension_numbers = #tpu.dot_dimension_numbers<[1], [0], [0], [1], [0, 0, 1, 1], [], []>} : vector<8x32xbf16>, vector<32x128xbf16>, vector<8x128xf32> -> vector<8x128xf32>
    %335 = arith.addf %332, %334 : vector<8x128xf32>
    %336 = vector.extract_strided_slice %335 {offsets = [0, 0], sizes = [8, 32], strides = [1, 1]} : vector<8x128xf32> to vector<8x32xf32>
    %337 = arith.negf %336 : vector<8x32xf32>
    %338 = math.exp %337 : vector<8x32xf32>
    %cst_106 = arith.constant 1.000000e+00 : f32
    %339 = vector.broadcast %cst_106 : f32 to vector<8x32xf32>
    %340 = arith.addf %339, %338 : vector<8x32xf32>
    %341 = arith.divf %339, %340 : vector<8x32xf32>
    %342 = vector.extract_strided_slice %335 {offsets = [0, 32], sizes = [8, 32], strides = [1, 1]} : vector<8x128xf32> to vector<8x32xf32>
    %343 = arith.negf %342 : vector<8x32xf32>
    %344 = math.exp %343 : vector<8x32xf32>
    %cst_107 = arith.constant 1.000000e+00 : f32
    %345 = vector.broadcast %cst_107 : f32 to vector<8x32xf32>
    %346 = arith.addf %345, %344 : vector<8x32xf32>
    %347 = arith.divf %345, %346 : vector<8x32xf32>
    %348 = vector.extract_strided_slice %335 {offsets = [0, 64], sizes = [8, 32], strides = [1, 1]} : vector<8x128xf32> to vector<8x32xf32>
    %349 = math.tanh %348 : vector<8x32xf32>
    %350 = vector.extract_strided_slice %335 {offsets = [0, 96], sizes = [8, 32], strides = [1, 1]} : vector<8x128xf32> to vector<8x32xf32>
    %351 = arith.negf %350 : vector<8x32xf32>
    %352 = math.exp %351 : vector<8x32xf32>
    %cst_108 = arith.constant 1.000000e+00 : f32
    %353 = vector.broadcast %cst_108 : f32 to vector<8x32xf32>
    %354 = arith.addf %353, %352 : vector<8x32xf32>
    %355 = arith.divf %353, %354 : vector<8x32xf32>
    %356 = arith.mulf %347, %277 : vector<8x32xf32>
    %357 = arith.mulf %341, %349 : vector<8x32xf32>
    %358 = arith.addf %356, %357 : vector<8x32xf32>
    %359 = math.tanh %358 : vector<8x32xf32>
    %360 = arith.mulf %355, %359 : vector<8x32xf32>
    %361 = vector.shape_cast %292 : vector<8x1xi1> to vector<8x1xi1>
    %362 = vector.broadcast %361 : vector<8x1xi1> to vector<8x32xi1>
    %363 = arith.select %362, %358, %277 : vector<8x32xi1>, vector<8x32xf32>
    %364 = vector.shape_cast %292 : vector<8x1xi1> to vector<8x1xi1>
    %365 = vector.broadcast %364 : vector<8x1xi1> to vector<8x32xi1>
    %366 = arith.select %365, %360, %280 : vector<8x32xi1>, vector<8x32xf32>
    %367 = arith.maximumf %284, %360 : vector<8x32xf32>
    %368 = vector.shape_cast %292 : vector<8x1xi1> to vector<8x1xi1>
    %369 = vector.broadcast %368 : vector<8x1xi1> to vector<8x32xi1>
    %370 = arith.select %369, %367, %284 : vector<8x32xi1>, vector<8x32xf32>
    %c0_109 = arith.constant 0 : index
    %c0_110 = arith.constant 0 : index
    %371 = vector.load %arg16[%c0_109, %c0_110] : memref<8x32xf32, #tpu.memory_space<vmem>>, vector<8x32xf32>
    tpu.vector_store %arg16[%c0_109, %c0_110], %327 {strides = array<i32>} : memref<8x32xf32, #tpu.memory_space<vmem>>, vector<8x32xf32>,
    %c0_111 = arith.constant 0 : index
    %c0_112 = arith.constant 0 : index
    %372 = vector.load %arg17[%c0_111, %c0_112] : memref<8x32xf32, #tpu.memory_space<vmem>>, vector<8x32xf32>
    tpu.vector_store %arg17[%c0_111, %c0_112], %324 {strides = array<i32>} : memref<8x32xf32, #tpu.memory_space<vmem>>, vector<8x32xf32>,
    %c0_113 = arith.constant 0 : index
    %c0_114 = arith.constant 0 : index
    %373 = vector.load %arg18[%c0_113, %c0_114] : memref<8x32xf32, #tpu.memory_space<vmem>>, vector<8x32xf32>
    tpu.vector_store %arg18[%c0_113, %c0_114], %366 {strides = array<i32>} : memref<8x32xf32, #tpu.memory_space<vmem>>, vector<8x32xf32>,
    %c0_115 = arith.constant 0 : index
    %c0_116 = arith.constant 0 : index
    %374 = vector.load %arg19[%c0_115, %c0_116] : memref<8x32xf32, #tpu.memory_space<vmem>>, vector<8x32xf32>
    tpu.vector_store %arg19[%c0_115, %c0_116], %363 {strides = array<i32>} : memref<8x32xf32, #tpu.memory_space<vmem>>, vector<8x32xf32>,
    %c0_117 = arith.constant 0 : index
    %c0_118 = arith.constant 0 : index
    %375 = vector.load %arg20[%c0_117, %c0_118] : memref<8x32xf32, #tpu.memory_space<vmem>>, vector<8x32xf32>
    tpu.vector_store %arg20[%c0_117, %c0_118], %331 {strides = array<i32>} : memref<8x32xf32, #tpu.memory_space<vmem>>, vector<8x32xf32>,
    %c0_119 = arith.constant 0 : index
    %c0_120 = arith.constant 0 : index
    %376 = vector.load %arg21[%c0_119, %c0_120] : memref<8x32xf32, #tpu.memory_space<vmem>>, vector<8x32xf32>
    tpu.vector_store %arg21[%c0_119, %c0_120], %370 {strides = array<i32>} : memref<8x32xf32, #tpu.memory_space<vmem>>, vector<8x32xf32>,
    %c1_i32 = arith.constant 1 : i32
    %377 = arith.cmpi eq, %arg1, %c1_i32 : i32
    %378 = arith.extui %377 : i1 to i32
    %c0_i32_121 = arith.constant 0 : i32
    %379 = arith.cmpi ne, %378, %c0_i32_121 : i32
    scf.if %379 {
      %380 = tpu.concatenate %331, %370 in 1 : vector<8x32xf32>, vector<8x32xf32> -> vector<8x64xf32>
      %c0_122 = arith.constant 0 : index
      %c0_123 = arith.constant 0 : index
      %381 = vector.load %arg13[%c0_122, %c0_123] : memref<8x64xf32, #tpu.memory_space<vmem>>, vector<8x64xf32>
      tpu.vector_store %arg13[%c0_122, %c0_123], %380 {strides = array<i32>} : memref<8x64xf32, #tpu.memory_space<vmem>>, vector<8x64xf32>,
    } else {
    }
    return
  }
  func.func @transform_0(%arg0: i32, %arg1: i32) -> (i32, i32) {
    %c0_i32 = arith.constant 0 : i32
    %c0_i32_0 = arith.constant 0 : i32
    return %arg0, %c0_i32 : i32, i32
  }
  func.func @transform_1(%arg0: i32, %arg1: i32) -> (i32, i32, i32) {
    %c0_i32 = arith.constant 0 : i32
    %c0_i32_0 = arith.constant 0 : i32
    return %arg1, %arg0, %c0_i32 : i32, i32, i32
  }
  func.func @transform_2(%arg0: i32, %arg1: i32) -> (i32, i32, i32) {
    %c1_i32 = arith.constant 1 : i32
    %0 = arith.subi %c1_i32, %arg1 : i32
    %c0_i32 = arith.constant 0 : i32
    %c0_i32_0 = arith.constant 0 : i32
    return %0, %arg0, %c0_i32 : i32, i32, i32
  }
  func.func @transform_3(%arg0: i32, %arg1: i32) -> (i32, i32, i32) {
    %c0_i32 = arith.constant 0 : i32
    %c0_i32_0 = arith.constant 0 : i32
    return %arg1, %arg0, %c0_i32 : i32, i32, i32
  }
  func.func @transform_4(%arg0: i32, %arg1: i32) -> (i32, i32, i32) {
    %c1_i32 = arith.constant 1 : i32
    %0 = arith.subi %c1_i32, %arg1 : i32
    %c0_i32 = arith.constant 0 : i32
    %c0_i32_0 = arith.constant 0 : i32
    return %0, %arg0, %c0_i32 : i32, i32, i32
  }
  func.func @transform_5(%arg0: i32, %arg1: i32) -> (i32, i32) {
    %c0_i32 = arith.constant 0 : i32
    %c0_i32_0 = arith.constant 0 : i32
    %c0_i32_1 = arith.constant 0 : i32
    return %c0_i32, %c0_i32_0 : i32, i32
  }
  func.func @transform_6(%arg0: i32, %arg1: i32) -> (i32, i32) {
    %c0_i32 = arith.constant 0 : i32
    %c0_i32_0 = arith.constant 0 : i32
    %c0_i32_1 = arith.constant 0 : i32
    return %c0_i32, %c0_i32_0 : i32, i32
  }
  func.func @transform_7(%arg0: i32, %arg1: i32) -> (i32, i32) {
    %c0_i32 = arith.constant 0 : i32
    %c0_i32_0 = arith.constant 0 : i32
    %c0_i32_1 = arith.constant 0 : i32
    return %c0_i32, %c0_i32_0 : i32, i32
  }
  func.func @transform_8(%arg0: i32, %arg1: i32) -> (i32, i32) {
    %c0_i32 = arith.constant 0 : i32
    %c0_i32_0 = arith.constant 0 : i32
    %c0_i32_1 = arith.constant 0 : i32
    return %c0_i32, %c0_i32_0 : i32, i32
  }
  func.func @transform_9(%arg0: i32, %arg1: i32) -> (i32, i32) {
    %c0_i32 = arith.constant 0 : i32
    %c0_i32_0 = arith.constant 0 : i32
    %c0_i32_1 = arith.constant 0 : i32
    return %c0_i32, %c0_i32_0 : i32, i32
  }
  func.func @transform_10(%arg0: i32, %arg1: i32) -> (i32, i32) {
    %c0_i32 = arith.constant 0 : i32
    %c0_i32_0 = arith.constant 0 : i32
    %c0_i32_1 = arith.constant 0 : i32
    return %c0_i32, %c0_i32_0 : i32, i32
  }
  func.func @transform_11(%arg0: i32, %arg1: i32) -> (i32, i32) {
    %c0_i32 = arith.constant 0 : i32
    %c0_i32_0 = arith.constant 0 : i32
    return %arg0, %c0_i32 : i32, i32
  }
}

</mosaic_0001>

<bundles_post_ra>
// kernel: tpu_custom_call.1
= control target key start
LH: loop header
LB: loop body
LE: loop exit
PB: predicated region body
PF: predicated region fallthrough
CT: control target
= control target key end

     0   :  { %16 = vsyncpa [#allocation11], 0  ;;  %s2073_s17 = smov 0   ;;  %s2075_s18 = smov 0   ;;  %s2516_s0 = inlined_call_operand.vmem [shape: f32[8,1], index: 0, kind: input, shape index: {}]   ;;  %s2517_s1 = inlined_call_operand.vmem [shape: f32[8,8,1], index: 1, kind: input, shape index: {}]   ;;  %s2518_s2 = inlined_call_operand.vmem [shape: f32[8,8,1], index: 2, kind: input, shape index: {}]   ;;  %s2519_s3 = inlined_call_operand.vmem [shape: bf16[8,8,32], index: 3, kind: input, shape index: {}]   ;;  %s2520_s4 = inlined_call_operand.vmem [shape: bf16[8,8,32], index: 4, kind: input, shape index: {}]   ;;  %s2521_s5 = inlined_call_operand.vmem [shape: bf16[32,128], index: 5, kind: input, shape index: {}]   ;;  %s2522_s6 = inlined_call_operand.vmem [shape: bf16[32,128], index: 6, kind: input, shape index: {}]   ;;  %s2523_s7 = inlined_call_operand.vmem [shape: f32[1,128], index: 7, kind: input, shape index: {}]   ;;  %s2524_s8 = inlined_call_operand.vmem [shape: f32[1,128], index: 8, kind: input, shape index: {}]   ;;  %s2525_s9 = inlined_call_operand.vmem [shape: bf16[32,128], index: 9, kind: input, shape index: {}]   ;;  %s2526_s10 = inlined_call_operand.vmem [shape: bf16[32,128], index: 10, kind: input, shape index: {}]   ;;  %s2527_s11 = inlined_call_operand.hbm [shape: f32[8,64], index: 11, kind: output, shape index: {}]  }
   0x1   :  { %s2077_s19 = smov 0  }
   0x2 LB: > { %2529 = sst [smem:[#allocation13_spill]] %s1996_s18  ;;  %s31_s21 = sadd.s32 1, %s1996_s18  ;;  %s2000_s19 = sphi %s2077_s19, %s22_s19   ;;  %s1996_s18 = sphi %s2075_s18, %s2534_s18   ;;  %s1992_s17 = sphi %s2073_s17, %s2533_s17  }
   0x3   : > { %p32_p0 = scmp.ge.s32.totalorder %s31_s21, 2  ;;  %p1663_p1 = scmp.ge.s32.totalorder %s2000_s19, 1 }
   0x4   : > { %p421_p2 = scmp.lt.s32.totalorder %s2000_s19, 3 }
   0x5   : > { %s2536_s21 = smov (%p32_p0, %s31_s21), 0 }
   0x6   : > { %2530 = sst [smem:[#allocation14_spill]] %s2536_s21  ;;  %p422_p3 = pnand %p1663_p1, %p421_p2 }
   0x7   : > { %s1664_s22 = sshll.u32 (!%p422_p3), %s1992_s17, 2  ;;  %s502_s23 = ssub.s32 (!%p422_p3), 1, %s1992_s17 }
   0x8   : > { %425 = sbr.rel (%p422_p3) target bundleno = 3077 (0xc05), region = 64  ;;  %p494_p4 = scmp.lt.s32.totalorder (!%p422_p3), %s1664_s22, 7 }
   0x9   : > { %s1666_s24 = sshll.u32 (!%p422_p3), %s502_s23, 2  ;;  %p1672_p6 = scmp.ne.s32.totalorder (!%p422_p3), %s1992_s17, 0 }
   0xa   : > { %p504_p5 = scmp.lt.s32.totalorder (!%p422_p3), %s1666_s24, 7 }
   0xd   : > { %s2538_s22 = smov (!%p494_p4, %s1664_s22), 7  ;;  %s2540_s24 = smov (!%p504_p5, %s1666_s24), 7 }
   0xe   : > { %s1665_s25 = sshll.u32 %s2538_s22, 3  ;;  %s1669_s26 = sshll.u32 %s2538_s22, 2 }
   0xf   : > { %s2099_s29 = scalar_lea.vmem %s2517_s1, %s1665_s25  ;;  %s1667_s30 = sshll.u32 %s2540_s24, 3 }
  0x10   : > { %s2104_s14 = scalar_lea.vmem %s2518_s2, %s1667_s30  ;;  %s2109_s23 = scalar_lea.vmem %s2519_s3, %s1669_s26 }
  0x11   : > { %s1671_s20 = sshll.u32 %s2540_s24, 2  ;;  %537 = sbr.rel (%p1672_p6) target bundleno = 152 (0x98), region = 68 }
  0x12   : > { %s2114_s22 = scalar_lea.vmem %s2520_s4, %s1671_s20 }
  0x16   : > { %v543_v0 = vld [vmem:[%s2516_s0] sm:$0xff]  ;;  %vm538_vm0 = vcmask 261120   ;;  %v2002_v1 = vmov 0   ;;  %v2003_v2 = vmov 0.0   ;;  %v2004_v5 = vmov -inf  }
  0x17   : > { %1871 = vset.pattern.permute.xlu0 %v2002_v1  ;;  %vm544_vm1 = vcmp.ne.f32.partialorder %v543_v0, 0.0  ;;  %539 = vst.msk [vmem:[#allocation4] sm:$0xff] %vm538_vm0, %v2003_v2  ;;  %540 = vst.msk [vmem:[#allocation5] sm:$0xff] %vm538_vm0, %v2003_v2 }
  0x18   : > { %541 = vst.msk [vmem:[#allocation6] sm:$0xff] %vm538_vm0, %v2003_v2  ;;  %542 = vst.msk [vmem:[#allocation7] sm:$0xff] %vm538_vm0, %v2003_v2  ;;  %v545_v3 = vsel %vm544_vm1, 1, %v2002_v1 }
  0x19   : > { %547 = vperm.xlu0 %1871, %v545_v3  }
  0x94   : > { %v548_v4 = vpop.permute.xlu0 %547 }
  0x95   : > { %vm549_vm2 = vcmp.eq.s32.totalorder %v548_v4, 1 }
  0x96   : > { %v550_v6 = vsel %vm549_vm2, 0.0, %v2004_v5 }
  0x97   : > { %551 = vst.msk [vmem:[#allocation8] sm:$0xff] %vm538_vm0, %v550_v6  ;;  %552 = vst.msk [vmem:[#allocation9] sm:$0xff] %vm538_vm0, %v550_v6 }
  0x98 PF: > { %v1874_v7 = vld [vmem:[%s2521_s5 + $0x8] sm:$0xff]   ;;  %v1876_v9 = vld [vmem:[%s2521_s5] sm:$0xff]   ;;  %vm590_vm3 = vcmask 261120   ;;  %v2005_v15 = vmov 0.0   ;;  %v2173_v21 = vld [vmem:[#allocation6] sm:$0xff]  ;;  %vm2006_vm4 = vmmov 0  }
  0x99   : > { %v1875_v8 = vld [vmem:[%s2522_s6 + $0x8] sm:$0xff]   ;;  %1750 = vmatprep.subr.bf16.mxu0 %v1874_v7  ;;  %v1877_v10 = vld [vmem:[%s2522_s6] sm:$0xff]   ;;  %s2007_s20 = smov 32   ;;  %v869_v24 = vpack.c.bf16 %v2173_v21, %v2173_v21  ;;  %v757_v25 = vld [vmem:[#allocation7] sm:$0xff]  ;;  %v2008_v54 = vmov 0   ;;  %s2009_s30 = smov 64  }
  0x9a   : > { %1758 = vmatprep.subr.bf16.mxu1 %v1875_v8  ;;  %1751 = vmatpush3.bf16.msra.mxu0 %v1874_v7  ;;  %v1878_v11 = vld [vmem:[%s2109_s23] sm:$0xff]   ;;  %v1880_v13 = vld [vmem:[%s2109_s23 + $0x8] sm:$0xff]   ;;  %v1687_v3 = vld [vmem:[%s2104_s14 + $0x18] sm:$0xff]  ;;  %s2010_s12 = smov 96   ;;  %p1713_p7 = scmp.ne.s32.totalorder %s1992_s17, 1 }
  0x9b   : > { %1759 = vmatpush3.bf16.msra.mxu1 %v1875_v8  ;;  %1752 = vmatprep.subr.bf16.mxu0 %v1876_v9  ;;  %v1879_v12 = vld [vmem:[%s2114_s22] sm:$0xff]   ;;  %v1881_v14 = vld [vmem:[%s2114_s22 + $0x8] sm:$0xff]   ;;  %vm764_vm6 = vcmp.ne.f32.partialorder %v1687_v3, 0.0 }
  0x9c   : > { %1760 = vmatprep.subr.bf16.mxu1 %v1877_v10  ;;  %1754 = vmatprep.mubr.msk.bf16.mxu0 %vm590_vm3, %v1878_v11  ;;  %v2148_v16 = vld [vmem:[%s2525_s9 + $0x8] sm:$0xff]   ;;  %v2160_v18 = vld [vmem:[%s2525_s9] sm:$0xff]   ;;  %v954_v8 = vsel %vm764_vm6, 1, %v2008_v54 }
  0x9d   : > { %1762 = vmatprep.mubr.msk.bf16.mxu1 %vm590_vm3, %v1879_v12  ;;  %v2154_v17 = vld [vmem:[%s2526_s10 + $0x8] sm:$0xff]   ;;  %v2167_v19 = vld [vmem:[%s2526_s10] sm:$0xff]   ;;  %1872 = vset.pattern.permute.xlu0 %v2008_v54 }
  0x9e   : > { %1753 = vmatpush3.bf16.msra.mxu0 %v1876_v9  ;;  %v2171_v20 = vld [vmem:[#allocation4] sm:$0xff]  ;;  %v755_v22 = vld [vmem:[#allocation5] sm:$0xff]  ;;  %1873 = vset.pattern.permute.xlu1 %v2008_v54 }
  0x9f   : > { %1761 = vmatpush3.bf16.msra.mxu1 %v1877_v10  ;;  %1766 = vmatprep.subr.bf16.mxu0 %v2005_v15  ;;  %v766_v23 = vpack.c.bf16 %v2171_v20, %v2171_v20  ;;  %v1673_v26 = vld [vmem:[%s2523_s7] ss:$0 sm:$0xff] }
  0xa0   : > { %1774 = vmatprep.subr.bf16.mxu1 %v2005_v15  ;;  %831 = vrot.lane.b32.xlu1 %v755_v22, %s2007_s20  ;;  %v1680_v27 = vld [vmem:[%s2524_s8] ss:$0 sm:$0xff] }
  0xa1   : > { %1755 = vmatmul.mubr.msk.bf16.vlgmr.msra.gmra.mxu0 %vm590_vm3, %v1880_v13  ;;  %v760_v63 = vld [vmem:[%s2099_s29] sm:$0xff] }
  0xa2   : > { %1763 = vmatmul.mubr.msk.bf16.vlgmr.msra.gmra.mxu1 %vm590_vm3, %v1881_v14  ;;  %1767 = vmatpush3.bf16.msra.mxu0 %v2148_v16  ;;  %vm761_vm5 = vcmp.ne.f32.partialorder %v760_v63, 0.0 }
  0xa3   : > { %1775 = vmatpush3.bf16.msra.mxu1 %v2154_v17  ;;  %1768 = vmatprep.subr.bf16.mxu0 %v2005_v15  ;;  %v851_v6 = vsel %vm761_vm5, 1, %v2008_v54 }
  0xa4   : > { %1776 = vmatprep.subr.bf16.mxu1 %v2005_v15  ;;  %1770 = vmatprep.mubr.msk.bf16.mxu0 %vm2006_vm4, %v2005_v15 }
  0xa5   : > { %1778 = vmatprep.mubr.msk.bf16.mxu1 %vm2006_vm4, %v2005_v15  ;;  %934 = vrot.lane.b32.xlu1 %v757_v25, %s2007_s20 }
  0xa6   : > { %1769 = vmatpush3.bf16.msra.mxu0 %v2160_v18 }
  0xa7   : > { %1777 = vmatpush3.bf16.msra.mxu1 %v2167_v19  ;;  %1782 = vmatprep.subr.bf16.mxu0 %v2005_v15 }
  0xa8   : > { %1790 = vmatprep.subr.bf16.mxu1 %v2005_v15 }
  0xa9   : > { %1771 = vmatmul.mubr.msk.bf16.vlgmr.msra.gmra.mxu0 %vm590_vm3, %v766_v23 }
  0xaa   : > { %1779 = vmatmul.mubr.msk.bf16.vlgmr.msra.gmra.mxu1 %vm590_vm3, %v869_v24  ;;  %1783 = vmatpush3.bf16.msra.mxu0 %v2148_v16 }
  0xab   : > { %1784 = vmatprep.subr.bf16.mxu0 %v2005_v15  ;;  %1791 = vmatpush3.bf16.msra.mxu1 %v2154_v17 }
  0xac   : > { %1786 = vmatprep.mubr.msk.bf16.mxu0 %vm2006_vm4, %v2005_v15  ;;  %1792 = vmatprep.subr.bf16.mxu1 %v2005_v15 }
  0xad   : > { %1794 = vmatprep.mubr.msk.bf16.mxu1 %vm2006_vm4, %v2005_v15 }
  0xae   : > { %1785 = vmatpush3.bf16.msra.mxu0 %v2160_v18 }
  0xaf   : > { %1793 = vmatpush3.bf16.msra.mxu1 %v2167_v19  ;;  %1798 = vmatprep.subr.bf16.mxu0 %v2005_v15 }
  0xb0   : > { %1806 = vmatprep.subr.bf16.mxu1 %v2005_v15 }
 0x112   : > { %v2232_v9 = vpop.permute.xlu1 %831 }
 0x117   : > { %v2235_v11 = vpop.permute.xlu1 %934 }
 0x161   : > { %v1756_v28 = vpop.f32.mrf.mxu0 }
 0x162   : > { %v2210_v29 = vadd.f32 %v1756_v28, %v1673_v26  ;;  %v1764_v30 = vpop.f32.mrf.mxu1 }
 0x163   : > { %v2212_v31 = vadd.f32 %v1764_v30, %v1680_v27  ;;  %v631_v32 = vpop.f32.mrf.mxu0 }
 0x164   : > { %v727_v33 = vpop.f32.mrf.mxu1  ;;  %v632_v39 = vadd.f32 %v1673_v26, %v631_v32 }
 0x165   : > { %v2214_v34 = vadd.f32 %v1680_v27, %v727_v33  ;;  %v1757_v35 = vpop.f32.mrf.mxu0 }
 0x166   : > { %v2216_v36 = vadd.f32 %v1757_v35, %v1673_v26  ;;  %v1765_v37 = vpop.f32.mrf.mxu1 }
 0x167   : > { %v634_v38 = vpop.f32.mrf.mxu0  ;;  %v739_v44 = vadd.f32 %v1765_v37, %v1680_v27 }
 0x168   : > { %v2218_v40 = vadd.f32 %v1673_v26, %v634_v38  ;;  %v730_v41 = vpop.f32.mrf.mxu1 }
 0x169   : > { %v2220_v42 = vadd.f32 %v1680_v27, %v730_v41  ;;  %v816_v43 = vpop.f32.mrf.mxu0 }
 0x16a   : > { %v822_v45 = vadd.f32 %v816_v43, %v632_v39  ;;  %v919_v46 = vpop.f32.mrf.mxu1 }
 0x16b   : > { %v1772_v47 = vpop.f32.mrf.mxu0  ;;  %v925_v48 = vadd.f32 %v919_v46, %v739_v44 }
 0x16c   : > { %1886 = vtanh.f32 %v822_v45  ;;  %v1780_v49 = vpop.f32.mrf.mxu1  ;;  %v1691_v57 = vmul.f32 -1.442695, %v822_v45 }
 0x16d   : > { %v819_v50 = vpop.f32.mrf.mxu0  ;;  %1888 = vtanh.f32 %v925_v48  ;;  %v1695_v58 = vmul.f32 -1.442695, %v925_v48 }
 0x16e   : > { %v922_v51 = vpop.f32.mrf.mxu1  ;;  %1890 = vpow2.f32 %v1691_v57 }
 0x16f   : > { %v1773_v52 = vpop.f32.mrf.mxu0  ;;  %1892 = vpow2.f32 %v1695_v58 }
 0x170   : > { %v1781_v53 = vpop.f32.mrf.mxu1 }
 0x179   : > { %v1887_v55 = vpop.eup %1886 }
 0x17a   : > { %836 = vrot.lane.b32.xlu0 %v1887_v55, %s2009_s30  ;;  %v1889_v56 = vpop.eup %1888 }
 0x17b   : > { %v1891_v59 = vpop.eup %1890 }
 0x17c   : > { %v826_v60 = vadd.f32 1.0, %v1891_v59  ;;  %v1893_v61 = vpop.eup %1892 }
 0x17d   : > { %v929_v62 = vadd.f32 1.0, %v1893_v61  ;;  %v1696_v61 = vld [vmem:[%s2099_s29 + $0x8] sm:$0xff] }
 0x17e   : > { %939 = vrot.lane.b32.xlu0 %v1889_v56, %s2009_s30  ;;  %1894 = vrcp.f32 %v826_v60  ;;  %vm973_vm9 = vcmp.ne.f32.partialorder %v1696_v61, 0.0 }
 0x17f   : > { %1896 = vrcp.f32 %v929_v62 }
 0x18b   : > { %v1895_v0 = vpop.eup %1894 }
 0x18c   : > { %v1897_v4 = vpop.eup %1896  ;;  %v834_v10 = vmul.f32 %v1895_v0, %v2232_v9 }
 0x18d   : > { %v937_v14 = vmul.f32 %v1897_v4, %v2235_v11 }
 0x1ec   : > { %v837_v1 = vpop.permute.xlu0 %836 }
 0x1ed   : > { %v839_v2 = vmul.f32 %v1895_v0, %v837_v1  ;;  %v1697_v1 = vld [vmem:[%s2104_s14 + $0x10] sm:$0xff] }
 0x1ee   : > { %vm976_vm10 = vcmp.ne.f32.partialorder %v1697_v1, 0.0 }
 0x1ef   : > { %841 = vrot.lane.b32.xlu0 %v839_v2, %s2007_s20 }
 0x1f0   : > { %v940_v5 = vpop.permute.xlu0 %939 }
 0x1f1   : > { %v942_v7 = vmul.f32 %v1897_v4, %v940_v5 }
 0x1f3   : > { %944 = vrot.lane.b32.xlu1 %v942_v7, %s2007_s20  ;;  %853 = vperm.xlu0 %1872, %v851_v6   ;;  %v1136_v6 = vsel %vm976_vm10, 1, %v2008_v54 }
 0x1f7   : > { %956 = vperm.xlu1 %1873, %v954_v8  }
 0x261   : > { %v842_v12 = vpop.permute.xlu0 %841 }
 0x262   : > { %v2237_v13 = vadd.f32 %v842_v12, %v834_v10 }
 0x264   : > { %1898 = vtanh.f32 %v2237_v13 }
 0x265   : > { %v945_v22 = vpop.permute.xlu1 %944 }
 0x266   : > { %v2241_v23 = vadd.f32 %v945_v22, %v937_v14 }
 0x268   : > { %1900 = vtanh.f32 %v2241_v23 }
 0x26e   : > { %v2252_v27 = vpop.permute.xlu0 %853 }
 0x26f   : > { %vm855_vm7 = vcmp.eq.s32.totalorder %v2252_v27, 1 }
 0x270   : > { %v2304_v7 = vsel %vm855_vm7, %v2237_v13, %v2232_v9 }
 0x271   : > { %v1899_v24 = vpop.eup %1898 }
 0x272   : > { %847 = vrot.lane.b32.xlu1 %v1899_v24, %s2009_s30  ;;  %v2250_v26 = vpop.permute.xlu1 %956 }
 0x273   : > { %vm958_vm8 = vcmp.eq.s32.totalorder %v2250_v26, 1 }
 0x274   : > { %v2313_v14 = vsel %vm958_vm8, %v2241_v23, %v2235_v11 }
 0x275   : > { %v1901_v25 = vpop.eup %1900 }
 0x276   : > { %950 = vrot.lane.b32.xlu0 %v1901_v25, %s2009_s30  ;;  %858 = vrot.lane.b32.xlu1 %v2171_v20, %s2010_s12 }
 0x27a   : > { %961 = vrot.lane.b32.xlu0 %v2173_v21, %s2010_s12 }
 0x2e4   : > { %v848_v28 = vpop.permute.xlu1 %847 }
 0x2e5   : > { %v2254_v30 = vmul.f32 %v1895_v0, %v848_v28 }
 0x2e8   : > { %v951_v32 = vpop.permute.xlu0 %950  ;;  %v859_v33 = vpop.permute.xlu1 %858 }
 0x2e9   : > { %v2260_v35 = vsel %vm855_vm7, %v2254_v30, %v859_v33  ;;  %v2264_v21 = vmul.f32 %v1897_v4, %v951_v32  ;;  %v1050_v4 = vsel %vm973_vm9, 1, %v2008_v54 }
 0x2ea   : > { %v978_v20 = vpack.c.bf16 %v2260_v35, %v2260_v35 }
 0x2ec   : > { %v962_v37 = vpop.permute.xlu0 %961  ;;  %980 = vrot.lane.b32.xlu1 %v978_v20, %s2007_s20 }
 0x2ed   : > { %v2271_v38 = vsel %vm958_vm8, %v2264_v21, %v962_v37 }
 0x2ee   : > { %v1064_v39 = vpack.c.bf16 %v2271_v38, %v2271_v38 }
 0x2f0   : > { %1066 = vrot.lane.b32.xlu0 %v1064_v39, %s2007_s20 }
 0x35e   : > { %v981_v41 = vpop.permute.xlu1 %980 }
 0x35f   : > { %1787 = vmatmul.mubr.msk.bf16.vlgmr.msra.gmra.mxu0 %vm590_vm3, %v981_v41 }
 0x360   : > { %1799 = vmatpush3.bf16.msra.mxu0 %v2148_v16  ;;  %1802 = vmatprep.mubr.msk.bf16.mxu0 %vm2006_vm4, %v2005_v15 }
 0x361   : > { %1800 = vmatprep.subr.bf16.mxu0 %v2005_v15 }
 0x362   : > { %v1067_v43 = vpop.permute.xlu0 %1066 }
 0x363   : > { %1795 = vmatmul.mubr.msk.bf16.vlgmr.msra.gmra.mxu1 %vm590_vm3, %v1067_v43 }
 0x364   : > { %1801 = vmatpush3.bf16.msra.mxu0 %v2160_v18  ;;  %1807 = vmatpush3.bf16.msra.mxu1 %v2154_v17 }
 0x365   : > { %1808 = vmatprep.subr.bf16.mxu1 %v2005_v15  ;;  %1810 = vmatprep.mubr.msk.bf16.mxu1 %vm2006_vm4, %v2005_v15 }
 0x366   : > { %1814 = vmatprep.subr.bf16.mxu0 %v2005_v15 }
 0x368   : > { %1809 = vmatpush3.bf16.msra.mxu1 %v2167_v19 }
 0x369   : > { %1822 = vmatprep.subr.bf16.mxu1 %v2005_v15 }
 0x41f   : > { %v1019_v44 = vpop.f32.mrf.mxu0 }
 0x420   : > { %v1025_v45 = vadd.f32 %v1019_v44, %v2218_v40 }
 0x421   : > { %v1788_v46 = vpop.f32.mrf.mxu0 }
 0x422   : > { %1902 = vtanh.f32 %v1025_v45  ;;  %v1699_v40 = vmul.f32 -1.442695, %v1025_v45 }
 0x423   : > { %v1022_v47 = vpop.f32.mrf.mxu0  ;;  %v1105_v48 = vpop.f32.mrf.mxu1 }
 0x424   : > { %v1111_v49 = vadd.f32 %v1105_v48, %v2212_v31 }
 0x425   : > { %v1789_v50 = vpop.f32.mrf.mxu0  ;;  %v1796_v51 = vpop.f32.mrf.mxu1 }
 0x426   : > { %1904 = vtanh.f32 %v1111_v49  ;;  %v1701_v57 = vmul.f32 -1.442695, %v1111_v49 }
 0x427   : > { %v1108_v52 = vpop.f32.mrf.mxu1  ;;  %1906 = vpow2.f32 %v1699_v40 }
 0x428   : > { %1908 = vpow2.f32 %v1701_v57 }
 0x429   : > { %v1797_v53 = vpop.f32.mrf.mxu1 }
 0x42f   : > { %v1903_v55 = vpop.eup %1902 }
 0x430   : > { %1035 = vrot.lane.b32.xlu1 %v1903_v55, %s2009_s30 }
 0x433   : > { %v1905_v56 = vpop.eup %1904 }
 0x434   : > { %1121 = vrot.lane.b32.xlu0 %v1905_v56, %s2009_s30  ;;  %v1907_v58 = vpop.eup %1906  ;;  %v1702_v56 = vld [vmem:[%s2099_s29 + $0x10] sm:$0xff] }
 0x435   : > { %v1029_v59 = vadd.f32 1.0, %v1907_v58  ;;  %v1909_v31 = vpop.eup %1908  ;;  %vm1151_vm13 = vcmp.ne.f32.partialorder %v1702_v56, 0.0 }
 0x436   : > { %v1115_v60 = vadd.f32 1.0, %v1909_v31  ;;  %v1228_v61 = vsel %vm1151_vm13, 1, %v2008_v54 }
 0x437   : > { %1910 = vrcp.f32 %v1029_v59  ;;  %v1703_v59 = vld [vmem:[%s2104_s14 + $0x8] sm:$0xff] }
 0x438   : > { %1912 = vrcp.f32 %v1115_v60  ;;  %vm1154_vm14 = vcmp.ne.f32.partialorder %v1703_v59, 0.0 }
 0x444   : > { %v1911_v62 = vpop.eup %1910 }
 0x445   : > { %v1913_v2 = vpop.eup %1912  ;;  %v1033_v8 = vmul.f32 %v1911_v62, %v2304_v7 }
 0x446   : > { %v1119_v22 = vmul.f32 %v1913_v2, %v2313_v14 }
 0x4a2   : > { %v1036_v63 = vpop.permute.xlu1 %1035 }
 0x4a3   : > { %v1038_v0 = vmul.f32 %v1911_v62, %v1036_v63  ;;  %v1314_v63 = vsel %vm1154_vm14, 1, %v2008_v54 }
 0x4a5   : > { %1040 = vrot.lane.b32.xlu1 %v1038_v0, %s2007_s20 }
 0x4a6   : > { %v1122_v3 = vpop.permute.xlu0 %1121 }
 0x4a7   : > { %v1124_v5 = vmul.f32 %v1913_v2, %v1122_v3 }
 0x4a9   : > { %1126 = vrot.lane.b32.xlu0 %v1124_v5, %s2007_s20  ;;  %1052 = vperm.xlu1 %1873, %v1050_v4  }
 0x4ad   : > { %1138 = vperm.xlu0 %1872, %v1136_v6  }
 0x517   : > { %v1041_v10 = vpop.permute.xlu1 %1040 }
 0x518   : > { %v2307_v12 = vadd.f32 %v1041_v10, %v1033_v8 }
 0x51a   : > { %1914 = vtanh.f32 %v2307_v12 }
 0x51b   : > { %v1127_v24 = vpop.permute.xlu0 %1126 }
 0x51c   : > { %v2317_v25 = vadd.f32 %v1127_v24, %v1119_v22 }
 0x51e   : > { %1916 = vtanh.f32 %v2317_v25 }
 0x524   : > { %v2322_v28 = vpop.permute.xlu1 %1052 }
 0x525   : > { %vm1054_vm11 = vcmp.eq.s32.totalorder %v2322_v28, 1 }
 0x526   : > { %v2376_v0 = vsel %vm1054_vm11, %v2307_v12, %v2304_v7 }
 0x527   : > { %v1915_v9 = vpop.eup %1914 }
 0x528   : > { %1046 = vrot.lane.b32.xlu1 %v1915_v9, %s2009_s30  ;;  %v2324_v32 = vpop.permute.xlu0 %1138 }
 0x529   : > { %vm1140_vm12 = vcmp.eq.s32.totalorder %v2324_v32, 1 }
 0x52a   : > { %v2385_v4 = vsel %vm1140_vm12, %v2317_v25, %v2313_v14 }
 0x52b   : > { %v1917_v13 = vpop.eup %1916 }
 0x52c   : > { %1132 = vrot.lane.b32.xlu0 %v1917_v13, %s2009_s30 }
 0x59a   : > { %v1047_v11 = vpop.permute.xlu1 %1046 }
 0x59b   : > { %v2326_v23 = vmul.f32 %v1911_v62, %v1047_v11 }
 0x59d   : > { %v2333_v33 = vsel %vm1054_vm11, %v2326_v23, %v2260_v35 }
 0x59e   : > { %v1133_v20 = vpop.permute.xlu0 %1132  ;;  %v1156_v37 = vpack.c.bf16 %v2333_v33, %v2333_v33 }
 0x59f   : > { %v2337_v39 = vmul.f32 %v1913_v2, %v1133_v20 }
 0x5a0   : > { %1158 = vrot.lane.b32.xlu1 %v1156_v37, %s2007_s20 }
 0x5a1   : > { %v2345_v41 = vsel %vm1140_vm12, %v2337_v39, %v2271_v38 }
 0x5a2   : > { %v1242_v35 = vpack.c.bf16 %v2345_v41, %v2345_v41 }
 0x5a4   : > { %1244 = vrot.lane.b32.xlu0 %v1242_v35, %s2007_s20 }
 0x612   : > { %v1159_v43 = vpop.permute.xlu1 %1158 }
 0x613   : > { %1803 = vmatmul.mubr.msk.bf16.vlgmr.msra.gmra.mxu0 %vm590_vm3, %v1159_v43 }
 0x614   : > { %1815 = vmatpush3.bf16.msra.mxu0 %v2148_v16  ;;  %1818 = vmatprep.mubr.msk.bf16.mxu0 %vm2006_vm4, %v2005_v15 }
 0x615   : > { %1816 = vmatprep.subr.bf16.mxu0 %v2005_v15 }
 0x616   : > { %v1245_v44 = vpop.permute.xlu0 %1244 }
 0x617   : > { %1811 = vmatmul.mubr.msk.bf16.vlgmr.msra.gmra.mxu1 %vm590_vm3, %v1245_v44 }
 0x618   : > { %1817 = vmatpush3.bf16.msra.mxu0 %v2160_v18  ;;  %1823 = vmatpush3.bf16.msra.mxu1 %v2154_v17 }
 0x619   : > { %1824 = vmatprep.subr.bf16.mxu1 %v2005_v15  ;;  %1826 = vmatprep.mubr.msk.bf16.mxu1 %vm2006_vm4, %v2005_v15 }
 0x61c   : > { %1825 = vmatpush3.bf16.msra.mxu1 %v2167_v19 }
 0x6d3   : > { %v1197_v16 = vpop.f32.mrf.mxu0 }
 0x6d4   : > { %v1203_v38 = vadd.f32 %v1197_v16, %v2210_v29 }
 0x6d5   : > { %v1804_v45 = vpop.f32.mrf.mxu0 }
 0x6d6   : > { %1918 = vtanh.f32 %v1203_v38  ;;  %v1705_v19 = vmul.f32 -1.442695, %v1203_v38 }
 0x6d7   : > { %v1200_v46 = vpop.f32.mrf.mxu0  ;;  %v1283_v47 = vpop.f32.mrf.mxu1 }
 0x6d8   : > { %v1289_v48 = vadd.f32 %v1283_v47, %v2220_v42 }
 0x6d9   : > { %v1805_v49 = vpop.f32.mrf.mxu0  ;;  %v1812_v18 = vpop.f32.mrf.mxu1 }
 0x6da   : > { %1920 = vtanh.f32 %v1289_v48  ;;  %v1707_v29 = vmul.f32 -1.442695, %v1289_v48 }
 0x6db   : > { %v1286_v17 = vpop.f32.mrf.mxu1  ;;  %1922 = vpow2.f32 %v1705_v19 }
 0x6dc   : > { %1924 = vpow2.f32 %v1707_v29  ;;  %v1708_v29 = vld [vmem:[%s2099_s29 + $0x18] sm:$0xff]  ;;  %s2011_s29 = smov (!%p1713_p7), 32  }
 0x6dd   : > { %v1813_v50 = vpop.f32.mrf.mxu1  ;;  %vm1329_vm1 = vcmp.ne.f32.partialorder %v1708_v29, 0.0 }
 0x6e3   : > { %v1919_v51 = vpop.eup %1918 }
 0x6e4   : > { %1213 = vrot.lane.b32.xlu1 %v1919_v51, %s2009_s30 }
 0x6e7   : > { %v1921_v15 = vpop.eup %1920 }
 0x6e8   : > { %1299 = vrot.lane.b32.xlu0 %v1921_v15, %s2009_s30  ;;  %v1923_v52 = vpop.eup %1922 }
 0x6e9   : > { %v1207_v53 = vadd.f32 1.0, %v1923_v52  ;;  %v1925_v42 = vpop.eup %1924 }
 0x6ea   : > { %v1293_v55 = vadd.f32 1.0, %v1925_v42 }
 0x6eb   : > { %1926 = vrcp.f32 %v1207_v53 }
 0x6ec   : > { %1928 = vrcp.f32 %v1293_v55  ;;  %v1330_v55 = vld [vmem:[%s2104_s14] sm:$0xff] }
 0x6ed   : > { %vm1331_vm2 = vcmp.ne.f32.partialorder %v1330_v55, 0.0 }
 0x6ee   : > { %v1491_v59 = vsel %vm1331_vm2, 1, %v2008_v54 }
 0x6f8   : > { %v1927_v40 = vpop.eup %1926 }
 0x6f9   : > { %v1929_v31 = vpop.eup %1928  ;;  %v1211_v1 = vmul.f32 %v1927_v40, %v2376_v0 }
 0x6fa   : > { %v1297_v5 = vmul.f32 %v1929_v31, %v2385_v4 }
 0x756   : > { %v1214_v57 = vpop.permute.xlu1 %1213 }
 0x757   : > { %v1216_v58 = vmul.f32 %v1927_v40, %v1214_v57  ;;  %v1405_v57 = vsel %vm1329_vm1, 1, %v2008_v54 }
 0x759   : > { %1218 = vrot.lane.b32.xlu1 %v1216_v58, %s2007_s20 }
 0x75a   : > { %v1300_v60 = vpop.permute.xlu0 %1299 }
 0x75b   : > { %v1302_v62 = vmul.f32 %v1929_v31, %v1300_v60 }
 0x75d   : > { %1304 = vrot.lane.b32.xlu0 %v1302_v62, %s2007_s20  ;;  %1230 = vperm.xlu1 %1873, %v1228_v61  }
 0x761   : > { %1316 = vperm.xlu0 %1872, %v1314_v63  }
 0x7cb   : > { %v1219_v2 = vpop.permute.xlu1 %1218 }
 0x7cc   : > { %v2379_v3 = vadd.f32 %v1219_v2, %v1211_v1 }
 0x7ce   : > { %1930 = vtanh.f32 %v2379_v3 }
 0x7cf   : > { %v1305_v6 = vpop.permute.xlu0 %1304 }
 0x7d0   : > { %v2389_v8 = vadd.f32 %v1305_v6, %v1297_v5 }
 0x7d2   : > { %1932 = vtanh.f32 %v2389_v8 }
 0x7d8   : > { %v2394_v12 = vpop.permute.xlu1 %1230 }
 0x7d9   : > { %vm1232_vm15 = vcmp.eq.s32.totalorder %v2394_v12, 1 }
 0x7db   : > { %v1931_v7 = vpop.eup %1930 }
 0x7dc   : > { %1224 = vrot.lane.b32.xlu1 %v1931_v7, %s2009_s30  ;;  %v2396_v22 = vpop.permute.xlu0 %1316  ;;  %v759_v7 = vld [vmem:[#allocation9] sm:$0xff] }
 0x7dd   : > { %vm1318_vm0 = vcmp.eq.s32.totalorder %v2396_v22, 1 }
 0x7de   : > { %v1319_v63 = vsel %vm1318_vm0, %v2389_v8, %v2385_v4 }
 0x7df   : > { %v1933_v10 = vpop.eup %1932 }
 0x7e0   : > { %1310 = vrot.lane.b32.xlu0 %v1933_v10, %s2009_s30 }
 0x84e   : > { %v1225_v14 = vpop.permute.xlu1 %1224 }
 0x84f   : > { %v2398_v24 = vmul.f32 %v1927_v40, %v1225_v14 }
 0x851   : > { %v2405_v25 = vsel %vm1232_vm15, %v2398_v24, %v2333_v33 }
 0x852   : > { %v1311_v9 = vpop.permute.xlu0 %1310  ;;  %v1333_v13 = vpack.c.bf16 %v2405_v25, %v2405_v25 }
 0x853   : > { %v2409_v11 = vmul.f32 %v1929_v31, %v1311_v9  ;;  %v1233_v31 = vsel %vm1232_vm15, %v2379_v3, %v2376_v0 }
 0x854   : > { %1335 = vrot.lane.b32.xlu1 %v1333_v13, %s2007_s20 }
 0x855   : > { %v2417_v20 = vsel %vm1318_vm0, %v2409_v11, %v2345_v41 }
 0x856   : > { %v1419_v33 = vpack.c.bf16 %v2417_v20, %v2417_v20 }
 0x858   : > { %1421 = vrot.lane.b32.xlu0 %v1419_v33, %s2007_s20 }
 0x8c6   : > { %v1336_v37 = vpop.permute.xlu1 %1335 }
 0x8c7   : > { %1819 = vmatmul.mubr.msk.bf16.vlgmr.msra.gmra.mxu0 %vm590_vm3, %v1336_v37 }
 0x8ca   : > { %v1422_v35 = vpop.permute.xlu0 %1421 }
 0x8cb   : > { %1827 = vmatmul.mubr.msk.bf16.vlgmr.msra.gmra.mxu1 %vm590_vm3, %v1422_v35 }
 0x987   : > { %v1374_v43 = vpop.f32.mrf.mxu0 }
 0x988   : > { %v1380_v44 = vadd.f32 %v1374_v43, %v2216_v36 }
 0x989   : > { %v1820_v16 = vpop.f32.mrf.mxu0 }
 0x98a   : > { %1934 = vtanh.f32 %v1380_v44  ;;  %v1710_v36 = vmul.f32 -1.442695, %v1380_v44 }
 0x98b   : > { %v1377_v38 = vpop.f32.mrf.mxu0  ;;  %v1460_v45 = vpop.f32.mrf.mxu1 }
 0x98c   : > { %v1466_v41 = vadd.f32 %v1460_v45, %v2214_v34 }
 0x98d   : > { %v1821_v46 = vpop.f32.mrf.mxu0  ;;  %v1828_v47 = vpop.f32.mrf.mxu1 }
 0x98e   : > { %1936 = vtanh.f32 %v1466_v41  ;;  %v1712_v50 = vmul.f32 -1.442695, %v1466_v41 }
 0x98f   : > { %v1463_v48 = vpop.f32.mrf.mxu1  ;;  %1938 = vpow2.f32 %v1710_v36 }
 0x990   : > { %1940 = vpow2.f32 %v1712_v50 }
 0x991   : > { %v1829_v49 = vpop.f32.mrf.mxu1 }
 0x997   : > { %v1935_v18 = vpop.eup %1934 }
 0x998   : > { %1390 = vrot.lane.b32.xlu1 %v1935_v18, %s2009_s30 }
 0x99b   : > { %v1937_v17 = vpop.eup %1936 }
 0x99c   : > { %1476 = vrot.lane.b32.xlu0 %v1937_v17, %s2009_s30  ;;  %v1939_v51 = vpop.eup %1938 }
 0x99d   : > { %v1384_v15 = vadd.f32 1.0, %v1939_v51  ;;  %v1941_v34 = vpop.eup %1940 }
 0x99e   : > { %v1470_v19 = vadd.f32 1.0, %v1941_v34 }
 0x99f   : > { %1942 = vrcp.f32 %v1384_v15 }
 0x9a0   : > { %1944 = vrcp.f32 %v1470_v19 }
 0x9ac   : > { %v1943_v52 = vpop.eup %1942 }
 0x9ad   : > { %v1945_v56 = vpop.eup %1944  ;;  %v1388_v60 = vmul.f32 %v1943_v52, %v1233_v31 }
 0x9ae   : > { %v1474_v1 = vmul.f32 %v1945_v56, %v1319_v63 }
 0xa0a   : > { %v1391_v53 = vpop.permute.xlu1 %1390 }
 0xa0b   : > { %v1393_v42 = vmul.f32 %v1943_v52, %v1391_v53 }
 0xa0d   : > { %1395 = vrot.lane.b32.xlu1 %v1393_v42, %s2007_s20 }
 0xa0e   : > { %v1477_v40 = vpop.permute.xlu0 %1476 }
 0xa0f   : > { %v1479_v58 = vmul.f32 %v1945_v56, %v1477_v40 }
 0xa11   : > { %1481 = vrot.lane.b32.xlu0 %v1479_v58, %s2007_s20  ;;  %1407 = vperm.xlu1 %1873, %v1405_v57  }
 0xa15   : > { %1493 = vperm.xlu0 %1872, %v1491_v59  }
 0xa7f   : > { %v1396_v61 = vpop.permute.xlu1 %1395 }
 0xa80   : > { %v1398_v62 = vadd.f32 %v1396_v61, %v1388_v60 }
 0xa82   : > { %1946 = vtanh.f32 %v1398_v62 }
 0xa83   : > { %v1482_v2 = vpop.permute.xlu0 %1481 }
 0xa84   : > { %v1484_v5 = vadd.f32 %v1482_v2, %v1474_v1 }
 0xa86   : > { %1948 = vtanh.f32 %v1484_v5 }
 0xa8c   : > { %v1408_v0 = vpop.permute.xlu1 %1407 }
 0xa8d   : > { %vm1409_vm4 = vcmp.eq.s32.totalorder %v1408_v0, 1 }
 0xa8e   : > { %v1410_v3 = vsel %vm1409_vm4, %v1398_v62, %v1233_v31 }
 0xa8f   : > { %v1947_v54 = vpop.eup %1946 }
 0xa90   : > { %1401 = vrot.lane.b32.xlu1 %v1947_v54, %s2009_s30 }
 0xa93   : > { %v1949_v6 = vpop.eup %1948 }
 0xa94   : > { %1487 = vrot.lane.b32.xlu0 %v1949_v6, %s2009_s30  ;;  %863 = vrot.lane.b32.xlu1 %v2254_v30, %s2007_s20  ;;  %v1494_v30 = vpop.permute.xlu0 %1493 }
 0xa95   : > { %vm1495_vm5 = vcmp.eq.s32.totalorder %v1494_v30, 1 }
 0xa98   : > { %966 = vrot.lane.b32.xlu0 %v2264_v21, %s2007_s20  ;;  %1058 = vrot.lane.b32.xlu1 %v2326_v23, %s2007_s20 }
 0xa9c   : > { %1144 = vrot.lane.b32.xlu0 %v2337_v39, %s2007_s20  ;;  %1236 = vrot.lane.b32.xlu1 %v2398_v24, %s2007_s20  ;;  %v1496_v24 = vsel %vm1495_vm5, %v1484_v5, %v1319_v63 }
 0xaa0   : > { %1322 = vrot.lane.b32.xlu0 %v2409_v11, %s2007_s20 }
 0xaa4   : > { %1510 = vrot.lane.b32.xlu0 %v1410_v3, %s2010_s12 }
 0xb02   : > { %v1402_v21 = vpop.permute.xlu1 %1401 }
 0xb03   : > { %v1404_v4 = vmul.f32 %v1943_v52, %v1402_v21 }
 0xb05   : > { %1413 = vrot.lane.b32.xlu1 %v1404_v4, %s2007_s20  ;;  %v1411_v39 = vsel %vm1409_vm4, %v1404_v4, %v2405_v25 }
 0xb06   : > { %v1488_v23 = vpop.permute.xlu0 %1487  ;;  %v864_v16 = vpop.permute.xlu1 %863 }
 0xb07   : > { %v1490_v8 = vmul.f32 %v1945_v56, %v1488_v23 }
 0xb09   : > { %1499 = vrot.lane.b32.xlu0 %v1490_v8, %s2007_s20  ;;  %1505 = vrot.lane.b32.xlu1 %v1411_v39, %s2007_s20  ;;  %v1497_v9 = vsel %vm1495_vm5, %v1490_v8, %v2417_v20  ;;  %v758_v20 = vld [vmem:[#allocation8] sm:$0xff] }
 0xb0a   : > { %v967_v10 = vpop.permute.xlu0 %966  ;;  %v866_v38 = vmax.f32 %v758_v20, %v864_v16  ;;  %v1059_v45 = vpop.permute.xlu1 %1058 }
 0xb0b   : > { %v969_v14 = vmax.f32 %v759_v7, %v967_v10 }
 0xb0c   : > { %v867_v26 = vsel %vm855_vm7, %v866_v38, %v758_v20 }
 0xb0d   : > { %1520 = vrot.lane.b32.xlu0 %v1496_v24, %s2010_s12  ;;  %1515 = vrot.lane.b32.xlu1 %v1497_v9, %s2007_s20  ;;  %v970_v25 = vsel %vm958_vm8, %v969_v14, %v759_v7  ;;  %v1061_v41 = vmax.f32 %v867_v26, %v1059_v45 }
 0xb0e   : > { %v1145_v13 = vpop.permute.xlu0 %1144  ;;  %v1237_v46 = vpop.permute.xlu1 %1236 }
 0xb0f   : > { %v1147_v11 = vmax.f32 %v970_v25, %v1145_v13  ;;  %v1062_v32 = vsel %vm1054_vm11, %v1061_v41, %v867_v26 }
 0xb10   : > { %v1239_v47 = vmax.f32 %v1062_v32, %v1237_v46 }
 0xb11   : > { %v1148_v33 = vsel %vm1140_vm12, %v1147_v11, %v970_v25 }
 0xb12   : > { %v1323_v37 = vpop.permute.xlu0 %1322  ;;  %v1240_v22 = vsel %vm1232_vm15, %v1239_v47, %v1062_v32 }
 0xb13   : > { %v1325_v35 = vmax.f32 %v1148_v33, %v1323_v37 }
 0xb15   : > { %v1326_v43 = vsel %vm1318_vm0, %v1325_v35, %v1148_v33 }
 0xb16   : > { %v1511_v44 = vpop.permute.xlu0 %1510 }
 0xb17   : > { %1513 = vst.msk [vmem:[#allocation5] sm:$0xff] %vm590_vm3, %v1511_v44 }
 0xb77   : > { %v1414_v48 = vpop.permute.xlu1 %1413 }
 0xb78   : > { %v1416_v49 = vmax.f32 %v1240_v22, %v1414_v48 }
 0xb7a   : > { %v1417_v18 = vsel %vm1409_vm4, %v1416_v49, %v1240_v22 }
 0xb7b   : > { %1524 = vst.msk [vmem:[#allocation8] sm:$0xff] %vm590_vm3, %v1417_v18  ;;  %v1500_v17 = vpop.permute.xlu0 %1499  ;;  %v1506_v36 = vpop.permute.xlu1 %1505 }
 0xb7c   : > { %v1502_v27 = vmax.f32 %v1326_v43, %v1500_v17  ;;  %1508 = vst.msk [vmem:[#allocation4] sm:$0xff] %vm590_vm3, %v1506_v36  ;;  %1529 = sbr.rel (%p1713_p7) target bundleno = 3062 (0xbf6), region = 72 }
 0xb7e   : > { %v1503_v50 = vsel %vm1495_vm5, %v1502_v27, %v1326_v43 }
 0xb7f   : > { %1525 = vst.msk [vmem:[#allocation9] sm:$0xff] %vm590_vm3, %v1503_v50  ;;  %v1521_v28 = vpop.permute.xlu0 %1520  ;;  %v1516_v51 = vpop.permute.xlu1 %1515 }
 0xb80   : > { %1523 = vst.msk [vmem:[#allocation7] sm:$0xff] %vm590_vm3, %v1521_v28  ;;  %1518 = vst.msk [vmem:[#allocation6] sm:$0xff] %vm590_vm3, %v1516_v51 }
 0xb81   : > { %1531 = vrot.lane.b32.xlu0 %v1503_v50, %s2011_s29  ;;  %vm1535_vm6 = vcmask 523264  }
 0xbf3   : > { %v1532_v12 = vpop.permute.xlu0 %1531 }
 0xbf4   : > { %v1534_v15 = vsel %vm590_vm3, %v1417_v18, %v1532_v12 }
 0xbf5   : > { %1536 = vst.msk [vmem:[#allocation10] sm:$0xff] %vm1535_vm6, %v1534_v15 }
 0xbf6 PF: > { %s2531_s14 = sadd.s32 4294967295, %s2000_s19   ;;  %s2012_s15 = smov [#allocation10]  }
 0xbf7   : > { %p2492_p8 = scmp.eq.s32.totalorder %s2531_s14, 1  ;;  %s1546_s16 = sshll.u32 %s2012_s15, 4  ;;  %s1547_s16 = int_to_ptr.vmem [resolvable:$true] %s1546_s16 }
 0xbf8   : > { %s1950_s17 = scalar_lea.vmem %s1547_s16, 128  ;;  %p1957_p12 = scmp.lt.s32.totalorder %s1547_s16, %s1547_s16 }
 0xbf9   : > { %p1951_p9 = scmp.ne.s32.totalorder %s1547_s16, %s1950_s17  ;;  %p1958_p13 = scmp.lt.s32.totalorder %s1950_s17, %s1950_s17 }
 0xbfb   : > { %p1952_p10 = pnand %p1951_p9, %p2492_p8  ;;  %p1959_p0 = por %p1958_p13, %p1957_p12 }
 0xbfd   : > { %p1953_p11 = pneg %p1952_p10 }
 0xbff   : > { %p1960_p1 = pnand %p1959_p0, %p1953_p11 }
 0xc01   : > { %1963 = shalt.err (!%p1960_p1)
}
 0xc02   : > { %1831 = dma.vmem_to_hbm [thread:$0]  (%p2492_p8), %s1547_s16, 128, %s2527_s11, [#allocation11]  }
 0xc03   : > { %1987 = dma.done.wait (%p2492_p8), [#allocation11], 128  }
 0xc04   : > { %1989 = vsyncadd (%p2492_p8), [#allocation11], 4294967168 }
 0xc05 PF: > { %s22_s19 = sadd.s32 1, %s2000_s19   ;;  %s2533_s17 = sld [smem:[#allocation13_spill]] }
 0xc06   : > { %p19_p2 = scmp.ge.s32.totalorder %s22_s19, 4   ;;  %s2534_s18 = sld [smem:[#allocation14_spill]] }
 0xc08   :  { %21 = sbr.rel (!%p19_p2) target bundleno = 2 (0x2), region = 118 }
 0xc0d   :  { %1559 = vsyncpa [#allocation11], 1 }
 0xc0e   :  { %1561 = vsyncpa [#allocation11 + $0x1], 1 }

// kernel: tpu_custom_call.1
= control target key start
LH: loop header
LB: loop body
LE: loop exit
PB: predicated region body
PF: predicated region fallthrough
CT: control target
= control target key end

     0   :  { %16 = vsyncpa [#allocation11], 0  ;;  %s2073_s17 = smov 0   ;;  %s2075_s18 = smov 0   ;;  %s2516_s0 = inlined_call_operand.vmem [shape: f32[8,1], index: 0, kind: input, shape index: {}]   ;;  %s2517_s1 = inlined_call_operand.vmem [shape: f32[8,8,1], index: 1, kind: input, shape index: {}]   ;;  %s2518_s2 = inlined_call_operand.vmem [shape: f32[8,8,1], index: 2, kind: input, shape index: {}]   ;;  %s2519_s3 = inlined_call_operand.vmem [shape: bf16[8,8,32], index: 3, kind: input, shape index: {}]   ;;  %s2520_s4 = inlined_call_operand.vmem [shape: bf16[8,8,32], index: 4, kind: input, shape index: {}]   ;;  %s2521_s5 = inlined_call_operand.vmem [shape: bf16[32,128], index: 5, kind: input, shape index: {}]   ;;  %s2522_s6 = inlined_call_operand.vmem [shape: bf16[32,128], index: 6, kind: input, shape index: {}]   ;;  %s2523_s7 = inlined_call_operand.vmem [shape: f32[1,128], index: 7, kind: input, shape index: {}]   ;;  %s2524_s8 = inlined_call_operand.vmem [shape: f32[1,128], index: 8, kind: input, shape index: {}]   ;;  %s2525_s9 = inlined_call_operand.vmem [shape: bf16[32,128], index: 9, kind: input, shape index: {}]   ;;  %s2526_s10 = inlined_call_operand.vmem [shape: bf16[32,128], index: 10, kind: input, shape index: {}]   ;;  %s2527_s11 = inlined_call_operand.hbm [shape: f32[8,64], index: 11, kind: output, shape index: {}]  }
   0x1   :  { %s2077_s19 = smov 0  }
   0x2 LB: > { %2529 = sst [smem:[#allocation13_spill]] %s1996_s18  ;;  %s31_s21 = sadd.s32 1, %s1996_s18  ;;  %s2000_s19 = sphi %s2077_s19, %s22_s19   ;;  %s1996_s18 = sphi %s2075_s18, %s2534_s18   ;;  %s1992_s17 = sphi %s2073_s17, %s2533_s17  }
   0x3   : > { %p32_p0 = scmp.ge.s32.totalorder %s31_s21, 2  ;;  %p1663_p1 = scmp.ge.s32.totalorder %s2000_s19, 1 }
   0x4   : > { %p421_p2 = scmp.lt.s32.totalorder %s2000_s19, 3 }
   0x5   : > { %s2536_s21 = smov (%p32_p0, %s31_s21), 0 }
   0x6   : > { %2530 = sst [smem:[#allocation14_spill]] %s2536_s21  ;;  %p422_p3 = pnand %p1663_p1, %p421_p2 }
   0x7   : > { %s1664_s22 = sshll.u32 (!%p422_p3), %s1992_s17, 2  ;;  %s502_s23 = ssub.s32 (!%p422_p3), 1, %s1992_s17 }
   0x8   : > { %425 = sbr.rel (%p422_p3) target bundleno = 3077 (0xc05), region = 64  ;;  %p494_p4 = scmp.lt.s32.totalorder (!%p422_p3), %s1664_s22, 7 }
   0x9   : > { %s1666_s24 = sshll.u32 (!%p422_p3), %s502_s23, 2  ;;  %p1672_p6 = scmp.ne.s32.totalorder (!%p422_p3), %s1992_s17, 0 }
   0xa   : > { %p504_p5 = scmp.lt.s32.totalorder (!%p422_p3), %s1666_s24, 7 }
   0xd   : > { %s2538_s22 = smov (!%p494_p4, %s1664_s22), 7  ;;  %s2540_s24 = smov (!%p504_p5, %s1666_s24), 7 }
   0xe   : > { %s1665_s25 = sshll.u32 %s2538_s22, 3  ;;  %s1669_s26 = sshll.u32 %s2538_s22, 2 }
   0xf   : > { %s2099_s29 = scalar_lea.vmem %s2517_s1, %s1665_s25  ;;  %s1667_s30 = sshll.u32 %s2540_s24, 3 }
  0x10   : > { %s2104_s14 = scalar_lea.vmem %s2518_s2, %s1667_s30  ;;  %s2109_s23 = scalar_lea.vmem %s2519_s3, %s1669_s26 }
  0x11   : > { %s1671_s20 = sshll.u32 %s2540_s24, 2  ;;  %537 = sbr.rel (%p1672_p6) target bundleno = 152 (0x98), region = 68 }
  0x12   : > { %s2114_s22 = scalar_lea.vmem %s2520_s4, %s1671_s20 }
  0x16   : > { %v543_v0 = vld [vmem:[%s2516_s0] sm:$0xff]  ;;  %vm538_vm0 = vcmask 261120   ;;  %v2002_v1 = vmov 0   ;;  %v2003_v2 = vmov 0.0   ;;  %v2004_v5 = vmov -inf  }
  0x17   : > { %1871 = vset.pattern.permute.xlu0 %v2002_v1  ;;  %vm544_vm1 = vcmp.ne.f32.partialorder %v543_v0, 0.0  ;;  %539 = vst.msk [vmem:[#allocation4] sm:$0xff] %vm538_vm0, %v2003_v2  ;;  %540 = vst.msk [vmem:[#allocation5] sm:$0xff] %vm538_vm0, %v2003_v2 }
  0x18   : > { %541 = vst.msk [vmem:[#allocation6] sm:$0xff] %vm538_vm0, %v2003_v2  ;;  %542 = vst.msk [vmem:[#allocation7] sm:$0xff] %vm538_vm0, %v2003_v2  ;;  %v545_v3 = vsel %vm544_vm1, 1, %v2002_v1 }
  0x19   : > { %547 = vperm.xlu0 %1871, %v545_v3  }
  0x94   : > { %v548_v4 = vpop.permute.xlu0 %547 }
  0x95   : > { %vm549_vm2 = vcmp.eq.s32.totalorder %v548_v4, 1 }
  0x96   : > { %v550_v6 = vsel %vm549_vm2, 0.0, %v2004_v5 }
  0x97   : > { %551 = vst.msk [vmem:[#allocation8] sm:$0xff] %vm538_vm0, %v550_v6  ;;  %552 = vst.msk [vmem:[#allocation9] sm:$0xff] %vm538_vm0, %v550_v6 }
  0x98 PF: > { %v1874_v7 = vld [vmem:[%s2521_s5 + $0x8] sm:$0xff]   ;;  %v1876_v9 = vld [vmem:[%s2521_s5] sm:$0xff]   ;;  %vm590_vm3 = vcmask 261120   ;;  %v2005_v15 = vmov 0.0   ;;  %v2173_v21 = vld [vmem:[#allocation6] sm:$0xff]  ;;  %vm2006_vm4 = vmmov 0  }
  0x99   : > { %v1875_v8 = vld [vmem:[%s2522_s6 + $0x8] sm:$0xff]   ;;  %1750 = vmatprep.subr.bf16.mxu0 %v1874_v7  ;;  %v1877_v10 = vld [vmem:[%s2522_s6] sm:$0xff]   ;;  %s2007_s20 = smov 32   ;;  %v869_v24 = vpack.c.bf16 %v2173_v21, %v2173_v21  ;;  %v757_v25 = vld [vmem:[#allocation7] sm:$0xff]  ;;  %v2008_v54 = vmov 0   ;;  %s2009_s30 = smov 64  }
  0x9a   : > { %1758 = vmatprep.subr.bf16.mxu1 %v1875_v8  ;;  %1751 = vmatpush3.bf16.msra.mxu0 %v1874_v7  ;;  %v1878_v11 = vld [vmem:[%s2109_s23] sm:$0xff]   ;;  %v1880_v13 = vld [vmem:[%s2109_s23 + $0x8] sm:$0xff]   ;;  %v1687_v3 = vld [vmem:[%s2104_s14 + $0x18] sm:$0xff]  ;;  %s2010_s12 = smov 96   ;;  %p1713_p7 = scmp.ne.s32.totalorder %s1992_s17, 1 }
  0x9b   : > { %1759 = vmatpush3.bf16.msra.mxu1 %v1875_v8  ;;  %1752 = vmatprep.subr.bf16.mxu0 %v1876_v9  ;;  %v1879_v12 = vld [vmem:[%s2114_s22] sm:$0xff]   ;;  %v1881_v14 = vld [vmem:[%s2114_s22 + $0x8] sm:$0xff]   ;;  %vm764_vm6 = vcmp.ne.f32.partialorder %v1687_v3, 0.0 }
  0x9c   : > { %1760 = vmatprep.subr.bf16.mxu1 %v1877_v10  ;;  %1754 = vmatprep.mubr.msk.bf16.mxu0 %vm590_vm3, %v1878_v11  ;;  %v2148_v16 = vld [vmem:[%s2525_s9 + $0x8] sm:$0xff]   ;;  %v2160_v18 = vld [vmem:[%s2525_s9] sm:$0xff]   ;;  %v954_v8 = vsel %vm764_vm6, 1, %v2008_v54 }
  0x9d   : > { %1762 = vmatprep.mubr.msk.bf16.mxu1 %vm590_vm3, %v1879_v12  ;;  %v2154_v17 = vld [vmem:[%s2526_s10 + $0x8] sm:$0xff]   ;;  %v2167_v19 = vld [vmem:[%s2526_s10] sm:$0xff]   ;;  %1872 = vset.pattern.permute.xlu0 %v2008_v54 }
  0x9e   : > { %1753 = vmatpush3.bf16.msra.mxu0 %v1876_v9  ;;  %v2171_v20 = vld [vmem:[#allocation4] sm:$0xff]  ;;  %v755_v22 = vld [vmem:[#allocation5] sm:$0xff]  ;;  %1873 = vset.pattern.permute.xlu1 %v2008_v54 }
  0x9f   : > { %1761 = vmatpush3.bf16.msra.mxu1 %v1877_v10  ;;  %1766 = vmatprep.subr.bf16.mxu0 %v2005_v15  ;;  %v766_v23 = vpack.c.bf16 %v2171_v20, %v2171_v20  ;;  %v1673_v26 = vld [vmem:[%s2523_s7] ss:$0 sm:$0xff] }
  0xa0   : > { %1774 = vmatprep.subr.bf16.mxu1 %v2005_v15  ;;  %831 = vrot.lane.b32.xlu1 %v755_v22, %s2007_s20  ;;  %v1680_v27 = vld [vmem:[%s2524_s8] ss:$0 sm:$0xff] }
  0xa1   : > { %1755 = vmatmul.mubr.msk.bf16.vlgmr.msra.gmra.mxu0 %vm590_vm3, %v1880_v13  ;;  %v760_v63 = vld [vmem:[%s2099_s29] sm:$0xff] }
  0xa2   : > { %1763 = vmatmul.mubr.msk.bf16.vlgmr.msra.gmra.mxu1 %vm590_vm3, %v1881_v14  ;;  %1767 = vmatpush3.bf16.msra.mxu0 %v2148_v16  ;;  %vm761_vm5 = vcmp.ne.f32.partialorder %v760_v63, 0.0 }
  0xa3   : > { %1775 = vmatpush3.bf16.msra.mxu1 %v2154_v17  ;;  %1768 = vmatprep.subr.bf16.mxu0 %v2005_v15  ;;  %v851_v6 = vsel %vm761_vm5, 1, %v2008_v54 }
  0xa4   : > { %1776 = vmatprep.subr.bf16.mxu1 %v2005_v15  ;;  %1770 = vmatprep.mubr.msk.bf16.mxu0 %vm2006_vm4, %v2005_v15 }
  0xa5   : > { %1778 = vmatprep.mubr.msk.bf16.mxu1 %vm2006_vm4, %v2005_v15  ;;  %934 = vrot.lane.b32.xlu1 %v757_v25, %s2007_s20 }
  0xa6   : > { %1769 = vmatpush3.bf16.msra.mxu0 %v2160_v18 }
  0xa7   : > { %1777 = vmatpush3.bf16.msra.mxu1 %v2167_v19  ;;  %1782 = vmatprep.subr.bf16.mxu0 %v2005_v15 }
  0xa8   : > { %1790 = vmatprep.subr.bf16.mxu1 %v2005_v15 }
  0xa9   : > { %1771 = vmatmul.mubr.msk.bf16.vlgmr.msra.gmra.mxu0 %vm590_vm3, %v766_v23 }
  0xaa   : > { %1779 = vmatmul.mubr.msk.bf16.vlgmr.msra.gmra.mxu1 %vm590_vm3, %v869_v24  ;;  %1783 = vmatpush3.bf16.msra.mxu0 %v2148_v16 }
  0xab   : > { %1784 = vmatprep.subr.bf16.mxu0 %v2005_v15  ;;  %1791 = vmatpush3.bf16.msra.mxu1 %v2154_v17 }
  0xac   : > { %1786 = vmatprep.mubr.msk.bf16.mxu0 %vm2006_vm4, %v2005_v15  ;;  %1792 = vmatprep.subr.bf16.mxu1 %v2005_v15 }
  0xad   : > { %1794 = vmatprep.mubr.msk.bf16.mxu1 %vm2006_vm4, %v2005_v15 }
  0xae   : > { %1785 = vmatpush3.bf16.msra.mxu0 %v2160_v18 }
  0xaf   : > { %1793 = vmatpush3.bf16.msra.mxu1 %v2167_v19  ;;  %1798 = vmatprep.subr.bf16.mxu0 %v2005_v15 }
  0xb0   : > { %1806 = vmatprep.subr.bf16.mxu1 %v2005_v15 }
 0x112   : > { %v2232_v9 = vpop.permute.xlu1 %831 }
 0x117   : > { %v2235_v11 = vpop.permute.xlu1 %934 }
 0x161   : > { %v1756_v28 = vpop.f32.mrf.mxu0 }
 0x162   : > { %v2210_v29 = vadd.f32 %v1756_v28, %v1673_v26  ;;  %v1764_v30 = vpop.f32.mrf.mxu1 }
 0x163   : > { %v2212_v31 = vadd.f32 %v1764_v30, %v1680_v27  ;;  %v631_v32 = vpop.f32.mrf.mxu0 }
 0x164   : > { %v727_v33 = vpop.f32.mrf.mxu1  ;;  %v632_v39 = vadd.f32 %v1673_v26, %v631_v32 }
 0x165   : > { %v2214_v34 = vadd.f32 %v1680_v27, %v727_v33  ;;  %v1757_v35 = vpop.f32.mrf.mxu0 }
 0x166   : > { %v2216_v36 = vadd.f32 %v1757_v35, %v1673_v26  ;;  %v1765_v37 = vpop.f32.mrf.mxu1 }
 0x167   : > { %v634_v38 = vpop.f32.mrf.mxu0  ;;  %v739_v44 = vadd.f32 %v1765_v37, %v1680_v27 }
 0x168   : > { %v2218_v40 = vadd.f32 %v1673_v26, %v634_v38  ;;  %v730_v41 = vpop.f32.mrf.mxu1 }
 0x169   : > { %v2220_v42 = vadd.f32 %v1680_v27, %v730_v41  ;;  %v816_v43 = vpop.f32.mrf.mxu0 }
 0x16a   : > { %v822_v45 = vadd.f32 %v816_v43, %v632_v39  ;;  %v919_v46 = vpop.f32.mrf.mxu1 }
 0x16b   : > { %v1772_v47 = vpop.f32.mrf.mxu0  ;;  %v925_v48 = vadd.f32 %v919_v46, %v739_v44 }
 0x16c   : > { %1886 = vtanh.f32 %v822_v45  ;;  %v1780_v49 = vpop.f32.mrf.mxu1  ;;  %v1691_v57 = vmul.f32 -1.442695, %v822_v45 }
 0x16d   : > { %v819_v50 = vpop.f32.mrf.mxu0  ;;  %1888 = vtanh.f32 %v925_v48  ;;  %v1695_v58 = vmul.f32 -1.442695, %v925_v48 }
 0x16e   : > { %v922_v51 = vpop.f32.mrf.mxu1  ;;  %1890 = vpow2.f32 %v1691_v57 }
 0x16f   : > { %v1773_v52 = vpop.f32.mrf.mxu0  ;;  %1892 = vpow2.f32 %v1695_v58 }
 0x170   : > { %v1781_v53 = vpop.f32.mrf.mxu1 }
 0x179   : > { %v1887_v55 = vpop.eup %1886 }
 0x17a   : > { %836 = vrot.lane.b32.xlu0 %v1887_v55, %s2009_s30  ;;  %v1889_v56 = vpop.eup %1888 }
 0x17b   : > { %v1891_v59 = vpop.eup %1890 }
 0x17c   : > { %v826_v60 = vadd.f32 1.0, %v1891_v59  ;;  %v1893_v61 = vpop.eup %1892 }
 0x17d   : > { %v929_v62 = vadd.f32 1.0, %v1893_v61  ;;  %v1696_v61 = vld [vmem:[%s2099_s29 + $0x8] sm:$0xff] }
 0x17e   : > { %939 = vrot.lane.b32.xlu0 %v1889_v56, %s2009_s30  ;;  %1894 = vrcp.f32 %v826_v60  ;;  %vm973_vm9 = vcmp.ne.f32.partialorder %v1696_v61, 0.0 }
 0x17f   : > { %1896 = vrcp.f32 %v929_v62 }
 0x18b   : > { %v1895_v0 = vpop.eup %1894 }
 0x18c   : > { %v1897_v4 = vpop.eup %1896  ;;  %v834_v10 = vmul.f32 %v1895_v0, %v2232_v9 }
 0x18d   : > { %v937_v14 = vmul.f32 %v1897_v4, %v2235_v11 }
 0x1ec   : > { %v837_v1 = vpop.permute.xlu0 %836 }
 0x1ed   : > { %v839_v2 = vmul.f32 %v1895_v0, %v837_v1  ;;  %v1697_v1 = vld [vmem:[%s2104_s14 + $0x10] sm:$0xff] }
 0x1ee   : > { %vm976_vm10 = vcmp.ne.f32.partialorder %v1697_v1, 0.0 }
 0x1ef   : > { %841 = vrot.lane.b32.xlu0 %v839_v2, %s2007_s20 }
 0x1f0   : > { %v940_v5 = vpop.permute.xlu0 %939 }
 0x1f1   : > { %v942_v7 = vmul.f32 %v1897_v4, %v940_v5 }
 0x1f3   : > { %944 = vrot.lane.b32.xlu1 %v942_v7, %s2007_s20  ;;  %853 = vperm.xlu0 %1872, %v851_v6   ;;  %v1136_v6 = vsel %vm976_vm10, 1, %v2008_v54 }
 0x1f7   : > { %956 = vperm.xlu1 %1873, %v954_v8  }
 0x261   : > { %v842_v12 = vpop.permute.xlu0 %841 }
 0x262   : > { %v2237_v13 = vadd.f32 %v842_v12, %v834_v10 }
 0x264   : > { %1898 = vtanh.f32 %v2237_v13 }
 0x265   : > { %v945_v22 = vpop.permute.xlu1 %944 }
 0x266   : > { %v2241_v23 = vadd.f32 %v945_v22, %v937_v14 }
 0x268   : > { %1900 = vtanh.f32 %v2241_v23 }
 0x26e   : > { %v2252_v27 = vpop.permute.xlu0 %853 }
 0x26f   : > { %vm855_vm7 = vcmp.eq.s32.totalorder %v2252_v27, 1 }
 0x270   : > { %v2304_v7 = vsel %vm855_vm7, %v2237_v13, %v2232_v9 }
 0x271   : > { %v1899_v24 = vpop.eup %1898 }
 0x272   : > { %847 = vrot.lane.b32.xlu1 %v1899_v24, %s2009_s30  ;;  %v2250_v26 = vpop.permute.xlu1 %956 }
 0x273   : > { %vm958_vm8 = vcmp.eq.s32.totalorder %v2250_v26, 1 }
 0x274   : > { %v2313_v14 = vsel %vm958_vm8, %v2241_v23, %v2235_v11 }
 0x275   : > { %v1901_v25 = vpop.eup %1900 }
 0x276   : > { %950 = vrot.lane.b32.xlu0 %v1901_v25, %s2009_s30  ;;  %858 = vrot.lane.b32.xlu1 %v2171_v20, %s2010_s12 }
 0x27a   : > { %961 = vrot.lane.b32.xlu0 %v2173_v21, %s2010_s12 }
 0x2e4   : > { %v848_v28 = vpop.permute.xlu1 %847 }
 0x2e5   : > { %v2254_v30 = vmul.f32 %v1895_v0, %v848_v28 }
 0x2e8   : > { %v951_v32 = vpop.permute.xlu0 %950  ;;  %v859_v33 = vpop.permute.xlu1 %858 }
 0x2e9   : > { %v2260_v35 = vsel %vm855_vm7, %v2254_v30, %v859_v33  ;;  %v2264_v21 = vmul.f32 %v1897_v4, %v951_v32  ;;  %v1050_v4 = vsel %vm973_vm9, 1, %v2008_v54 }
 0x2ea   : > { %v978_v20 = vpack.c.bf16 %v2260_v35, %v2260_v35 }
 0x2ec   : > { %v962_v37 = vpop.permute.xlu0 %961  ;;  %980 = vrot.lane.b32.xlu1 %v978_v20, %s2007_s20 }
 0x2ed   : > { %v2271_v38 = vsel %vm958_vm8, %v2264_v21, %v962_v37 }
 0x2ee   : > { %v1064_v39 = vpack.c.bf16 %v2271_v38, %v2271_v38 }
 0x2f0   : > { %1066 = vrot.lane.b32.xlu0 %v1064_v39, %s2007_s20 }
 0x35e   : > { %v981_v41 = vpop.permute.xlu1 %980 }
 0x35f   : > { %1787 = vmatmul.mubr.msk.bf16.vlgmr.msra.gmra.mxu0 %vm590_vm3, %v981_v41 }
 0x360   : > { %1799 = vmatpush3.bf16.msra.mxu0 %v2148_v16  ;;  %1802 = vmatprep.mubr.msk.bf16.mxu0 %vm2006_vm4, %v2005_v15 }
 0x361   : > { %1800 = vmatprep.subr.bf16.mxu0 %v2005_v15 }
 0x362   : > { %v1067_v43 = vpop.permute.xlu0 %1066 }
 0x363   : > { %1795 = vmatmul.mubr.msk.bf16.vlgmr.msra.gmra.mxu1 %vm590_vm3, %v1067_v43 }
 0x364   : > { %1801 = vmatpush3.bf16.msra.mxu0 %v2160_v18  ;;  %1807 = vmatpush3.bf16.msra.mxu1 %v2154_v17 }
 0x365   : > { %1808 = vmatprep.subr.bf16.mxu1 %v2005_v15  ;;  %1810 = vmatprep.mubr.msk.bf16.mxu1 %vm2006_vm4, %v2005_v15 }
 0x366   : > { %1814 = vmatprep.subr.bf16.mxu0 %v2005_v15 }
 0x368   : > { %1809 = vmatpush3.bf16.msra.mxu1 %v2167_v19 }
 0x369   : > { %1822 = vmatprep.subr.bf16.mxu1 %v2005_v15 }
 0x41f   : > { %v1019_v44 = vpop.f32.mrf.mxu0 }
 0x420   : > { %v1025_v45 = vadd.f32 %v1019_v44, %v2218_v40 }
 0x421   : > { %v1788_v46 = vpop.f32.mrf.mxu0 }
 0x422   : > { %1902 = vtanh.f32 %v1025_v45  ;;  %v1699_v40 = vmul.f32 -1.442695, %v1025_v45 }
 0x423   : > { %v1022_v47 = vpop.f32.mrf.mxu0  ;;  %v1105_v48 = vpop.f32.mrf.mxu1 }
 0x424   : > { %v1111_v49 = vadd.f32 %v1105_v48, %v2212_v31 }
 0x425   : > { %v1789_v50 = vpop.f32.mrf.mxu0  ;;  %v1796_v51 = vpop.f32.mrf.mxu1 }
 0x426   : > { %1904 = vtanh.f32 %v1111_v49  ;;  %v1701_v57 = vmul.f32 -1.442695, %v1111_v49 }
 0x427   : > { %v1108_v52 = vpop.f32.mrf.mxu1  ;;  %1906 = vpow2.f32 %v1699_v40 }
 0x428   : > { %1908 = vpow2.f32 %v1701_v57 }
 0x429   : > { %v1797_v53 = vpop.f32.mrf.mxu1 }
 0x42f   : > { %v1903_v55 = vpop.eup %1902 }
 0x430   : > { %1035 = vrot.lane.b32.xlu1 %v1903_v55, %s2009_s30 }
 0x433   : > { %v1905_v56 = vpop.eup %1904 }
 0x434   : > { %1121 = vrot.lane.b32.xlu0 %v1905_v56, %s2009_s30  ;;  %v1907_v58 = vpop.eup %1906  ;;  %v1702_v56 = vld [vmem:[%s2099_s29 + $0x10] sm:$0xff] }
 0x435   : > { %v1029_v59 = vadd.f32 1.0, %v1907_v58  ;;  %v1909_v31 = vpop.eup %1908  ;;  %vm1151_vm13 = vcmp.ne.f32.partialorder %v1702_v56, 0.0 }
 0x436   : > { %v1115_v60 = vadd.f32 1.0, %v1909_v31  ;;  %v1228_v61 = vsel %vm1151_vm13, 1, %v2008_v54 }
 0x437   : > { %1910 = vrcp.f32 %v1029_v59  ;;  %v1703_v59 = vld [vmem:[%s2104_s14 + $0x8] sm:$0xff] }
 0x438   : > { %1912 = vrcp.f32 %v1115_v60  ;;  %vm1154_vm14 = vcmp.ne.f32.partialorder %v1703_v59, 0.0 }
 0x444   : > { %v1911_v62 = vpop.eup %1910 }
 0x445   : > { %v1913_v2 = vpop.eup %1912  ;;  %v1033_v8 = vmul.f32 %v1911_v62, %v2304_v7 }
 0x446   : > { %v1119_v22 = vmul.f32 %v1913_v2, %v2313_v14 }
 0x4a2   : > { %v1036_v63 = vpop.permute.xlu1 %1035 }
 0x4a3   : > { %v1038_v0 = vmul.f32 %v1911_v62, %v1036_v63  ;;  %v1314_v63 = vsel %vm1154_vm14, 1, %v2008_v54 }
 0x4a5   : > { %1040 = vrot.lane.b32.xlu1 %v1038_v0, %s2007_s20 }
 0x4a6   : > { %v1122_v3 = vpop.permute.xlu0 %1121 }
 0x4a7   : > { %v1124_v5 = vmul.f32 %v1913_v2, %v1122_v3 }
 0x4a9   : > { %1126 = vrot.lane.b32.xlu0 %v1124_v5, %s2007_s20  ;;  %1052 = vperm.xlu1 %1873, %v1050_v4  }
 0x4ad   : > { %1138 = vperm.xlu0 %1872, %v1136_v6  }
 0x517   : > { %v1041_v10 = vpop.permute.xlu1 %1040 }
 0x518   : > { %v2307_v12 = vadd.f32 %v1041_v10, %v1033_v8 }
 0x51a   : > { %1914 = vtanh.f32 %v2307_v12 }
 0x51b   : > { %v1127_v24 = vpop.permute.xlu0 %1126 }
 0x51c   : > { %v2317_v25 = vadd.f32 %v1127_v24, %v1119_v22 }
 0x51e   : > { %1916 = vtanh.f32 %v2317_v25 }
 0x524   : > { %v2322_v28 = vpop.permute.xlu1 %1052 }
 0x525   : > { %vm1054_vm11 = vcmp.eq.s32.totalorder %v2322_v28, 1 }
 0x526   : > { %v2376_v0 = vsel %vm1054_vm11, %v2307_v12, %v2304_v7 }
 0x527   : > { %v1915_v9 = vpop.eup %1914 }
 0x528   : > { %1046 = vrot.lane.b32.xlu1 %v1915_v9, %s2009_s30  ;;  %v2324_v32 = vpop.permute.xlu0 %1138 }
 0x529   : > { %vm1140_vm12 = vcmp.eq.s32.totalorder %v2324_v32, 1 }
 0x52a   : > { %v2385_v4 = vsel %vm1140_vm12, %v2317_v25, %v2313_v14 }
 0x52b   : > { %v1917_v13 = vpop.eup %1916 }
 0x52c   : > { %1132 = vrot.lane.b32.xlu0 %v1917_v13, %s2009_s30 }
 0x59a   : > { %v1047_v11 = vpop.permute.xlu1 %1046 }
 0x59b   : > { %v2326_v23 = vmul.f32 %v1911_v62, %v1047_v11 }
 0x59d   : > { %v2333_v33 = vsel %vm1054_vm11, %v2326_v23, %v2260_v35 }
 0x59e   : > { %v1133_v20 = vpop.permute.xlu0 %1132  ;;  %v1156_v37 = vpack.c.bf16 %v2333_v33, %v2333_v33 }
 0x59f   : > { %v2337_v39 = vmul.f32 %v1913_v2, %v1133_v20 }
 0x5a0   : > { %1158 = vrot.lane.b32.xlu1 %v1156_v37, %s2007_s20 }
 0x5a1   : > { %v2345_v41 = vsel %vm1140_vm12, %v2337_v39, %v2271_v38 }
 0x5a2   : > { %v1242_v35 = vpack.c.bf16 %v2345_v41, %v2345_v41 }
 0x5a4   : > { %1244 = vrot.lane.b32.xlu0 %v1242_v35, %s2007_s20 }
 0x612   : > { %v1159_v43 = vpop.permute.xlu1 %1158 }
 0x613   : > { %1803 = vmatmul.mubr.msk.bf16.vlgmr.msra.gmra.mxu0 %vm590_vm3, %v1159_v43 }
 0x614   : > { %1815 = vmatpush3.bf16.msra.mxu0 %v2148_v16  ;;  %1818 = vmatprep.mubr.msk.bf16.mxu0 %vm2006_vm4, %v2005_v15 }
 0x615   : > { %1816 = vmatprep.subr.bf16.mxu0 %v2005_v15 }
 0x616   : > { %v1245_v44 = vpop.permute.xlu0 %1244 }
 0x617   : > { %1811 = vmatmul.mubr.msk.bf16.vlgmr.msra.gmra.mxu1 %vm590_vm3, %v1245_v44 }
 0x618   : > { %1817 = vmatpush3.bf16.msra.mxu0 %v2160_v18  ;;  %1823 = vmatpush3.bf16.msra.mxu1 %v2154_v17 }
 0x619   : > { %1824 = vmatprep.subr.bf16.mxu1 %v2005_v15  ;;  %1826 = vmatprep.mubr.msk.bf16.mxu1 %vm2006_vm4, %v2005_v15 }
 0x61c   : > { %1825 = vmatpush3.bf16.msra.mxu1 %v2167_v19 }
 0x6d3   : > { %v1197_v16 = vpop.f32.mrf.mxu0 }
 0x6d4   : > { %v1203_v38 = vadd.f32 %v1197_v16, %v2210_v29 }
 0x6d5   : > { %v1804_v45 = vpop.f32.mrf.mxu0 }
 0x6d6   : > { %1918 = vtanh.f32 %v1203_v38  ;;  %v1705_v19 = vmul.f32 -1.442695, %v1203_v38 }
 0x6d7   : > { %v1200_v46 = vpop.f32.mrf.mxu0  ;;  %v1283_v47 = vpop.f32.mrf.mxu1 }
 0x6d8   : > { %v1289_v48 = vadd.f32 %v1283_v47, %v2220_v42 }
 0x6d9   : > { %v1805_v49 = vpop.f32.mrf.mxu0  ;;  %v1812_v18 = vpop.f32.mrf.mxu1 }
 0x6da   : > { %1920 = vtanh.f32 %v1289_v48  ;;  %v1707_v29 = vmul.f32 -1.442695, %v1289_v48 }
 0x6db   : > { %v1286_v17 = vpop.f32.mrf.mxu1  ;;  %1922 = vpow2.f32 %v1705_v19 }
 0x6dc   : > { %1924 = vpow2.f32 %v1707_v29  ;;  %v1708_v29 = vld [vmem:[%s2099_s29 + $0x18] sm:$0xff]  ;;  %s2011_s29 = smov (!%p1713_p7), 32  }
 0x6dd   : > { %v1813_v50 = vpop.f32.mrf.mxu1  ;;  %vm1329_vm1 = vcmp.ne.f32.partialorder %v1708_v29, 0.0 }
 0x6e3   : > { %v1919_v51 = vpop.eup %1918 }
 0x6e4   : > { %1213 = vrot.lane.b32.xlu1 %v1919_v51, %s2009_s30 }
 0x6e7   : > { %v1921_v15 = vpop.eup %1920 }
 0x6e8   : > { %1299 = vrot.lane.b32.xlu0 %v1921_v15, %s2009_s30  ;;  %v1923_v52 = vpop.eup %1922 }
 0x6e9   : > { %v1207_v53 = vadd.f32 1.0, %v1923_v52  ;;  %v1925_v42 = vpop.eup %1924 }
 0x6ea   : > { %v1293_v55 = vadd.f32 1.0, %v1925_v42 }
 0x6eb   : > { %1926 = vrcp.f32 %v1207_v53 }
 0x6ec   : > { %1928 = vrcp.f32 %v1293_v55  ;;  %v1330_v55 = vld [vmem:[%s2104_s14] sm:$0xff] }
 0x6ed   : > { %vm1331_vm2 = vcmp.ne.f32.partialorder %v1330_v55, 0.0 }
 0x6ee   : > { %v1491_v59 = vsel %vm1331_vm2, 1, %v2008_v54 }
 0x6f8   : > { %v1927_v40 = vpop.eup %1926 }
 0x6f9   : > { %v1929_v31 = vpop.eup %1928  ;;  %v1211_v1 = vmul.f32 %v1927_v40, %v2376_v0 }
 0x6fa   : > { %v1297_v5 = vmul.f32 %v1929_v31, %v2385_v4 }
 0x756   : > { %v1214_v57 = vpop.permute.xlu1 %1213 }
 0x757   : > { %v1216_v58 = vmul.f32 %v1927_v40, %v1214_v57  ;;  %v1405_v57 = vsel %vm1329_vm1, 1, %v2008_v54 }
 0x759   : > { %1218 = vrot.lane.b32.xlu1 %v1216_v58, %s2007_s20 }
 0x75a   : > { %v1300_v60 = vpop.permute.xlu0 %1299 }
 0x75b   : > { %v1302_v62 = vmul.f32 %v1929_v31, %v1300_v60 }
 0x75d   : > { %1304 = vrot.lane.b32.xlu0 %v1302_v62, %s2007_s20  ;;  %1230 = vperm.xlu1 %1873, %v1228_v61  }
 0x761   : > { %1316 = vperm.xlu0 %1872, %v1314_v63  }
 0x7cb   : > { %v1219_v2 = vpop.permute.xlu1 %1218 }
 0x7cc   : > { %v2379_v3 = vadd.f32 %v1219_v2, %v1211_v1 }
 0x7ce   : > { %1930 = vtanh.f32 %v2379_v3 }
 0x7cf   : > { %v1305_v6 = vpop.permute.xlu0 %1304 }
 0x7d0   : > { %v2389_v8 = vadd.f32 %v1305_v6, %v1297_v5 }
 0x7d2   : > { %1932 = vtanh.f32 %v2389_v8 }
 0x7d8   : > { %v2394_v12 = vpop.permute.xlu1 %1230 }
 0x7d9   : > { %vm1232_vm15 = vcmp.eq.s32.totalorder %v2394_v12, 1 }
 0x7db   : > { %v1931_v7 = vpop.eup %1930 }
 0x7dc   : > { %1224 = vrot.lane.b32.xlu1 %v1931_v7, %s2009_s30  ;;  %v2396_v22 = vpop.permute.xlu0 %1316  ;;  %v759_v7 = vld [vmem:[#allocation9] sm:$0xff] }
 0x7dd   : > { %vm1318_vm0 = vcmp.eq.s32.totalorder %v2396_v22, 1 }
 0x7de   : > { %v1319_v63 = vsel %vm1318_vm0, %v2389_v8, %v2385_v4 }
 0x7df   : > { %v1933_v10 = vpop.eup %1932 }
 0x7e0   : > { %1310 = vrot.lane.b32.xlu0 %v1933_v10, %s2009_s30 }
 0x84e   : > { %v1225_v14 = vpop.permute.xlu1 %1224 }
 0x84f   : > { %v2398_v24 = vmul.f32 %v1927_v40, %v1225_v14 }
 0x851   : > { %v2405_v25 = vsel %vm1232_vm15, %v2398_v24, %v2333_v33 }
 0x852   : > { %v1311_v9 = vpop.permute.xlu0 %1310  ;;  %v1333_v13 = vpack.c.bf16 %v2405_v25, %v2405_v25 }
 0x853   : > { %v2409_v11 = vmul.f32 %v1929_v31, %v1311_v9  ;;  %v1233_v31 = vsel %vm1232_vm15, %v2379_v3, %v2376_v0 }
 0x854   : > { %1335 = vrot.lane.b32.xlu1 %v1333_v13, %s2007_s20 }
 0x855   : > { %v2417_v20 = vsel %vm1318_vm0, %v2409_v11, %v2345_v41 }
 0x856   : > { %v1419_v33 = vpack.c.bf16 %v2417_v20, %v2417_v20 }
 0x858   : > { %1421 = vrot.lane.b32.xlu0 %v1419_v33, %s2007_s20 }
 0x8c6   : > { %v1336_v37 = vpop.permute.xlu1 %1335 }
 0x8c7   : > { %1819 = vmatmul.mubr.msk.bf16.vlgmr.msra.gmra.mxu0 %vm590_vm3, %v1336_v37 }
 0x8ca   : > { %v1422_v35 = vpop.permute.xlu0 %1421 }
 0x8cb   : > { %1827 = vmatmul.mubr.msk.bf16.vlgmr.msra.gmra.mxu1 %vm590_vm3, %v1422_v35 }
 0x987   : > { %v1374_v43 = vpop.f32.mrf.mxu0 }
 0x988   : > { %v1380_v44 = vadd.f32 %v1374_v43, %v2216_v36 }
 0x989   : > { %v1820_v16 = vpop.f32.mrf.mxu0 }
 0x98a   : > { %1934 = vtanh.f32 %v1380_v44  ;;  %v1710_v36 = vmul.f32 -1.442695, %v1380_v44 }
 0x98b   : > { %v1377_v38 = vpop.f32.mrf.mxu0  ;;  %v1460_v45 = vpop.f32.mrf.mxu1 }
 0x98c   : > { %v1466_v41 = vadd.f32 %v1460_v45, %v2214_v34 }
 0x98d   : > { %v1821_v46 = vpop.f32.mrf.mxu0  ;;  %v1828_v47 = vpop.f32.mrf.mxu1 }
 0x98e   : > { %1936 = vtanh.f32 %v1466_v41  ;;  %v1712_v50 = vmul.f32 -1.442695, %v1466_v41 }
 0x98f   : > { %v1463_v48 = vpop.f32.mrf.mxu1  ;;  %1938 = vpow2.f32 %v1710_v36 }
 0x990   : > { %1940 = vpow2.f32 %v1712_v50 }
 0x991   : > { %v1829_v49 = vpop.f32.mrf.mxu1 }
 0x997   : > { %v1935_v18 = vpop.eup %1934 }
 0x998   : > { %1390 = vrot.lane.b32.xlu1 %v1935_v18, %s2009_s30 }
 0x99b   : > { %v1937_v17 = vpop.eup %1936 }
 0x99c   : > { %1476 = vrot.lane.b32.xlu0 %v1937_v17, %s2009_s30  ;;  %v1939_v51 = vpop.eup %1938 }
 0x99d   : > { %v1384_v15 = vadd.f32 1.0, %v1939_v51  ;;  %v1941_v34 = vpop.eup %1940 }
 0x99e   : > { %v1470_v19 = vadd.f32 1.0, %v1941_v34 }
 0x99f   : > { %1942 = vrcp.f32 %v1384_v15 }
 0x9a0   : > { %1944 = vrcp.f32 %v1470_v19 }
 0x9ac   : > { %v1943_v52 = vpop.eup %1942 }
 0x9ad   : > { %v1945_v56 = vpop.eup %1944  ;;  %v1388_v60 = vmul.f32 %v1943_v52, %v1233_v31 }
 0x9ae   : > { %v1474_v1 = vmul.f32 %v1945_v56, %v1319_v63 }
 0xa0a   : > { %v1391_v53 = vpop.permute.xlu1 %1390 }
 0xa0b   : > { %v1393_v42 = vmul.f32 %v1943_v52, %v1391_v53 }
 0xa0d   : > { %1395 = vrot.lane.b32.xlu1 %v1393_v42, %s2007_s20 }
 0xa0e   : > { %v1477_v40 = vpop.permute.xlu0 %1476 }
 0xa0f   : > { %v1479_v58 = vmul.f32 %v1945_v56, %v1477_v40 }
 0xa11   : > { %1481 = vrot.lane.b32.xlu0 %v1479_v58, %s2007_s20  ;;  %1407 = vperm.xlu1 %1873, %v1405_v57  }
 0xa15   : > { %1493 = vperm.xlu0 %1872, %v1491_v59  }
 0xa7f   : > { %v1396_v61 = vpop.permute.xlu1 %1395 }
 0xa80   : > { %v1398_v62 = vadd.f32 %v1396_v61, %v1388_v60 }
 0xa82   : > { %1946 = vtanh.f32 %v1398_v62 }
 0xa83   : > { %v1482_v2 = vpop.permute.xlu0 %1481 }
 0xa84   : > { %v1484_v5 = vadd.f32 %v1482_v2, %v1474_v1 }
 0xa86   : > { %1948 = vtanh.f32 %v1484_v5 }
 0xa8c   : > { %v1408_v0 = vpop.permute.xlu1 %1407 }
 0xa8d   : > { %vm1409_vm4 = vcmp.eq.s32.totalorder %v1408_v0, 1 }
 0xa8e   : > { %v1410_v3 = vsel %vm1409_vm4, %v1398_v62, %v1233_v31 }
 0xa8f   : > { %v1947_v54 = vpop.eup %1946 }
 0xa90   : > { %1401 = vrot.lane.b32.xlu1 %v1947_v54, %s2009_s30 }
 0xa93   : > { %v1949_v6 = vpop.eup %1948 }
 0xa94   : > { %1487 = vrot.lane.b32.xlu0 %v1949_v6, %s2009_s30  ;;  %863 = vrot.lane.b32.xlu1 %v2254_v30, %s2007_s20  ;;  %v1494_v30 = vpop.permute.xlu0 %1493 }
 0xa95   : > { %vm1495_vm5 = vcmp.eq.s32.totalorder %v1494_v30, 1 }
 0xa98   : > { %966 = vrot.lane.b32.xlu0 %v2264_v21, %s2007_s20  ;;  %1058 = vrot.lane.b32.xlu1 %v2326_v23, %s2007_s20 }
 0xa9c   : > { %1144 = vrot.lane.b32.xlu0 %v2337_v39, %s2007_s20  ;;  %1236 = vrot.lane.b32.xlu1 %v2398_v24, %s2007_s20  ;;  %v1496_v24 = vsel %vm1495_vm5, %v1484_v5, %v1319_v63 }
 0xaa0   : > { %1322 = vrot.lane.b32.xlu0 %v2409_v11, %s2007_s20 }
 0xaa4   : > { %1510 = vrot.lane.b32.xlu0 %v1410_v3, %s2010_s12 }
 0xb02   : > { %v1402_v21 = vpop.permute.xlu1 %1401 }
 0xb03   : > { %v1404_v4 = vmul.f32 %v1943_v52, %v1402_v21 }
 0xb05   : > { %1413 = vrot.lane.b32.xlu1 %v1404_v4, %s2007_s20  ;;  %v1411_v39 = vsel %vm1409_vm4, %v1404_v4, %v2405_v25 }
 0xb06   : > { %v1488_v23 = vpop.permute.xlu0 %1487  ;;  %v864_v16 = vpop.permute.xlu1 %863 }
 0xb07   : > { %v1490_v8 = vmul.f32 %v1945_v56, %v1488_v23 }
 0xb09   : > { %1499 = vrot.lane.b32.xlu0 %v1490_v8, %s2007_s20  ;;  %1505 = vrot.lane.b32.xlu1 %v1411_v39, %s2007_s20  ;;  %v1497_v9 = vsel %vm1495_vm5, %v1490_v8, %v2417_v20  ;;  %v758_v20 = vld [vmem:[#allocation8] sm:$0xff] }
 0xb0a   : > { %v967_v10 = vpop.permute.xlu0 %966  ;;  %v866_v38 = vmax.f32 %v758_v20, %v864_v16  ;;  %v1059_v45 = vpop.permute.xlu1 %1058 }
 0xb0b   : > { %v969_v14 = vmax.f32 %v759_v7, %v967_v10 }
 0xb0c   : > { %v867_v26 = vsel %vm855_vm7, %v866_v38, %v758_v20 }
 0xb0d   : > { %1520 = vrot.lane.b32.xlu0 %v1496_v24, %s2010_s12  ;;  %1515 = vrot.lane.b32.xlu1 %v1497_v9, %s2007_s20  ;;  %v970_v25 = vsel %vm958_vm8, %v969_v14, %v759_v7  ;;  %v1061_v41 = vmax.f32 %v867_v26, %v1059_v45 }
 0xb0e   : > { %v1145_v13 = vpop.permute.xlu0 %1144  ;;  %v1237_v46 = vpop.permute.xlu1 %1236 }
 0xb0f   : > { %v1147_v11 = vmax.f32 %v970_v25, %v1145_v13  ;;  %v1062_v32 = vsel %vm1054_vm11, %v1061_v41, %v867_v26 }
 0xb10   : > { %v1239_v47 = vmax.f32 %v1062_v32, %v1237_v46 }
 0xb11   : > { %v1148_v33 = vsel %vm1140_vm12, %v1147_v11, %v970_v25 }
 0xb12   : > { %v1323_v37 = vpop.permute.xlu0 %1322  ;;  %v1240_v22 = vsel %vm1232_vm15, %v1239_v47, %v1062_v32 }
 0xb13   : > { %v1325_v35 = vmax.f32 %v1148_v33, %v1323_v37 }
 0xb15   : > { %v1326_v43 = vsel %vm1318_vm0, %v1325_v35, %v1148_v33 }
 0xb16   : > { %v1511_v44 = vpop.permute.xlu0 %1510 }
 0xb17   : > { %1513 = vst.msk [vmem:[#allocation5] sm:$0xff] %vm590_vm3, %v1511_v44 }
 0xb77   : > { %v1414_v48 = vpop.permute.xlu1 %1413 }
 0xb78   : > { %v1416_v49 = vmax.f32 %v1240_v22, %v1414_v48 }
 0xb7a   : > { %v1417_v18 = vsel %vm1409_vm4, %v1416_v49, %v1240_v22 }
 0xb7b   : > { %1524 = vst.msk [vmem:[#allocation8] sm:$0xff] %vm590_vm3, %v1417_v18  ;;  %v1500_v17 = vpop.permute.xlu0 %1499  ;;  %v1506_v36 = vpop.permute.xlu1 %1505 }
 0xb7c   : > { %v1502_v27 = vmax.f32 %v1326_v43, %v1500_v17  ;;  %1508 = vst.msk [vmem:[#allocation4] sm:$0xff] %vm590_vm3, %v1506_v36  ;;  %1529 = sbr.rel (%p1713_p7) target bundleno = 3062 (0xbf6), region = 72 }
 0xb7e   : > { %v1503_v50 = vsel %vm1495_vm5, %v1502_v27, %v1326_v43 }
 0xb7f   : > { %1525 = vst.msk [vmem:[#allocation9] sm:$0xff] %vm590_vm3, %v1503_v50  ;;  %v1521_v28 = vpop.permute.xlu0 %1520  ;;  %v1516_v51 = vpop.permute.xlu1 %1515 }
 0xb80   : > { %1523 = vst.msk [vmem:[#allocation7] sm:$0xff] %vm590_vm3, %v1521_v28  ;;  %1518 = vst.msk [vmem:[#allocation6] sm:$0xff] %vm590_vm3, %v1516_v51 }
 0xb81   : > { %1531 = vrot.lane.b32.xlu0 %v1503_v50, %s2011_s29  ;;  %vm1535_vm6 = vcmask 523264  }
 0xbf3   : > { %v1532_v12 = vpop.permute.xlu0 %1531 }
 0xbf4   : > { %v1534_v15 = vsel %vm590_vm3, %v1417_v18, %v1532_v12 }
 0xbf5   : > { %1536 = vst.msk [vmem:[#allocation10] sm:$0xff] %vm1535_vm6, %v1534_v15 }
 0xbf6 PF: > { %s2531_s14 = sadd.s32 4294967295, %s2000_s19   ;;  %s2012_s15 = smov [#allocation10]  }
 0xbf7   : > { %p2492_p8 = scmp.eq.s32.totalorder %s2531_s14, 1  ;;  %s1546_s16 = sshll.u32 %s2012_s15, 4  ;;  %s1547_s16 = int_to_ptr.vmem [resolvable:$true] %s1546_s16 }
 0xbf8   : > { %s1950_s17 = scalar_lea.vmem %s1547_s16, 128  ;;  %p1957_p12 = scmp.lt.s32.totalorder %s1547_s16, %s1547_s16 }
 0xbf9   : > { %p1951_p9 = scmp.ne.s32.totalorder %s1547_s16, %s1950_s17  ;;  %p1958_p13 = scmp.lt.s32.totalorder %s1950_s17, %s1950_s17 }
 0xbfb   : > { %p1952_p10 = pnand %p1951_p9, %p2492_p8  ;;  %p1959_p0 = por %p1958_p13, %p1957_p12 }
 0xbfd   : > { %p1953_p11 = pneg %p1952_p10 }
 0xbff   : > { %p1960_p1 = pnand %p1959_p0, %p1953_p11 }
 0xc01   : > { %1963 = shalt.err (!%p1960_p1)
}
 0xc02   : > { %1831 = dma.vmem_to_hbm [thread:$0]  (%p2492_p8), %s1547_s16, 128, %s2527_s11, [#allocation11]  }
 0xc03   : > { %1987 = dma.done.wait (%p2492_p8), [#allocation11], 128  }
 0xc04   : > { %1989 = vsyncadd (%p2492_p8), [#allocation11], 4294967168 }
 0xc05 PF: > { %s22_s19 = sadd.s32 1, %s2000_s19   ;;  %s2533_s17 = sld [smem:[#allocation13_spill]] }
 0xc06   : > { %p19_p2 = scmp.ge.s32.totalorder %s22_s19, 4   ;;  %s2534_s18 = sld [smem:[#allocation14_spill]] }
 0xc08   :  { %21 = sbr.rel (!%p19_p2) target bundleno = 2 (0x2), region = 118 }
 0xc0d   :  { %1559 = vsyncpa [#allocation11], 1 }
 0xc0e   :  { %1561 = vsyncpa [#allocation11 + $0x1], 1 }

</bundles_post_ra>
